<compile_context>
chip_gen: v7x
topology: tpu7x:2x2x1
jax: 0.10.0
libtpu: 0.0.40
codegen_flags: <defaults>
</compile_context>

<pallas_src>
import functools

import jax
import jax.numpy as jnp
from jax import lax
from jax.experimental import pallas as pl
from jax.experimental.pallas import tpu as pltpu

_ACT_DTYPE = jnp.bfloat16     # inter-layer activation / MXU-input dtype
_MIN_PALLAS_M = 128           # below this, a Pallas launch costs more than the matmul
_MIN_PALLAS_N = 64            # below this, N-padding to 128 wastes more HBM than it saves


# ----------------------------------------------------------------------------- Pallas kernels

def _epilogue(y, act):
    if act == "relu":
        return jnp.maximum(y, 0.0)
    if act == "sigmoid":
        return jax.nn.sigmoid(y)
    return y


def _mm_kernel(x_ref, w_ref, b_ref, o_ref, acc_ref, *, act):
    @pl.when(pl.program_id(2) == 0)
    def _():
        acc_ref[...] = jnp.zeros_like(acc_ref)

    acc_ref[...] += jnp.dot(x_ref[...], w_ref[...], preferred_element_type=jnp.float32)

    @pl.when(pl.program_id(2) == pl.num_programs(2) - 1)
    def _():
        y = acc_ref[...] + b_ref[...]
        o_ref[...] = _epilogue(y, act).astype(o_ref.dtype)


def _mm_res_kernel(x_ref, w_ref, b_ref, r_ref, o_ref, acc_ref, *, act):
    @pl.when(pl.program_id(2) == 0)
    def _():
        acc_ref[...] = jnp.zeros_like(acc_ref)

    acc_ref[...] += jnp.dot(x_ref[...], w_ref[...], preferred_element_type=jnp.float32)

    @pl.when(pl.program_id(2) == pl.num_programs(2) - 1)
    def _():
        y = acc_ref[...] + b_ref[...] + r_ref[...].astype(jnp.float32)
        o_ref[...] = _epilogue(y, act).astype(o_ref.dtype)


# ----------------------------------------------------------------------------- matmul wrapper

def _round_up(v, m):
    return ((v + m - 1) // m) * m


def _choose_tile(dim, candidates, granule):
    """Pick the largest candidate tile that divides the (granule-)padded dim."""
    padded = _round_up(dim, granule)
    for c in candidates:
        if padded % c == 0:
            return c, padded
    fallback = candidates[-1]
    return fallback, _round_up(dim, fallback)


def fused_matmul(x, w, bias, act=None, residual=None, out_dtype=_ACT_DTYPE):
    """(M,K)@(K,N) + bias (+residual) (+relu/sigmoid).  BN scale already folded into w."""
    M, K = x.shape
    N = w.shape[1]
    bias = bias.reshape(1, N).astype(jnp.float32)

    if M < _MIN_PALLAS_M or N < _MIN_PALLAS_N:
        # Tiny matmuls (pooled CAM/SSAM/GFU tensors, very-low-res stages, classes=1 heads):
        # the XLA path beats a Pallas launch + lane padding here.
        y = jnp.dot(x.astype(jnp.float32), w.astype(jnp.float32)) + bias
        if residual is not None:
            y = y + residual.astype(jnp.float32)
        return _epilogue(y, act).astype(out_dtype)

    tm, Mp = _choose_tile(M, (512, 256, 128), 8)
    tk, Kp = _choose_tile(K, (512, 256, 128), 128)
    tn, Np = _choose_tile(N, (256, 128), 128)
    # v7x shards the "parallel" axes across its 2 TensorCores: guarantee >= 2 (M,N) tiles.
    while (Mp // tm) * (Np // tn) < 2 and tm > 128:
        tm //= 2

    xp = x.astype(_ACT_DTYPE)                       # no-op: activations are already bf16
    if (Mp, Kp) != (M, K):
        xp = jnp.pad(xp, ((0, Mp - M), (0, Kp - K)))
    wp = w.astype(jnp.float32)
    if (Kp, Np) != (K, N):
        wp = jnp.pad(wp, ((0, Kp - K), (0, Np - N)))
    wp = wp.astype(_ACT_DTYPE)                      # weights are jit constants -> folded
    bp = jnp.pad(bias, ((0, 0), (0, Np - N))) if Np != N else bias

    grid = (Mp // tm, Np // tn, Kp // tk)
    x_spec = pl.BlockSpec((tm, tk), lambda i, j, k: (i, k))
    w_spec = pl.BlockSpec((tk, tn), lambda i, j, k: (k, j))
    b_spec = pl.BlockSpec((1, tn), lambda i, j, k: (0, j))
    o_spec = pl.BlockSpec((tm, tn), lambda i, j, k: (i, j))
    cp = pltpu.CompilerParams(
        dimension_semantics=("parallel", "parallel", "arbitrary"))
    scratch = [pltpu.VMEM((tm, tn), jnp.float32)]

    if residual is None:
        out = pl.pallas_call(
            functools.partial(_mm_kernel, act=act),
            out_shape=jax.ShapeDtypeStruct((Mp, Np), out_dtype),
            grid_spec=pltpu.PrefetchScalarGridSpec(
                num_scalar_prefetch=0, grid=grid,
                in_specs=[x_spec, w_spec, b_spec],
                out_specs=o_spec, scratch_shapes=scratch),
            compiler_params=cp,
        )(xp, wp, bp)
    else:
        rp = residual.astype(_ACT_DTYPE)
        if (Mp, Np) != (M, N):
            rp = jnp.pad(rp, ((0, Mp - M), (0, Np - N)))
        r_spec = pl.BlockSpec((tm, tn), lambda i, j, k: (i, j))
        out = pl.pallas_call(
            functools.partial(_mm_res_kernel, act=act),
            out_shape=jax.ShapeDtypeStruct((Mp, Np), out_dtype),
            grid_spec=pltpu.PrefetchScalarGridSpec(
                num_scalar_prefetch=0, grid=grid,
                in_specs=[x_spec, w_spec, b_spec, r_spec],
                out_specs=o_spec, scratch_shapes=scratch),
            compiler_params=cp,
        )(xp, wp, bp, rp)

    if Mp != M or Np != N:
        out = out[:M, :N]
    return out


# ----------------------------------------------------------------------------- conv wrapper (glue)

def conv2d(x_nhwc, w, b, stride, padding, bn=None, act=None, residual=None):
    """NHWC conv; im2col in bf16 JAX, matmul+BN+act(+residual) fused in the Pallas kernel."""
    # TODO(synk): fold the kh*kw taps into the kernel's K grid axis (shifted, overlapping
    # input tiles per tap) instead of materializing the im2col expansion in HBM.
    cout, cin, kh, kw = w.shape
    x = x_nhwc.astype(_ACT_DTYPE)
    if padding:
        x = jnp.pad(x, ((0, 0), (padding, padding), (padding, padding), (0, 0)))
    B, Hp, Wp, C = x.shape
    Ho = (Hp - kh) // stride + 1
    Wo = (Wp - kw) // stride + 1
    if kh == 1 and kw == 1 and stride == 1:
        cols = x.reshape(B * Ho * Wo, C)
    else:
        patches = [x[:, i:i + (Ho - 1) * stride + 1:stride,
                     j:j + (Wo - 1) * stride + 1:stride, :]
                   for i in range(kh) for j in range(kw)]
        cols = jnp.concatenate(patches, axis=-1).reshape(B * Ho * Wo, kh * kw * C)

    w_mat = jnp.transpose(w, (2, 3, 1, 0)).reshape(kh * kw * cin, cout).astype(jnp.float32)
    if bn is not None:
        s = bn["gamma"] / jnp.sqrt(bn["var"] + bn["eps"])
        w_mat = w_mat * s[None, :]                 # fold BN scale into jit-constant weights
        bias = bn["beta"] + s * (b - bn["mean"])
    else:
        bias = b
    res = residual.reshape(B * Ho * Wo, cout) if residual is not None else None
    y = fused_matmul(cols, w_mat, bias, act=act, residual=res)
    return y.reshape(B, Ho, Wo, cout)


# ----------------------------------------------------------------------------- misc glue ops

def maxpool_3x3_s2_p1(x_nhwc):
    # TODO(synk): window reduction via lax.reduce_window (no clean Pallas equivalent here).
    neg_inf = jnp.array(-jnp.inf, dtype=x_nhwc.dtype)
    return lax.reduce_window(x_nhwc, neg_inf, lax.max,
                             (1, 3, 3, 1), (1, 2, 2, 1),
                             [(0, 0), (1, 1), (1, 1), (0, 0)])


def _interp_matrix(out_size, in_size):
    """Dense bilinear interpolation matrix (PyTorch align_corners=False semantics)."""
    i = jnp.arange(out_size, dtype=jnp.float32)
    src = (i + 0.5) * (in_size / out_size) - 0.5
    src = jnp.clip(src, 0.0, float(in_size - 1))
    i0 = jnp.clip(jnp.floor(src).astype(jnp.int32), 0, in_size - 1)
    i1 = jnp.minimum(i0 + 1, in_size - 1)
    frac = src - i0.astype(jnp.float32)
    rows = jnp.arange(out_size)
    m = jnp.zeros((out_size, in_size), jnp.float32)
    m = m.at[rows, i0].add(1.0 - frac)
    m = m.at[rows, i1].add(frac)
    return m


def bilinear_resize(x, out_h, out_w):
    """Bilinear resize as two small dense matmuls (MXU friendly, no TPU gathers)."""
    B, H, W, C = x.shape
    if (H, W) == (out_h, out_w):
        return x
    wy = _interp_matrix(out_h, H)
    wx = _interp_matrix(out_w, W)
    y = jnp.einsum("oh,bhwc->bowc", wy, x.astype(jnp.float32))
    y = jnp.einsum("pw,bowc->bopc", wx, y)
    return y.astype(x.dtype)


# ----------------------------------------------------------------------------- parameter builders

_KEY = [jax.random.PRNGKey(0)]


def next_key():
    _KEY[0], k = jax.random.split(_KEY[0])
    return k


def conv_params(cin, cout, k, bias=True):
    kw_, kb_ = jax.random.split(next_key())
    fan_in = cin * k * k
    # Conservative 0.5*Xavier(fan_in) init: with identity BatchNorm running stats,
    # He-scale random weights make the chained APF feature products overflow f32.
    std = 0.5 * (1.0 / fan_in) ** 0.5
    w = jax.random.normal(kw_, (cout, cin, k, k), jnp.float32) * std
    if bias:
        b = jax.random.normal(kb_, (cout,), jnp.float32) * 0.01
    else:
        b = jnp.zeros((cout,), jnp.float32)
    return w, b


def make_bn(c):
    return dict(gamma=jnp.ones((c,), jnp.float32), beta=jnp.zeros((c,), jnp.float32),
                mean=jnp.zeros((c,), jnp.float32), var=jnp.ones((c,), jnp.float32), eps=1e-5)


def make_conv_block(cin, cout, k, stride, padding, use_bn_act):
    w, b = conv_params(cin, cout, k, bias=True)
    return dict(w=w, b=b, bn=make_bn(cout), stride=stride, padding=padding, use_bn_act=use_bn_act)


def conv_block_fwd(p, x):
    if p["use_bn_act"]:
        return conv2d(x, p["w"], p["b"], p["stride"], p["padding"], bn=p["bn"], act="relu")
    return conv2d(x, p["w"], p["b"], p["stride"], p["padding"])


# ----------------------------------------------------------------------------- CAM / SSAM / APF / GFU

def make_cam(c):
    return dict(conv1=make_conv_block(c, c, 1, 1, 0, False),
                conv2=make_conv_block(c, c, 1, 1, 0, False))


def cam_fwd(p, x):
    g = jnp.mean(x.astype(jnp.float32), axis=(1, 2), keepdims=True)       # AdaptiveAvgPool2d(1)
    g = conv2d(g, p["conv1"]["w"], p["conv1"]["b"], 1, 0, act="relu")      # conv1 + relu
    g = conv2d(g, p["conv2"]["w"], p["conv2"]["b"], 1, 0, act="sigmoid")   # conv2 + sigmoid
    return x * g


def make_ssam(cin, cout):
    w, b = conv_params(cin, cout, 1, bias=True)
    return dict(w=w, b=b, bn_max=make_bn(cin), bn_avg=make_bn(cin),
                gamma=jnp.zeros((1,), jnp.float32))


def ssam_fwd(p, x):
    xf = x.astype(jnp.float32)
    max_pool = jnp.max(x, axis=2, keepdims=True)                 # F.max_pool2d(x, [1, W]) in NHWC
    avg_pool = jnp.mean(xf, axis=2, keepdims=True).astype(x.dtype)
    mp = conv2d(max_pool, p["w"], p["b"], 1, 0, bn=p["bn_max"]).astype(jnp.float32)
    ap = conv2d(avg_pool, p["w"], p["b"], 1, 0, bn=p["bn_avg"]).astype(jnp.float32)
    att = jax.nn.softmax(mp * ap, axis=-1)                       # softmax over channels (dim=1)
    f_scale = att * mp + att * ap
    gamma = p["gamma"].reshape(1, 1, 1, 1)
    return jnp.maximum(gamma * f_scale + (1.0 - gamma) * xf, 0.0).astype(x.dtype)


def make_apf(ch_high, ch_low, ch_out, classes=1):
    return dict(
        lateral_low=make_conv_block(ch_low, ch_high, 1, 1, 0, True),
        frb1=make_conv_block(ch_high * 2, ch_out, 1, 1, 0, True),
        frb2=make_conv_block(ch_out, ch_out, 3, 1, 1, True),
        fc_conv=make_conv_block(ch_high, ch_out, 3, 1, 1, True),
        fs_conv=make_conv_block(ch_high, ch_out, 3, 1, 1, True),
        cam=make_cam(ch_out),
        ssam=make_ssam(ch_out, ch_out),
        classifier=make_conv_block(ch_out, classes, 3, 1, 1, True),
        apf=make_conv_block(ch_out, ch_out, 3, 1, 1, True),
    )


def apf_fwd(p, x_high, x_low, compute_classifier=False):
    x_low = conv_block_fwd(p["lateral_low"], x_low)
    x_high = bilinear_resize(x_high, x_low.shape[1], x_low.shape[2])
    f_c = jnp.concatenate([x_low, x_high], axis=-1)
    f_r = conv_block_fwd(p["frb2"], conv_block_fwd(p["frb1"], f_c))
    f_a = conv_block_fwd(p["fc_conv"], x_low) * cam_fwd(p["cam"], f_r)
    f_b = conv_block_fwd(p["fs_conv"], x_high) * ssam_fwd(p["ssam"], f_r)
    f_out = f_a + f_b
    apf = conv_block_fwd(p["apf"], f_out)
    if compute_classifier:
        return apf, conv_block_fwd(p["classifier"], f_out)
    return apf, None                      # eval mode: cls5..cls2 are unused -> skipped


def make_gfu(apf_c, fab_c, out_c):
    return dict(apf_conv=make_conv_block(apf_c, out_c, 1, 1, 0, True),
                fab_conv=make_conv_block(fab_c, out_c, 1, 1, 0, False),
                out_conv=make_conv_block(out_c, out_c, 1, 1, 0, True))


def gfu_fwd(p, apf, fab):
    B, H, W, C = apf.shape
    apf = conv_block_fwd(p["apf_conv"], apf)
    fab = bilinear_resize(fab, H, W)
    fab = conv2d(fab, p["fab_conv"]["w"], p["fab_conv"]["b"], 1, 0, act="relu")   # conv + ReLU
    fab = jnp.mean(fab.astype(jnp.float32), axis=(1, 2), keepdims=True)           # AdaptiveAvgPool2d(1)
    f_out = (apf.astype(jnp.float32) + fab).astype(_ACT_DTYPE)
    return conv_block_fwd(p["out_conv"], f_out)


# ----------------------------------------------------------------------------- resnet18 backbone

def make_basic_block(cin, cout, stride):
    p = dict(conv1=conv_params(cin, cout, 3, bias=False), bn1=make_bn(cout),
             conv2=conv_params(cout, cout, 3, bias=False), bn2=make_bn(cout),
             stride=stride, down=None)
    if stride != 1 or cin != cout:
        p["down"] = dict(conv=conv_params(cin, cout, 1, bias=False), bn=make_bn(cout))
    return p


def basic_block_fwd(p, x):
    identity = x
    out = conv2d(x, p["conv1"][0], p["conv1"][1], p["stride"], 1, bn=p["bn1"], act="relu")
    if p["down"] is not None:
        identity = conv2d(x, p["down"]["conv"][0], p["down"]["conv"][1],
                          p["stride"], 0, bn=p["down"]["bn"])
    # conv2 + bn2 + residual add + relu fused into a single Pallas call
    return conv2d(out, p["conv2"][0], p["conv2"][1], 1, 1, bn=p["bn2"], act="relu",
                  residual=identity)


# ----------------------------------------------------------------------------- SSFPN

def make_ssfpn(classes=1):
    oc = 512  # resnet18
    return dict(
        conv1=conv_params(3, 64, 7, bias=False), bn1=make_bn(64),
        layer1=[make_basic_block(64, 64, 1), make_basic_block(64, 64, 1)],
        layer2=[make_basic_block(64, 128, 2), make_basic_block(128, 128, 1)],
        layer3=[make_basic_block(128, 256, 2), make_basic_block(256, 256, 1)],
        layer4=[make_basic_block(256, 512, 2), make_basic_block(512, 512, 1)],
        fab=make_conv_block(oc, oc // 2, 3, 1, 1, True),
        cfgb=make_conv_block(oc, oc, 3, 2, 1, True),
        apf5=make_apf(oc, oc, oc // 2, classes),
        apf4=make_apf(oc // 2, oc // 2, oc // 4, classes),
        apf3=make_apf(oc // 4, oc // 4, oc // 8, classes),
        apf2=make_apf(oc // 8, oc // 8, oc // 16, classes),
        gfu5=make_gfu(oc // 2, oc // 2, oc // 2),
        gfu4=make_gfu(oc // 4, oc // 2, oc // 4),
        gfu3=make_gfu(oc // 8, oc // 4, oc // 8),
        gfu2=make_gfu(oc // 16, oc // 8, oc // 16),
        classifier=make_conv_block(oc // 16, classes, 1, 1, 0, True),
    )


def ssfpn_fwd(p, x_nchw):
    """Eval-mode forward: BatchNorm uses running stats; returns `pre` only."""
    B, C, H, W = x_nchw.shape
    x = jnp.transpose(x_nchw, (0, 2, 3, 1))  # NCHW -> NHWC, once at the boundary
    x = conv2d(x, p["conv1"][0], p["conv1"][1], 2, 3, bn=p["bn1"], act="relu")
    x = maxpool_3x3_s2_p1(x)
    x2 = x
    for blk in p["layer1"]:
        x2 = basic_block_fwd(blk, x2)
    x3 = x2
    for blk in p["layer2"]:
        x3 = basic_block_fwd(blk, x3)
    x4 = x3
    for blk in p["layer3"]:
        x4 = basic_block_fwd(blk, x4)
    x5 = x4
    for blk in p["layer4"]:
        x5 = basic_block_fwd(blk, x5)

    cfgb = conv_block_fwd(p["cfgb"], x5)
    fab = conv_block_fwd(p["fab"], x5)

    apf5, _ = apf_fwd(p["apf5"], cfgb, x5)
    apf4, _ = apf_fwd(p["apf4"], apf5, x4)
    apf3, _ = apf_fwd(p["apf3"], apf4, x3)
    apf2, _ = apf_fwd(p["apf2"], apf3, x2)

    g5 = gfu_fwd(p["gfu5"], apf5, fab)
    g4 = gfu_fwd(p["gfu4"], apf4, g5)
    g3 = gfu_fwd(p["gfu3"], apf3, g4)
    g2 = gfu_fwd(p["gfu2"], apf2, g3)

    cls = conv_block_fwd(p["classifier"], g2)
    pre = bilinear_resize(cls, H, W)
    # (sup5..sup2 would be bilinear_resize(cls5..cls2) in training mode)
    return jnp.transpose(pre, (0, 3, 1, 2)).astype(jnp.float32)  # NHWC -> NCHW at the boundary


if __name__ == "__main__":
    key = jax.random.PRNGKey(0)
    x = jax.random.normal(key, (2, 3, 64, 64), jnp.float32)
    params = make_ssfpn(classes=1)
    fwd = jax.jit(lambda inp: ssfpn_fwd(params, inp))
    out = jax.block_until_ready(fwd(x))
    assert out.shape == (2, 1, 64, 64), out.shape
    assert bool(jnp.all(jnp.isfinite(out))), "non-finite output"
    print("KERNEL_OK")
</pallas_src>

<mosaic_0001>
module attributes {stable_mosaic.version = 11 : i64} {
  func.func private @main(%arg0: i32) attributes {dimension_semantics = [#tpu.dimension_semantics<core_parallel>], iteration_bounds = array<i64: 2>, tpu.core_type = #tpu.core_type<sc_scalar_subcore>, window_params = []} {
    return
  }
}

module attributes {stable_mosaic.version = 11 : i64} {
  func.func private @main(%arg0: i32) attributes {dimension_semantics = [#tpu.dimension_semantics<core_parallel>], iteration_bounds = array<i64: 2>, tpu.core_type = #tpu.core_type<sc_scalar_subcore>, window_params = []} {
    return
  }
}

module attributes {stable_mosaic.version = 11 : i64} {
  func.func @_mm_kernel(%arg0: i32, %arg1: i32, %arg2: i32, %arg3: memref<512x256xbf16, #tpu.memory_space<vmem>>, %arg4: memref<256x128xbf16, #tpu.memory_space<vmem>>, %arg5: memref<1x128xf32, #tpu.memory_space<vmem>>, %arg6: memref<512x128xbf16, #tpu.memory_space<vmem>>, %arg7: memref<512x128xf32, #tpu.memory_space<vmem>>) attributes {dimension_semantics = [#tpu.dimension_semantics<parallel>, #tpu.dimension_semantics<parallel>, #tpu.dimension_semantics<arbitrary>], iteration_bounds = array<i64: 4, 1, 1>, scalar_prefetch = 0 : i64, scratch_operands = 1 : i64, tpu.core_type = #tpu.core_type<tc>, window_params = [{transform_indices = @transform_0, window_bounds = array<i64: 512, 256>}, {transform_indices = @transform_1, window_bounds = array<i64: 256, 128>}, {transform_indices = @transform_2, window_bounds = array<i64: 1, 128>}, {transform_indices = @transform_3, window_bounds = array<i64: 512, 128>}]} {
    %c0_i32 = arith.constant 0 : i32
    %0 = arith.cmpi eq, %arg2, %c0_i32 : i32
    %1 = arith.extui %0 : i1 to i32
    %c0_i32_0 = arith.constant 0 : i32
    %2 = arith.cmpi ne, %1, %c0_i32_0 : i32
    scf.if %2 {
      %cst_10 = arith.constant 0.000000e+00 : f32
      %12 = vector.broadcast %cst_10 : f32 to vector<512x128xf32>
      %c0_11 = arith.constant 0 : index
      %c0_12 = arith.constant 0 : index
      %13 = vector.load %arg7[%c0_11, %c0_12] : memref<512x128xf32, #tpu.memory_space<vmem>>, vector<512x128xf32>
      tpu.vector_store %arg7[%c0_11, %c0_12], %12 {strides = array<i32>} : memref<512x128xf32, #tpu.memory_space<vmem>>, vector<512x128xf32>,
    } else {
    }
    %c0 = arith.constant 0 : index
    %c0_1 = arith.constant 0 : index
    %3 = vector.load %arg7[%c0, %c0_1] : memref<512x128xf32, #tpu.memory_space<vmem>>, vector<512x128xf32>
    %c0_2 = arith.constant 0 : index
    %c0_3 = arith.constant 0 : index
    %4 = vector.load %arg3[%c0_2, %c0_3] : memref<512x256xbf16, #tpu.memory_space<vmem>>, vector<512x256xbf16>
    %c0_4 = arith.constant 0 : index
    %c0_5 = arith.constant 0 : index
    %5 = vector.load %arg4[%c0_4, %c0_5] : memref<256x128xbf16, #tpu.memory_space<vmem>>, vector<256x128xbf16>
    %cst = arith.constant dense<0.000000e+00> : vector<512x128xf32>
    %6 = tpu.matmul %4, %5, %cst {dimension_numbers = #tpu.dot_dimension_numbers<[1], [0], [0], [1], [0, 0, 1, 1], [], []>} : vector<512x256xbf16>, vector<256x128xbf16>, vector<512x128xf32> -> vector<512x128xf32>
    %7 = arith.addf %3, %6 : vector<512x128xf32>
    %c0_6 = arith.constant 0 : index
    %c0_7 = arith.constant 0 : index
    %8 = vector.load %arg7[%c0_6, %c0_7] : memref<512x128xf32, #tpu.memory_space<vmem>>, vector<512x128xf32>
    tpu.vector_store %arg7[%c0_6, %c0_7], %7 {strides = array<i32>} : memref<512x128xf32, #tpu.memory_space<vmem>>, vector<512x128xf32>,
    %c0_i32_8 = arith.constant 0 : i32
    %9 = arith.cmpi eq, %arg2, %c0_i32_8 : i32
    %10 = arith.extui %9 : i1 to i32
    %c0_i32_9 = arith.constant 0 : i32
    %11 = arith.cmpi ne, %10, %c0_i32_9 : i32
    scf.if %11 {
      %c0_10 = arith.constant 0 : index
      %c0_11 = arith.constant 0 : index
      %12 = vector.load %arg7[%c0_10, %c0_11] : memref<512x128xf32, #tpu.memory_space<vmem>>, vector<512x128xf32>
      %c0_12 = arith.constant 0 : index
      %c0_13 = arith.constant 0 : index
      %13 = vector.load %arg5[%c0_12, %c0_13] : memref<1x128xf32, #tpu.memory_space<vmem>>, vector<1x128xf32>
      %14 = vector.broadcast %13 : vector<1x128xf32> to vector<512x128xf32>
      %15 = arith.addf %12, %14 : vector<512x128xf32>
      %cst_14 = arith.constant 0.000000e+00 : f32
      %16 = vector.broadcast %cst_14 : f32 to vector<512x128xf32>
      %17 = arith.maximumf %15, %16 : vector<512x128xf32>
      %18 = arith.truncf %17 : vector<512x128xf32> to vector<512x128xbf16>
      %c0_15 = arith.constant 0 : index
      %c0_16 = arith.constant 0 : index
      %19 = vector.load %arg6[%c0_15, %c0_16] : memref<512x128xbf16, #tpu.memory_space<vmem>>, vector<512x128xbf16>
      tpu.vector_store %arg6[%c0_15, %c0_16], %18 {strides = array<i32>} : memref<512x128xbf16, #tpu.memory_space<vmem>>, vector<512x128xbf16>,
    } else {
    }
    return
  }
  func.func @transform_0(%arg0: i32, %arg1: i32, %arg2: i32) -> (i32, i32) {
    %c0_i32 = arith.constant 0 : i32
    return %arg0, %arg2 : i32, i32
  }
  func.func @transform_1(%arg0: i32, %arg1: i32, %arg2: i32) -> (i32, i32) {
    %c0_i32 = arith.constant 0 : i32
    return %arg2, %arg1 : i32, i32
  }
  func.func @transform_2(%arg0: i32, %arg1: i32, %arg2: i32) -> (i32, i32) {
    %c0_i32 = arith.constant 0 : i32
    %c0_i32_0 = arith.constant 0 : i32
    return %c0_i32, %arg1 : i32, i32
  }
  func.func @transform_3(%arg0: i32, %arg1: i32, %arg2: i32) -> (i32, i32) {
    %c0_i32 = arith.constant 0 : i32
    return %arg0, %arg1 : i32, i32
  }
}

module attributes {stable_mosaic.version = 11 : i64} {
  func.func @_mm_kernel(%arg0: i32, %arg1: i32, %arg2: i32, %arg3: memref<256x128xbf16, #tpu.memory_space<vmem>>, %arg4: memref<128x128xbf16, #tpu.memory_space<vmem>>, %arg5: memref<1x128xf32, #tpu.memory_space<vmem>>, %arg6: memref<256x128xbf16, #tpu.memory_space<vmem>>, %arg7: memref<256x128xf32, #tpu.memory_space<vmem>>) attributes {dimension_semantics = [#tpu.dimension_semantics<parallel>, #tpu.dimension_semantics<parallel>, #tpu.dimension_semantics<arbitrary>], iteration_bounds = array<i64: 2, 1, 5>, scalar_prefetch = 0 : i64, scratch_operands = 1 : i64, tpu.core_type = #tpu.core_type<tc>, window_params = [{transform_indices = @transform_0, window_bounds = array<i64: 256, 128>}, {transform_indices = @transform_1, window_bounds = array<i64: 128, 128>}, {transform_indices = @transform_2, window_bounds = array<i64: 1, 128>}, {transform_indices = @transform_3, window_bounds = array<i64: 256, 128>}]} {
    %c0_i32 = arith.constant 0 : i32
    %0 = arith.cmpi eq, %arg2, %c0_i32 : i32
    %1 = arith.extui %0 : i1 to i32
    %c0_i32_0 = arith.constant 0 : i32
    %2 = arith.cmpi ne, %1, %c0_i32_0 : i32
    scf.if %2 {
      %cst_9 = arith.constant 0.000000e+00 : f32
      %12 = vector.broadcast %cst_9 : f32 to vector<256x128xf32>
      %c0_10 = arith.constant 0 : index
      %c0_11 = arith.constant 0 : index
      %13 = vector.load %arg7[%c0_10, %c0_11] : memref<256x128xf32, #tpu.memory_space<vmem>>, vector<256x128xf32>
      tpu.vector_store %arg7[%c0_10, %c0_11], %12 {strides = array<i32>} : memref<256x128xf32, #tpu.memory_space<vmem>>, vector<256x128xf32>,
    } else {
    }
    %c0 = arith.constant 0 : index
    %c0_1 = arith.constant 0 : index
    %3 = vector.load %arg7[%c0, %c0_1] : memref<256x128xf32, #tpu.memory_space<vmem>>, vector<256x128xf32>
    %c0_2 = arith.constant 0 : index
    %c0_3 = arith.constant 0 : index
    %4 = vector.load %arg3[%c0_2, %c0_3] : memref<256x128xbf16, #tpu.memory_space<vmem>>, vector<256x128xbf16>
    %c0_4 = arith.constant 0 : index
    %c0_5 = arith.constant 0 : index
    %5 = vector.load %arg4[%c0_4, %c0_5] : memref<128x128xbf16, #tpu.memory_space<vmem>>, vector<128x128xbf16>
    %cst = arith.constant dense<0.000000e+00> : vector<256x128xf32>
    %6 = tpu.matmul %4, %5, %cst {dimension_numbers = #tpu.dot_dimension_numbers<[1], [0], [0], [1], [0, 0, 1, 1], [], []>} : vector<256x128xbf16>, vector<128x128xbf16>, vector<256x128xf32> -> vector<256x128xf32>
    %7 = arith.addf %3, %6 : vector<256x128xf32>
    %c0_6 = arith.constant 0 : index
    %c0_7 = arith.constant 0 : index
    %8 = vector.load %arg7[%c0_6, %c0_7] : memref<256x128xf32, #tpu.memory_space<vmem>>, vector<256x128xf32>
    tpu.vector_store %arg7[%c0_6, %c0_7], %7 {strides = array<i32>} : memref<256x128xf32, #tpu.memory_space<vmem>>, vector<256x128xf32>,
    %c4_i32 = arith.constant 4 : i32
    %9 = arith.cmpi eq, %arg2, %c4_i32 : i32
    %10 = arith.extui %9 : i1 to i32
    %c0_i32_8 = arith.constant 0 : i32
    %11 = arith.cmpi ne, %10, %c0_i32_8 : i32
    scf.if %11 {
      %c0_9 = arith.constant 0 : index
      %c0_10 = arith.constant 0 : index
      %12 = vector.load %arg7[%c0_9, %c0_10] : memref<256x128xf32, #tpu.memory_space<vmem>>, vector<256x128xf32>
      %c0_11 = arith.constant 0 : index
      %c0_12 = arith.constant 0 : index
      %13 = vector.load %arg5[%c0_11, %c0_12] : memref<1x128xf32, #tpu.memory_space<vmem>>, vector<1x128xf32>
      %14 = vector.broadcast %13 : vector<1x128xf32> to vector<256x128xf32>
      %15 = arith.addf %12, %14 : vector<256x128xf32>
      %cst_13 = arith.constant 0.000000e+00 : f32
      %16 = vector.broadcast %cst_13 : f32 to vector<256x128xf32>
      %17 = arith.maximumf %15, %16 : vector<256x128xf32>
      %18 = arith.truncf %17 : vector<256x128xf32> to vector<256x128xbf16>
      %c0_14 = arith.constant 0 : index
      %c0_15 = arith.constant 0 : index
      %19 = vector.load %arg6[%c0_14, %c0_15] : memref<256x128xbf16, #tpu.memory_space<vmem>>, vector<256x128xbf16>
      tpu.vector_store %arg6[%c0_14, %c0_15], %18 {strides = array<i32>} : memref<256x128xbf16, #tpu.memory_space<vmem>>, vector<256x128xbf16>,
    } else {
    }
    return
  }
  func.func @transform_0(%arg0: i32, %arg1: i32, %arg2: i32) -> (i32, i32) {
    %c0_i32 = arith.constant 0 : i32
    return %arg0, %arg2 : i32, i32
  }
  func.func @transform_1(%arg0: i32, %arg1: i32, %arg2: i32) -> (i32, i32) {
    %c0_i32 = arith.constant 0 : i32
    return %arg2, %arg1 : i32, i32
  }
  func.func @transform_2(%arg0: i32, %arg1: i32, %arg2: i32) -> (i32, i32) {
    %c0_i32 = arith.constant 0 : i32
    %c0_i32_0 = arith.constant 0 : i32
    return %c0_i32, %arg1 : i32, i32
  }
  func.func @transform_3(%arg0: i32, %arg1: i32, %arg2: i32) -> (i32, i32) {
    %c0_i32 = arith.constant 0 : i32
    return %arg0, %arg1 : i32, i32
  }
}

module attributes {stable_mosaic.version = 11 : i64} {
  func.func @_mm_res_kernel(%arg0: i32, %arg1: i32, %arg2: i32, %arg3: memref<256x128xbf16, #tpu.memory_space<vmem>>, %arg4: memref<128x128xbf16, #tpu.memory_space<vmem>>, %arg5: memref<1x128xf32, #tpu.memory_space<vmem>>, %arg6: memref<256x128xbf16, #tpu.memory_space<vmem>>, %arg7: memref<256x128xbf16, #tpu.memory_space<vmem>>, %arg8: memref<256x128xf32, #tpu.memory_space<vmem>>) attributes {dimension_semantics = [#tpu.dimension_semantics<parallel>, #tpu.dimension_semantics<parallel>, #tpu.dimension_semantics<arbitrary>], iteration_bounds = array<i64: 2, 1, 5>, scalar_prefetch = 0 : i64, scratch_operands = 1 : i64, tpu.core_type = #tpu.core_type<tc>, window_params = [{transform_indices = @transform_0, window_bounds = array<i64: 256, 128>}, {transform_indices = @transform_1, window_bounds = array<i64: 128, 128>}, {transform_indices = @transform_2, window_bounds = array<i64: 1, 128>}, {transform_indices = @transform_3, window_bounds = array<i64: 256, 128>}, {transform_indices = @transform_4, window_bounds = array<i64: 256, 128>}]} {
    %c0_i32 = arith.constant 0 : i32
    %0 = arith.cmpi eq, %arg2, %c0_i32 : i32
    %1 = arith.extui %0 : i1 to i32
    %c0_i32_0 = arith.constant 0 : i32
    %2 = arith.cmpi ne, %1, %c0_i32_0 : i32
    scf.if %2 {
      %cst_9 = arith.constant 0.000000e+00 : f32
      %12 = vector.broadcast %cst_9 : f32 to vector<256x128xf32>
      %c0_10 = arith.constant 0 : index
      %c0_11 = arith.constant 0 : index
      %13 = vector.load %arg8[%c0_10, %c0_11] : memref<256x128xf32, #tpu.memory_space<vmem>>, vector<256x128xf32>
      tpu.vector_store %arg8[%c0_10, %c0_11], %12 {strides = array<i32>} : memref<256x128xf32, #tpu.memory_space<vmem>>, vector<256x128xf32>,
    } else {
    }
    %c0 = arith.constant 0 : index
    %c0_1 = arith.constant 0 : index
    %3 = vector.load %arg8[%c0, %c0_1] : memref<256x128xf32, #tpu.memory_space<vmem>>, vector<256x128xf32>
    %c0_2 = arith.constant 0 : index
    %c0_3 = arith.constant 0 : index
    %4 = vector.load %arg3[%c0_2, %c0_3] : memref<256x128xbf16, #tpu.memory_space<vmem>>, vector<256x128xbf16>
    %c0_4 = arith.constant 0 : index
    %c0_5 = arith.constant 0 : index
    %5 = vector.load %arg4[%c0_4, %c0_5] : memref<128x128xbf16, #tpu.memory_space<vmem>>, vector<128x128xbf16>
    %cst = arith.constant dense<0.000000e+00> : vector<256x128xf32>
    %6 = tpu.matmul %4, %5, %cst {dimension_numbers = #tpu.dot_dimension_numbers<[1], [0], [0], [1], [0, 0, 1, 1], [], []>} : vector<256x128xbf16>, vector<128x128xbf16>, vector<256x128xf32> -> vector<256x128xf32>
    %7 = arith.addf %3, %6 : vector<256x128xf32>
    %c0_6 = arith.constant 0 : index
    %c0_7 = arith.constant 0 : index
    %8 = vector.load %arg8[%c0_6, %c0_7] : memref<256x128xf32, #tpu.memory_space<vmem>>, vector<256x128xf32>
    tpu.vector_store %arg8[%c0_6, %c0_7], %7 {strides = array<i32>} : memref<256x128xf32, #tpu.memory_space<vmem>>, vector<256x128xf32>,
    %c4_i32 = arith.constant 4 : i32
    %9 = arith.cmpi eq, %arg2, %c4_i32 : i32
    %10 = arith.extui %9 : i1 to i32
    %c0_i32_8 = arith.constant 0 : i32
    %11 = arith.cmpi ne, %10, %c0_i32_8 : i32
    scf.if %11 {
      %c0_9 = arith.constant 0 : index
      %c0_10 = arith.constant 0 : index
      %12 = vector.load %arg8[%c0_9, %c0_10] : memref<256x128xf32, #tpu.memory_space<vmem>>, vector<256x128xf32>
      %c0_11 = arith.constant 0 : index
      %c0_12 = arith.constant 0 : index
      %13 = vector.load %arg5[%c0_11, %c0_12] : memref<1x128xf32, #tpu.memory_space<vmem>>, vector<1x128xf32>
      %14 = vector.broadcast %13 : vector<1x128xf32> to vector<256x128xf32>
      %15 = arith.addf %12, %14 : vector<256x128xf32>
      %c0_13 = arith.constant 0 : index
      %c0_14 = arith.constant 0 : index
      %16 = vector.load %arg6[%c0_13, %c0_14] : memref<256x128xbf16, #tpu.memory_space<vmem>>, vector<256x128xbf16>
      %17 = arith.extf %16 : vector<256x128xbf16> to vector<256x128xf32>
      %18 = arith.addf %15, %17 : vector<256x128xf32>
      %cst_15 = arith.constant 0.000000e+00 : f32
      %19 = vector.broadcast %cst_15 : f32 to vector<256x128xf32>
      %20 = arith.maximumf %18, %19 : vector<256x128xf32>
      %21 = arith.truncf %20 : vector<256x128xf32> to vector<256x128xbf16>
      %c0_16 = arith.constant 0 : index
      %c0_17 = arith.constant 0 : index
      %22 = vector.load %arg7[%c0_16, %c0_17] : memref<256x128xbf16, #tpu.memory_space<vmem>>, vector<256x128xbf16>
      tpu.vector_store %arg7[%c0_16, %c0_17], %21 {strides = array<i32>} : memref<256x128xbf16, #tpu.memory_space<vmem>>, vector<256x128xbf16>,
    } else {
    }
    return
  }
  func.func @transform_0(%arg0: i32, %arg1: i32, %arg2: i32) -> (i32, i32) {
    %c0_i32 = arith.constant 0 : i32
    return %arg0, %arg2 : i32, i32
  }
  func.func @transform_1(%arg0: i32, %arg1: i32, %arg2: i32) -> (i32, i32) {
    %c0_i32 = arith.constant 0 : i32
    return %arg2, %arg1 : i32, i32
  }
  func.func @transform_2(%arg0: i32, %arg1: i32, %arg2: i32) -> (i32, i32) {
    %c0_i32 = arith.constant 0 : i32
    %c0_i32_0 = arith.constant 0 : i32
    return %c0_i32, %arg1 : i32, i32
  }
  func.func @transform_3(%arg0: i32, %arg1: i32, %arg2: i32) -> (i32, i32) {
    %c0_i32 = arith.constant 0 : i32
    return %arg0, %arg1 : i32, i32
  }
  func.func @transform_4(%arg0: i32, %arg1: i32, %arg2: i32) -> (i32, i32) {
    %c0_i32 = arith.constant 0 : i32
    return %arg0, %arg1 : i32, i32
  }
}

module attributes {stable_mosaic.version = 11 : i64} {
  func.func @_mm_kernel(%arg0: i32, %arg1: i32, %arg2: i32, %arg3: memref<128x128xbf16, #tpu.memory_space<vmem>>, %arg4: memref<128x128xbf16, #tpu.memory_space<vmem>>, %arg5: memref<1x128xf32, #tpu.memory_space<vmem>>, %arg6: memref<128x128xbf16, #tpu.memory_space<vmem>>, %arg7: memref<128x128xf32, #tpu.memory_space<vmem>>) attributes {dimension_semantics = [#tpu.dimension_semantics<parallel>, #tpu.dimension_semantics<parallel>, #tpu.dimension_semantics<arbitrary>], iteration_bounds = array<i64: 1, 1, 5>, scalar_prefetch = 0 : i64, scratch_operands = 1 : i64, tpu.core_type = #tpu.core_type<tc>, window_params = [{transform_indices = @transform_0, window_bounds = array<i64: 128, 128>}, {transform_indices = @transform_1, window_bounds = array<i64: 128, 128>}, {transform_indices = @transform_2, window_bounds = array<i64: 1, 128>}, {transform_indices = @transform_3, window_bounds = array<i64: 128, 128>}]} {
    %c0_i32 = arith.constant 0 : i32
    %0 = arith.cmpi eq, %arg2, %c0_i32 : i32
    %1 = arith.extui %0 : i1 to i32
    %c0_i32_0 = arith.constant 0 : i32
    %2 = arith.cmpi ne, %1, %c0_i32_0 : i32
    scf.if %2 {
      %cst_9 = arith.constant 0.000000e+00 : f32
      %12 = vector.broadcast %cst_9 : f32 to vector<128x128xf32>
      %c0_10 = arith.constant 0 : index
      %c0_11 = arith.constant 0 : index
      %13 = vector.load %arg7[%c0_10, %c0_11] : memref<128x128xf32, #tpu.memory_space<vmem>>, vector<128x128xf32>
      tpu.vector_store %arg7[%c0_10, %c0_11], %12 {strides = array<i32>} : memref<128x128xf32, #tpu.memory_space<vmem>>, vector<128x128xf32>,
    } else {
    }
    %c0 = arith.constant 0 : index
    %c0_1 = arith.constant 0 : index
    %3 = vector.load %arg7[%c0, %c0_1] : memref<128x128xf32, #tpu.memory_space<vmem>>, vector<128x128xf32>
    %c0_2 = arith.constant 0 : index
    %c0_3 = arith.constant 0 : index
    %4 = vector.load %arg3[%c0_2, %c0_3] : memref<128x128xbf16, #tpu.memory_space<vmem>>, vector<128x128xbf16>
    %c0_4 = arith.constant 0 : index
    %c0_5 = arith.constant 0 : index
    %5 = vector.load %arg4[%c0_4, %c0_5] : memref<128x128xbf16, #tpu.memory_space<vmem>>, vector<128x128xbf16>
    %cst = arith.constant dense<0.000000e+00> : vector<128x128xf32>
    %6 = tpu.matmul %4, %5, %cst {dimension_numbers = #tpu.dot_dimension_numbers<[1], [0], [0], [1], [0, 0, 1, 1], [], []>} : vector<128x128xbf16>, vector<128x128xbf16>, vector<128x128xf32> -> vector<128x128xf32>
    %7 = arith.addf %3, %6 : vector<128x128xf32>
    %c0_6 = arith.constant 0 : index
    %c0_7 = arith.constant 0 : index
    %8 = vector.load %arg7[%c0_6, %c0_7] : memref<128x128xf32, #tpu.memory_space<vmem>>, vector<128x128xf32>
    tpu.vector_store %arg7[%c0_6, %c0_7], %7 {strides = array<i32>} : memref<128x128xf32, #tpu.memory_space<vmem>>, vector<128x128xf32>,
    %c4_i32 = arith.constant 4 : i32
    %9 = arith.cmpi eq, %arg2, %c4_i32 : i32
    %10 = arith.extui %9 : i1 to i32
    %c0_i32_8 = arith.constant 0 : i32
    %11 = arith.cmpi ne, %10, %c0_i32_8 : i32
    scf.if %11 {
      %c0_9 = arith.constant 0 : index
      %c0_10 = arith.constant 0 : index
      %12 = vector.load %arg7[%c0_9, %c0_10] : memref<128x128xf32, #tpu.memory_space<vmem>>, vector<128x128xf32>
      %c0_11 = arith.constant 0 : index
      %c0_12 = arith.constant 0 : index
      %13 = vector.load %arg5[%c0_11, %c0_12] : memref<1x128xf32, #tpu.memory_space<vmem>>, vector<1x128xf32>
      %14 = vector.broadcast %13 : vector<1x128xf32> to vector<128x128xf32>
      %15 = arith.addf %12, %14 : vector<128x128xf32>
      %cst_13 = arith.constant 0.000000e+00 : f32
      %16 = vector.broadcast %cst_13 : f32 to vector<128x128xf32>
      %17 = arith.maximumf %15, %16 : vector<128x128xf32>
      %18 = arith.truncf %17 : vector<128x128xf32> to vector<128x128xbf16>
      %c0_14 = arith.constant 0 : index
      %c0_15 = arith.constant 0 : index
      %19 = vector.load %arg6[%c0_14, %c0_15] : memref<128x128xbf16, #tpu.memory_space<vmem>>, vector<128x128xbf16>
      tpu.vector_store %arg6[%c0_14, %c0_15], %18 {strides = array<i32>} : memref<128x128xbf16, #tpu.memory_space<vmem>>, vector<128x128xbf16>,
    } else {
    }
    return
  }
  func.func @transform_0(%arg0: i32, %arg1: i32, %arg2: i32) -> (i32, i32) {
    %c0_i32 = arith.constant 0 : i32
    return %arg0, %arg2 : i32, i32
  }
  func.func @transform_1(%arg0: i32, %arg1: i32, %arg2: i32) -> (i32, i32) {
    %c0_i32 = arith.constant 0 : i32
    return %arg2, %arg1 : i32, i32
  }
  func.func @transform_2(%arg0: i32, %arg1: i32, %arg2: i32) -> (i32, i32) {
    %c0_i32 = arith.constant 0 : i32
    %c0_i32_0 = arith.constant 0 : i32
    return %c0_i32, %arg1 : i32, i32
  }
  func.func @transform_3(%arg0: i32, %arg1: i32, %arg2: i32) -> (i32, i32) {
    %c0_i32 = arith.constant 0 : i32
    return %arg0, %arg1 : i32, i32
  }
}

module attributes {stable_mosaic.version = 11 : i64} {
  func.func @_mm_kernel(%arg0: i32, %arg1: i32, %arg2: i32, %arg3: memref<128x128xbf16, #tpu.memory_space<vmem>>, %arg4: memref<128x128xbf16, #tpu.memory_space<vmem>>, %arg5: memref<1x128xf32, #tpu.memory_space<vmem>>, %arg6: memref<128x128xbf16, #tpu.memory_space<vmem>>, %arg7: memref<128x128xf32, #tpu.memory_space<vmem>>) attributes {dimension_semantics = [#tpu.dimension_semantics<parallel>, #tpu.dimension_semantics<parallel>, #tpu.dimension_semantics<arbitrary>], iteration_bounds = array<i64: 1, 1, 1>, scalar_prefetch = 0 : i64, scratch_operands = 1 : i64, tpu.core_type = #tpu.core_type<tc>, window_params = [{transform_indices = @transform_0, window_bounds = array<i64: 128, 128>}, {transform_indices = @transform_1, window_bounds = array<i64: 128, 128>}, {transform_indices = @transform_2, window_bounds = array<i64: 1, 128>}, {transform_indices = @transform_3, window_bounds = array<i64: 128, 128>}]} {
    %c0_i32 = arith.constant 0 : i32
    %0 = arith.cmpi eq, %arg2, %c0_i32 : i32
    %1 = arith.extui %0 : i1 to i32
    %c0_i32_0 = arith.constant 0 : i32
    %2 = arith.cmpi ne, %1, %c0_i32_0 : i32
    scf.if %2 {
      %cst_10 = arith.constant 0.000000e+00 : f32
      %12 = vector.broadcast %cst_10 : f32 to vector<128x128xf32>
      %c0_11 = arith.constant 0 : index
      %c0_12 = arith.constant 0 : index
      %13 = vector.load %arg7[%c0_11, %c0_12] : memref<128x128xf32, #tpu.memory_space<vmem>>, vector<128x128xf32>
      tpu.vector_store %arg7[%c0_11, %c0_12], %12 {strides = array<i32>} : memref<128x128xf32, #tpu.memory_space<vmem>>, vector<128x128xf32>,
    } else {
    }
    %c0 = arith.constant 0 : index
    %c0_1 = arith.constant 0 : index
    %3 = vector.load %arg7[%c0, %c0_1] : memref<128x128xf32, #tpu.memory_space<vmem>>, vector<128x128xf32>
    %c0_2 = arith.constant 0 : index
    %c0_3 = arith.constant 0 : index
    %4 = vector.load %arg3[%c0_2, %c0_3] : memref<128x128xbf16, #tpu.memory_space<vmem>>, vector<128x128xbf16>
    %c0_4 = arith.constant 0 : index
    %c0_5 = arith.constant 0 : index
    %5 = vector.load %arg4[%c0_4, %c0_5] : memref<128x128xbf16, #tpu.memory_space<vmem>>, vector<128x128xbf16>
    %cst = arith.constant dense<0.000000e+00> : vector<128x128xf32>
    %6 = tpu.matmul %4, %5, %cst {dimension_numbers = #tpu.dot_dimension_numbers<[1], [0], [0], [1], [0, 0, 1, 1], [], []>} : vector<128x128xbf16>, vector<128x128xbf16>, vector<128x128xf32> -> vector<128x128xf32>
    %7 = arith.addf %3, %6 : vector<128x128xf32>
    %c0_6 = arith.constant 0 : index
    %c0_7 = arith.constant 0 : index
    %8 = vector.load %arg7[%c0_6, %c0_7] : memref<128x128xf32, #tpu.memory_space<vmem>>, vector<128x128xf32>
    tpu.vector_store %arg7[%c0_6, %c0_7], %7 {strides = array<i32>} : memref<128x128xf32, #tpu.memory_space<vmem>>, vector<128x128xf32>,
    %c0_i32_8 = arith.constant 0 : i32
    %9 = arith.cmpi eq, %arg2, %c0_i32_8 : i32
    %10 = arith.extui %9 : i1 to i32
    %c0_i32_9 = arith.constant 0 : i32
    %11 = arith.cmpi ne, %10, %c0_i32_9 : i32
    scf.if %11 {
      %c0_10 = arith.constant 0 : index
      %c0_11 = arith.constant 0 : index
      %12 = vector.load %arg7[%c0_10, %c0_11] : memref<128x128xf32, #tpu.memory_space<vmem>>, vector<128x128xf32>
      %c0_12 = arith.constant 0 : index
      %c0_13 = arith.constant 0 : index
      %13 = vector.load %arg5[%c0_12, %c0_13] : memref<1x128xf32, #tpu.memory_space<vmem>>, vector<1x128xf32>
      %14 = vector.broadcast %13 : vector<1x128xf32> to vector<128x128xf32>
      %15 = arith.addf %12, %14 : vector<128x128xf32>
      %16 = arith.truncf %15 : vector<128x128xf32> to vector<128x128xbf16>
      %c0_14 = arith.constant 0 : index
      %c0_15 = arith.constant 0 : index
      %17 = vector.load %arg6[%c0_14, %c0_15] : memref<128x128xbf16, #tpu.memory_space<vmem>>, vector<128x128xbf16>
      tpu.vector_store %arg6[%c0_14, %c0_15], %16 {strides = array<i32>} : memref<128x128xbf16, #tpu.memory_space<vmem>>, vector<128x128xbf16>,
    } else {
    }
    return
  }
  func.func @transform_0(%arg0: i32, %arg1: i32, %arg2: i32) -> (i32, i32) {
    %c0_i32 = arith.constant 0 : i32
    return %arg0, %arg2 : i32, i32
  }
  func.func @transform_1(%arg0: i32, %arg1: i32, %arg2: i32) -> (i32, i32) {
    %c0_i32 = arith.constant 0 : i32
    return %arg2, %arg1 : i32, i32
  }
  func.func @transform_2(%arg0: i32, %arg1: i32, %arg2: i32) -> (i32, i32) {
    %c0_i32 = arith.constant 0 : i32
    %c0_i32_0 = arith.constant 0 : i32
    return %c0_i32, %arg1 : i32, i32
  }
  func.func @transform_3(%arg0: i32, %arg1: i32, %arg2: i32) -> (i32, i32) {
    %c0_i32 = arith.constant 0 : i32
    return %arg0, %arg1 : i32, i32
  }
}

module attributes {stable_mosaic.version = 11 : i64} {
  func.func @_mm_res_kernel(%arg0: i32, %arg1: i32, %arg2: i32, %arg3: memref<128x128xbf16, #tpu.memory_space<vmem>>, %arg4: memref<128x128xbf16, #tpu.memory_space<vmem>>, %arg5: memref<1x128xf32, #tpu.memory_space<vmem>>, %arg6: memref<128x128xbf16, #tpu.memory_space<vmem>>, %arg7: memref<128x128xbf16, #tpu.memory_space<vmem>>, %arg8: memref<128x128xf32, #tpu.memory_space<vmem>>) attributes {dimension_semantics = [#tpu.dimension_semantics<parallel>, #tpu.dimension_semantics<parallel>, #tpu.dimension_semantics<arbitrary>], iteration_bounds = array<i64: 1, 1, 9>, scalar_prefetch = 0 : i64, scratch_operands = 1 : i64, tpu.core_type = #tpu.core_type<tc>, window_params = [{transform_indices = @transform_0, window_bounds = array<i64: 128, 128>}, {transform_indices = @transform_1, window_bounds = array<i64: 128, 128>}, {transform_indices = @transform_2, window_bounds = array<i64: 1, 128>}, {transform_indices = @transform_3, window_bounds = array<i64: 128, 128>}, {transform_indices = @transform_4, window_bounds = array<i64: 128, 128>}]} {
    %c0_i32 = arith.constant 0 : i32
    %0 = arith.cmpi eq, %arg2, %c0_i32 : i32
    %1 = arith.extui %0 : i1 to i32
    %c0_i32_0 = arith.constant 0 : i32
    %2 = arith.cmpi ne, %1, %c0_i32_0 : i32
    scf.if %2 {
      %cst_9 = arith.constant 0.000000e+00 : f32
      %12 = vector.broadcast %cst_9 : f32 to vector<128x128xf32>
      %c0_10 = arith.constant 0 : index
      %c0_11 = arith.constant 0 : index
      %13 = vector.load %arg8[%c0_10, %c0_11] : memref<128x128xf32, #tpu.memory_space<vmem>>, vector<128x128xf32>
      tpu.vector_store %arg8[%c0_10, %c0_11], %12 {strides = array<i32>} : memref<128x128xf32, #tpu.memory_space<vmem>>, vector<128x128xf32>,
    } else {
    }
    %c0 = arith.constant 0 : index
    %c0_1 = arith.constant 0 : index
    %3 = vector.load %arg8[%c0, %c0_1] : memref<128x128xf32, #tpu.memory_space<vmem>>, vector<128x128xf32>
    %c0_2 = arith.constant 0 : index
    %c0_3 = arith.constant 0 : index
    %4 = vector.load %arg3[%c0_2, %c0_3] : memref<128x128xbf16, #tpu.memory_space<vmem>>, vector<128x128xbf16>
    %c0_4 = arith.constant 0 : index
    %c0_5 = arith.constant 0 : index
    %5 = vector.load %arg4[%c0_4, %c0_5] : memref<128x128xbf16, #tpu.memory_space<vmem>>, vector<128x128xbf16>
    %cst = arith.constant dense<0.000000e+00> : vector<128x128xf32>
    %6 = tpu.matmul %4, %5, %cst {dimension_numbers = #tpu.dot_dimension_numbers<[1], [0], [0], [1], [0, 0, 1, 1], [], []>} : vector<128x128xbf16>, vector<128x128xbf16>, vector<128x128xf32> -> vector<128x128xf32>
    %7 = arith.addf %3, %6 : vector<128x128xf32>
    %c0_6 = arith.constant 0 : index
    %c0_7 = arith.constant 0 : index
    %8 = vector.load %arg8[%c0_6, %c0_7] : memref<128x128xf32, #tpu.memory_space<vmem>>, vector<128x128xf32>
    tpu.vector_store %arg8[%c0_6, %c0_7], %7 {strides = array<i32>} : memref<128x128xf32, #tpu.memory_space<vmem>>, vector<128x128xf32>,
    %c8_i32 = arith.constant 8 : i32
    %9 = arith.cmpi eq, %arg2, %c8_i32 : i32
    %10 = arith.extui %9 : i1 to i32
    %c0_i32_8 = arith.constant 0 : i32
    %11 = arith.cmpi ne, %10, %c0_i32_8 : i32
    scf.if %11 {
      %c0_9 = arith.constant 0 : index
      %c0_10 = arith.constant 0 : index
      %12 = vector.load %arg8[%c0_9, %c0_10] : memref<128x128xf32, #tpu.memory_space<vmem>>, vector<128x128xf32>
      %c0_11 = arith.constant 0 : index
      %c0_12 = arith.constant 0 : index
      %13 = vector.load %arg5[%c0_11, %c0_12] : memref<1x128xf32, #tpu.memory_space<vmem>>, vector<1x128xf32>
      %14 = vector.broadcast %13 : vector<1x128xf32> to vector<128x128xf32>
      %15 = arith.addf %12, %14 : vector<128x128xf32>
      %c0_13 = arith.constant 0 : index
      %c0_14 = arith.constant 0 : index
      %16 = vector.load %arg6[%c0_13, %c0_14] : memref<128x128xbf16, #tpu.memory_space<vmem>>, vector<128x128xbf16>
      %17 = arith.extf %16 : vector<128x128xbf16> to vector<128x128xf32>
      %18 = arith.addf %15, %17 : vector<128x128xf32>
      %cst_15 = arith.constant 0.000000e+00 : f32
      %19 = vector.broadcast %cst_15 : f32 to vector<128x128xf32>
      %20 = arith.maximumf %18, %19 : vector<128x128xf32>
      %21 = arith.truncf %20 : vector<128x128xf32> to vector<128x128xbf16>
      %c0_16 = arith.constant 0 : index
      %c0_17 = arith.constant 0 : index
      %22 = vector.load %arg7[%c0_16, %c0_17] : memref<128x128xbf16, #tpu.memory_space<vmem>>, vector<128x128xbf16>
      tpu.vector_store %arg7[%c0_16, %c0_17], %21 {strides = array<i32>} : memref<128x128xbf16, #tpu.memory_space<vmem>>, vector<128x128xbf16>,
    } else {
    }
    return
  }
  func.func @transform_0(%arg0: i32, %arg1: i32, %arg2: i32) -> (i32, i32) {
    %c0_i32 = arith.constant 0 : i32
    return %arg0, %arg2 : i32, i32
  }
  func.func @transform_1(%arg0: i32, %arg1: i32, %arg2: i32) -> (i32, i32) {
    %c0_i32 = arith.constant 0 : i32
    return %arg2, %arg1 : i32, i32
  }
  func.func @transform_2(%arg0: i32, %arg1: i32, %arg2: i32) -> (i32, i32) {
    %c0_i32 = arith.constant 0 : i32
    %c0_i32_0 = arith.constant 0 : i32
    return %c0_i32, %arg1 : i32, i32
  }
  func.func @transform_3(%arg0: i32, %arg1: i32, %arg2: i32) -> (i32, i32) {
    %c0_i32 = arith.constant 0 : i32
    return %arg0, %arg1 : i32, i32
  }
  func.func @transform_4(%arg0: i32, %arg1: i32, %arg2: i32) -> (i32, i32) {
    %c0_i32 = arith.constant 0 : i32
    return %arg0, %arg1 : i32, i32
  }
}

module attributes {stable_mosaic.version = 11 : i64} {
  func.func @_mm_kernel(%arg0: i32, %arg1: i32, %arg2: i32, %arg3: memref<128x128xbf16, #tpu.memory_space<vmem>>, %arg4: memref<128x128xbf16, #tpu.memory_space<vmem>>, %arg5: memref<1x128xf32, #tpu.memory_space<vmem>>, %arg6: memref<128x128xbf16, #tpu.memory_space<vmem>>, %arg7: memref<128x128xf32, #tpu.memory_space<vmem>>) attributes {dimension_semantics = [#tpu.dimension_semantics<parallel>, #tpu.dimension_semantics<parallel>, #tpu.dimension_semantics<arbitrary>], iteration_bounds = array<i64: 1, 1, 9>, scalar_prefetch = 0 : i64, scratch_operands = 1 : i64, tpu.core_type = #tpu.core_type<tc>, window_params = [{transform_indices = @transform_0, window_bounds = array<i64: 128, 128>}, {transform_indices = @transform_1, window_bounds = array<i64: 128, 128>}, {transform_indices = @transform_2, window_bounds = array<i64: 1, 128>}, {transform_indices = @transform_3, window_bounds = array<i64: 128, 128>}]} {
    %c0_i32 = arith.constant 0 : i32
    %0 = arith.cmpi eq, %arg2, %c0_i32 : i32
    %1 = arith.extui %0 : i1 to i32
    %c0_i32_0 = arith.constant 0 : i32
    %2 = arith.cmpi ne, %1, %c0_i32_0 : i32
    scf.if %2 {
      %cst_9 = arith.constant 0.000000e+00 : f32
      %12 = vector.broadcast %cst_9 : f32 to vector<128x128xf32>
      %c0_10 = arith.constant 0 : index
      %c0_11 = arith.constant 0 : index
      %13 = vector.load %arg7[%c0_10, %c0_11] : memref<128x128xf32, #tpu.memory_space<vmem>>, vector<128x128xf32>
      tpu.vector_store %arg7[%c0_10, %c0_11], %12 {strides = array<i32>} : memref<128x128xf32, #tpu.memory_space<vmem>>, vector<128x128xf32>,
    } else {
    }
    %c0 = arith.constant 0 : index
    %c0_1 = arith.constant 0 : index
    %3 = vector.load %arg7[%c0, %c0_1] : memref<128x128xf32, #tpu.memory_space<vmem>>, vector<128x128xf32>
    %c0_2 = arith.constant 0 : index
    %c0_3 = arith.constant 0 : index
    %4 = vector.load %arg3[%c0_2, %c0_3] : memref<128x128xbf16, #tpu.memory_space<vmem>>, vector<128x128xbf16>
    %c0_4 = arith.constant 0 : index
    %c0_5 = arith.constant 0 : index
    %5 = vector.load %arg4[%c0_4, %c0_5] : memref<128x128xbf16, #tpu.memory_space<vmem>>, vector<128x128xbf16>
    %cst = arith.constant dense<0.000000e+00> : vector<128x128xf32>
    %6 = tpu.matmul %4, %5, %cst {dimension_numbers = #tpu.dot_dimension_numbers<[1], [0], [0], [1], [0, 0, 1, 1], [], []>} : vector<128x128xbf16>, vector<128x128xbf16>, vector<128x128xf32> -> vector<128x128xf32>
    %7 = arith.addf %3, %6 : vector<128x128xf32>
    %c0_6 = arith.constant 0 : index
    %c0_7 = arith.constant 0 : index
    %8 = vector.load %arg7[%c0_6, %c0_7] : memref<128x128xf32, #tpu.memory_space<vmem>>, vector<128x128xf32>
    tpu.vector_store %arg7[%c0_6, %c0_7], %7 {strides = array<i32>} : memref<128x128xf32, #tpu.memory_space<vmem>>, vector<128x128xf32>,
    %c8_i32 = arith.constant 8 : i32
    %9 = arith.cmpi eq, %arg2, %c8_i32 : i32
    %10 = arith.extui %9 : i1 to i32
    %c0_i32_8 = arith.constant 0 : i32
    %11 = arith.cmpi ne, %10, %c0_i32_8 : i32
    scf.if %11 {
      %c0_9 = arith.constant 0 : index
      %c0_10 = arith.constant 0 : index
      %12 = vector.load %arg7[%c0_9, %c0_10] : memref<128x128xf32, #tpu.memory_space<vmem>>, vector<128x128xf32>
      %c0_11 = arith.constant 0 : index
      %c0_12 = arith.constant 0 : index
      %13 = vector.load %arg5[%c0_11, %c0_12] : memref<1x128xf32, #tpu.memory_space<vmem>>, vector<1x128xf32>
      %14 = vector.broadcast %13 : vector<1x128xf32> to vector<128x128xf32>
      %15 = arith.addf %12, %14 : vector<128x128xf32>
      %cst_13 = arith.constant 0.000000e+00 : f32
      %16 = vector.broadcast %cst_13 : f32 to vector<128x128xf32>
      %17 = arith.maximumf %15, %16 : vector<128x128xf32>
      %18 = arith.truncf %17 : vector<128x128xf32> to vector<128x128xbf16>
      %c0_14 = arith.constant 0 : index
      %c0_15 = arith.constant 0 : index
      %19 = vector.load %arg6[%c0_14, %c0_15] : memref<128x128xbf16, #tpu.memory_space<vmem>>, vector<128x128xbf16>
      tpu.vector_store %arg6[%c0_14, %c0_15], %18 {strides = array<i32>} : memref<128x128xbf16, #tpu.memory_space<vmem>>, vector<128x128xbf16>,
    } else {
    }
    return
  }
  func.func @transform_0(%arg0: i32, %arg1: i32, %arg2: i32) -> (i32, i32) {
    %c0_i32 = arith.constant 0 : i32
    return %arg0, %arg2 : i32, i32
  }
  func.func @transform_1(%arg0: i32, %arg1: i32, %arg2: i32) -> (i32, i32) {
    %c0_i32 = arith.constant 0 : i32
    return %arg2, %arg1 : i32, i32
  }
  func.func @transform_2(%arg0: i32, %arg1: i32, %arg2: i32) -> (i32, i32) {
    %c0_i32 = arith.constant 0 : i32
    %c0_i32_0 = arith.constant 0 : i32
    return %c0_i32, %arg1 : i32, i32
  }
  func.func @transform_3(%arg0: i32, %arg1: i32, %arg2: i32) -> (i32, i32) {
    %c0_i32 = arith.constant 0 : i32
    return %arg0, %arg1 : i32, i32
  }
}

module attributes {stable_mosaic.version = 11 : i64} {
  func.func @_mm_kernel(%arg0: i32, %arg1: i32, %arg2: i32, %arg3: memref<128x128xbf16, #tpu.memory_space<vmem>>, %arg4: memref<128x128xbf16, #tpu.memory_space<vmem>>, %arg5: memref<1x128xf32, #tpu.memory_space<vmem>>, %arg6: memref<128x128xbf16, #tpu.memory_space<vmem>>, %arg7: memref<128x128xf32, #tpu.memory_space<vmem>>) attributes {dimension_semantics = [#tpu.dimension_semantics<parallel>, #tpu.dimension_semantics<parallel>, #tpu.dimension_semantics<arbitrary>], iteration_bounds = array<i64: 1, 1, 1>, scalar_prefetch = 0 : i64, scratch_operands = 1 : i64, tpu.core_type = #tpu.core_type<tc>, window_params = [{transform_indices = @transform_0, window_bounds = array<i64: 128, 128>}, {transform_indices = @transform_1, window_bounds = array<i64: 128, 128>}, {transform_indices = @transform_2, window_bounds = array<i64: 1, 128>}, {transform_indices = @transform_3, window_bounds = array<i64: 128, 128>}]} {
    %c0_i32 = arith.constant 0 : i32
    %0 = arith.cmpi eq, %arg2, %c0_i32 : i32
    %1 = arith.extui %0 : i1 to i32
    %c0_i32_0 = arith.constant 0 : i32
    %2 = arith.cmpi ne, %1, %c0_i32_0 : i32
    scf.if %2 {
      %cst_10 = arith.constant 0.000000e+00 : f32
      %12 = vector.broadcast %cst_10 : f32 to vector<128x128xf32>
      %c0_11 = arith.constant 0 : index
      %c0_12 = arith.constant 0 : index
      %13 = vector.load %arg7[%c0_11, %c0_12] : memref<128x128xf32, #tpu.memory_space<vmem>>, vector<128x128xf32>
      tpu.vector_store %arg7[%c0_11, %c0_12], %12 {strides = array<i32>} : memref<128x128xf32, #tpu.memory_space<vmem>>, vector<128x128xf32>,
    } else {
    }
    %c0 = arith.constant 0 : index
    %c0_1 = arith.constant 0 : index
    %3 = vector.load %arg7[%c0, %c0_1] : memref<128x128xf32, #tpu.memory_space<vmem>>, vector<128x128xf32>
    %c0_2 = arith.constant 0 : index
    %c0_3 = arith.constant 0 : index
    %4 = vector.load %arg3[%c0_2, %c0_3] : memref<128x128xbf16, #tpu.memory_space<vmem>>, vector<128x128xbf16>
    %c0_4 = arith.constant 0 : index
    %c0_5 = arith.constant 0 : index
    %5 = vector.load %arg4[%c0_4, %c0_5] : memref<128x128xbf16, #tpu.memory_space<vmem>>, vector<128x128xbf16>
    %cst = arith.constant dense<0.000000e+00> : vector<128x128xf32>
    %6 = tpu.matmul %4, %5, %cst {dimension_numbers = #tpu.dot_dimension_numbers<[1], [0], [0], [1], [0, 0, 1, 1], [], []>} : vector<128x128xbf16>, vector<128x128xbf16>, vector<128x128xf32> -> vector<128x128xf32>
    %7 = arith.addf %3, %6 : vector<128x128xf32>
    %c0_6 = arith.constant 0 : index
    %c0_7 = arith.constant 0 : index
    %8 = vector.load %arg7[%c0_6, %c0_7] : memref<128x128xf32, #tpu.memory_space<vmem>>, vector<128x128xf32>
    tpu.vector_store %arg7[%c0_6, %c0_7], %7 {strides = array<i32>} : memref<128x128xf32, #tpu.memory_space<vmem>>, vector<128x128xf32>,
    %c0_i32_8 = arith.constant 0 : i32
    %9 = arith.cmpi eq, %arg2, %c0_i32_8 : i32
    %10 = arith.extui %9 : i1 to i32
    %c0_i32_9 = arith.constant 0 : i32
    %11 = arith.cmpi ne, %10, %c0_i32_9 : i32
    scf.if %11 {
      %c0_10 = arith.constant 0 : index
      %c0_11 = arith.constant 0 : index
      %12 = vector.load %arg7[%c0_10, %c0_11] : memref<128x128xf32, #tpu.memory_space<vmem>>, vector<128x128xf32>
      %c0_12 = arith.constant 0 : index
      %c0_13 = arith.constant 0 : index
      %13 = vector.load %arg5[%c0_12, %c0_13] : memref<1x128xf32, #tpu.memory_space<vmem>>, vector<1x128xf32>
      %14 = vector.broadcast %13 : vector<1x128xf32> to vector<128x128xf32>
      %15 = arith.addf %12, %14 : vector<128x128xf32>
      %cst_14 = arith.constant 0.000000e+00 : f32
      %16 = vector.broadcast %cst_14 : f32 to vector<128x128xf32>
      %17 = arith.maximumf %15, %16 : vector<128x128xf32>
      %18 = arith.truncf %17 : vector<128x128xf32> to vector<128x128xbf16>
      %c0_15 = arith.constant 0 : index
      %c0_16 = arith.constant 0 : index
      %19 = vector.load %arg6[%c0_15, %c0_16] : memref<128x128xbf16, #tpu.memory_space<vmem>>, vector<128x128xbf16>
      tpu.vector_store %arg6[%c0_15, %c0_16], %18 {strides = array<i32>} : memref<128x128xbf16, #tpu.memory_space<vmem>>, vector<128x128xbf16>,
    } else {
    }
    return
  }
  func.func @transform_0(%arg0: i32, %arg1: i32, %arg2: i32) -> (i32, i32) {
    %c0_i32 = arith.constant 0 : i32
    return %arg0, %arg2 : i32, i32
  }
  func.func @transform_1(%arg0: i32, %arg1: i32, %arg2: i32) -> (i32, i32) {
    %c0_i32 = arith.constant 0 : i32
    return %arg2, %arg1 : i32, i32
  }
  func.func @transform_2(%arg0: i32, %arg1: i32, %arg2: i32) -> (i32, i32) {
    %c0_i32 = arith.constant 0 : i32
    %c0_i32_0 = arith.constant 0 : i32
    return %c0_i32, %arg1 : i32, i32
  }
  func.func @transform_3(%arg0: i32, %arg1: i32, %arg2: i32) -> (i32, i32) {
    %c0_i32 = arith.constant 0 : i32
    return %arg0, %arg1 : i32, i32
  }
}

module attributes {stable_mosaic.version = 11 : i64} {
  func.func @_mm_kernel(%arg0: i32, %arg1: i32, %arg2: i32, %arg3: memref<128x256xbf16, #tpu.memory_space<vmem>>, %arg4: memref<256x128xbf16, #tpu.memory_space<vmem>>, %arg5: memref<1x128xf32, #tpu.memory_space<vmem>>, %arg6: memref<128x128xbf16, #tpu.memory_space<vmem>>, %arg7: memref<128x128xf32, #tpu.memory_space<vmem>>) attributes {dimension_semantics = [#tpu.dimension_semantics<parallel>, #tpu.dimension_semantics<parallel>, #tpu.dimension_semantics<arbitrary>], iteration_bounds = array<i64: 1, 1, 1>, scalar_prefetch = 0 : i64, scratch_operands = 1 : i64, tpu.core_type = #tpu.core_type<tc>, window_params = [{transform_indices = @transform_0, window_bounds = array<i64: 128, 256>}, {transform_indices = @transform_1, window_bounds = array<i64: 256, 128>}, {transform_indices = @transform_2, window_bounds = array<i64: 1, 128>}, {transform_indices = @transform_3, window_bounds = array<i64: 128, 128>}]} {
    %c0_i32 = arith.constant 0 : i32
    %0 = arith.cmpi eq, %arg2, %c0_i32 : i32
    %1 = arith.extui %0 : i1 to i32
    %c0_i32_0 = arith.constant 0 : i32
    %2 = arith.cmpi ne, %1, %c0_i32_0 : i32
    scf.if %2 {
      %cst_10 = arith.constant 0.000000e+00 : f32
      %12 = vector.broadcast %cst_10 : f32 to vector<128x128xf32>
      %c0_11 = arith.constant 0 : index
      %c0_12 = arith.constant 0 : index
      %13 = vector.load %arg7[%c0_11, %c0_12] : memref<128x128xf32, #tpu.memory_space<vmem>>, vector<128x128xf32>
      tpu.vector_store %arg7[%c0_11, %c0_12], %12 {strides = array<i32>} : memref<128x128xf32, #tpu.memory_space<vmem>>, vector<128x128xf32>,
    } else {
    }
    %c0 = arith.constant 0 : index
    %c0_1 = arith.constant 0 : index
    %3 = vector.load %arg7[%c0, %c0_1] : memref<128x128xf32, #tpu.memory_space<vmem>>, vector<128x128xf32>
    %c0_2 = arith.constant 0 : index
    %c0_3 = arith.constant 0 : index
    %4 = vector.load %arg3[%c0_2, %c0_3] : memref<128x256xbf16, #tpu.memory_space<vmem>>, vector<128x256xbf16>
    %c0_4 = arith.constant 0 : index
    %c0_5 = arith.constant 0 : index
    %5 = vector.load %arg4[%c0_4, %c0_5] : memref<256x128xbf16, #tpu.memory_space<vmem>>, vector<256x128xbf16>
    %cst = arith.constant dense<0.000000e+00> : vector<128x128xf32>
    %6 = tpu.matmul %4, %5, %cst {dimension_numbers = #tpu.dot_dimension_numbers<[1], [0], [0], [1], [0, 0, 1, 1], [], []>} : vector<128x256xbf16>, vector<256x128xbf16>, vector<128x128xf32> -> vector<128x128xf32>
    %7 = arith.addf %3, %6 : vector<128x128xf32>
    %c0_6 = arith.constant 0 : index
    %c0_7 = arith.constant 0 : index
    %8 = vector.load %arg7[%c0_6, %c0_7] : memref<128x128xf32, #tpu.memory_space<vmem>>, vector<128x128xf32>
    tpu.vector_store %arg7[%c0_6, %c0_7], %7 {strides = array<i32>} : memref<128x128xf32, #tpu.memory_space<vmem>>, vector<128x128xf32>,
    %c0_i32_8 = arith.constant 0 : i32
    %9 = arith.cmpi eq, %arg2, %c0_i32_8 : i32
    %10 = arith.extui %9 : i1 to i32
    %c0_i32_9 = arith.constant 0 : i32
    %11 = arith.cmpi ne, %10, %c0_i32_9 : i32
    scf.if %11 {
      %c0_10 = arith.constant 0 : index
      %c0_11 = arith.constant 0 : index
      %12 = vector.load %arg7[%c0_10, %c0_11] : memref<128x128xf32, #tpu.memory_space<vmem>>, vector<128x128xf32>
      %c0_12 = arith.constant 0 : index
      %c0_13 = arith.constant 0 : index
      %13 = vector.load %arg5[%c0_12, %c0_13] : memref<1x128xf32, #tpu.memory_space<vmem>>, vector<1x128xf32>
      %14 = vector.broadcast %13 : vector<1x128xf32> to vector<128x128xf32>
      %15 = arith.addf %12, %14 : vector<128x128xf32>
      %cst_14 = arith.constant 0.000000e+00 : f32
      %16 = vector.broadcast %cst_14 : f32 to vector<128x128xf32>
      %17 = arith.maximumf %15, %16 : vector<128x128xf32>
      %18 = arith.truncf %17 : vector<128x128xf32> to vector<128x128xbf16>
      %c0_15 = arith.constant 0 : index
      %c0_16 = arith.constant 0 : index
      %19 = vector.load %arg6[%c0_15, %c0_16] : memref<128x128xbf16, #tpu.memory_space<vmem>>, vector<128x128xbf16>
      tpu.vector_store %arg6[%c0_15, %c0_16], %18 {strides = array<i32>} : memref<128x128xbf16, #tpu.memory_space<vmem>>, vector<128x128xbf16>,
    } else {
    }
    return
  }
  func.func @transform_0(%arg0: i32, %arg1: i32, %arg2: i32) -> (i32, i32) {
    %c0_i32 = arith.constant 0 : i32
    return %arg0, %arg2 : i32, i32
  }
  func.func @transform_1(%arg0: i32, %arg1: i32, %arg2: i32) -> (i32, i32) {
    %c0_i32 = arith.constant 0 : i32
    return %arg2, %arg1 : i32, i32
  }
  func.func @transform_2(%arg0: i32, %arg1: i32, %arg2: i32) -> (i32, i32) {
    %c0_i32 = arith.constant 0 : i32
    %c0_i32_0 = arith.constant 0 : i32
    return %c0_i32, %arg1 : i32, i32
  }
  func.func @transform_3(%arg0: i32, %arg1: i32, %arg2: i32) -> (i32, i32) {
    %c0_i32 = arith.constant 0 : i32
    return %arg0, %arg1 : i32, i32
  }
}

module attributes {stable_mosaic.version = 11 : i64} {
  func.func @_mm_kernel(%arg0: i32, %arg1: i32, %arg2: i32, %arg3: memref<256x128xbf16, #tpu.memory_space<vmem>>, %arg4: memref<128x128xbf16, #tpu.memory_space<vmem>>, %arg5: memref<1x128xf32, #tpu.memory_space<vmem>>, %arg6: memref<256x128xbf16, #tpu.memory_space<vmem>>, %arg7: memref<256x128xf32, #tpu.memory_space<vmem>>) attributes {dimension_semantics = [#tpu.dimension_semantics<parallel>, #tpu.dimension_semantics<parallel>, #tpu.dimension_semantics<arbitrary>], iteration_bounds = array<i64: 2, 1, 1>, scalar_prefetch = 0 : i64, scratch_operands = 1 : i64, tpu.core_type = #tpu.core_type<tc>, window_params = [{transform_indices = @transform_0, window_bounds = array<i64: 256, 128>}, {transform_indices = @transform_1, window_bounds = array<i64: 128, 128>}, {transform_indices = @transform_2, window_bounds = array<i64: 1, 128>}, {transform_indices = @transform_3, window_bounds = array<i64: 256, 128>}]} {
    %c0_i32 = arith.constant 0 : i32
    %0 = arith.cmpi eq, %arg2, %c0_i32 : i32
    %1 = arith.extui %0 : i1 to i32
    %c0_i32_0 = arith.constant 0 : i32
    %2 = arith.cmpi ne, %1, %c0_i32_0 : i32
    scf.if %2 {
      %cst_10 = arith.constant 0.000000e+00 : f32
      %12 = vector.broadcast %cst_10 : f32 to vector<256x128xf32>
      %c0_11 = arith.constant 0 : index
      %c0_12 = arith.constant 0 : index
      %13 = vector.load %arg7[%c0_11, %c0_12] : memref<256x128xf32, #tpu.memory_space<vmem>>, vector<256x128xf32>
      tpu.vector_store %arg7[%c0_11, %c0_12], %12 {strides = array<i32>} : memref<256x128xf32, #tpu.memory_space<vmem>>, vector<256x128xf32>,
    } else {
    }
    %c0 = arith.constant 0 : index
    %c0_1 = arith.constant 0 : index
    %3 = vector.load %arg7[%c0, %c0_1] : memref<256x128xf32, #tpu.memory_space<vmem>>, vector<256x128xf32>
    %c0_2 = arith.constant 0 : index
    %c0_3 = arith.constant 0 : index
    %4 = vector.load %arg3[%c0_2, %c0_3] : memref<256x128xbf16, #tpu.memory_space<vmem>>, vector<256x128xbf16>
    %c0_4 = arith.constant 0 : index
    %c0_5 = arith.constant 0 : index
    %5 = vector.load %arg4[%c0_4, %c0_5] : memref<128x128xbf16, #tpu.memory_space<vmem>>, vector<128x128xbf16>
    %cst = arith.constant dense<0.000000e+00> : vector<256x128xf32>
    %6 = tpu.matmul %4, %5, %cst {dimension_numbers = #tpu.dot_dimension_numbers<[1], [0], [0], [1], [0, 0, 1, 1], [], []>} : vector<256x128xbf16>, vector<128x128xbf16>, vector<256x128xf32> -> vector<256x128xf32>
    %7 = arith.addf %3, %6 : vector<256x128xf32>
    %c0_6 = arith.constant 0 : index
    %c0_7 = arith.constant 0 : index
    %8 = vector.load %arg7[%c0_6, %c0_7] : memref<256x128xf32, #tpu.memory_space<vmem>>, vector<256x128xf32>
    tpu.vector_store %arg7[%c0_6, %c0_7], %7 {strides = array<i32>} : memref<256x128xf32, #tpu.memory_space<vmem>>, vector<256x128xf32>,
    %c0_i32_8 = arith.constant 0 : i32
    %9 = arith.cmpi eq, %arg2, %c0_i32_8 : i32
    %10 = arith.extui %9 : i1 to i32
    %c0_i32_9 = arith.constant 0 : i32
    %11 = arith.cmpi ne, %10, %c0_i32_9 : i32
    scf.if %11 {
      %c0_10 = arith.constant 0 : index
      %c0_11 = arith.constant 0 : index
      %12 = vector.load %arg7[%c0_10, %c0_11] : memref<256x128xf32, #tpu.memory_space<vmem>>, vector<256x128xf32>
      %c0_12 = arith.constant 0 : index
      %c0_13 = arith.constant 0 : index
      %13 = vector.load %arg5[%c0_12, %c0_13] : memref<1x128xf32, #tpu.memory_space<vmem>>, vector<1x128xf32>
      %14 = vector.broadcast %13 : vector<1x128xf32> to vector<256x128xf32>
      %15 = arith.addf %12, %14 : vector<256x128xf32>
      %cst_14 = arith.constant 0.000000e+00 : f32
      %16 = vector.broadcast %cst_14 : f32 to vector<256x128xf32>
      %17 = arith.maximumf %15, %16 : vector<256x128xf32>
      %18 = arith.truncf %17 : vector<256x128xf32> to vector<256x128xbf16>
      %c0_15 = arith.constant 0 : index
      %c0_16 = arith.constant 0 : index
      %19 = vector.load %arg6[%c0_15, %c0_16] : memref<256x128xbf16, #tpu.memory_space<vmem>>, vector<256x128xbf16>
      tpu.vector_store %arg6[%c0_15, %c0_16], %18 {strides = array<i32>} : memref<256x128xbf16, #tpu.memory_space<vmem>>, vector<256x128xbf16>,
    } else {
    }
    return
  }
  func.func @transform_0(%arg0: i32, %arg1: i32, %arg2: i32) -> (i32, i32) {
    %c0_i32 = arith.constant 0 : i32
    return %arg0, %arg2 : i32, i32
  }
  func.func @transform_1(%arg0: i32, %arg1: i32, %arg2: i32) -> (i32, i32) {
    %c0_i32 = arith.constant 0 : i32
    return %arg2, %arg1 : i32, i32
  }
  func.func @transform_2(%arg0: i32, %arg1: i32, %arg2: i32) -> (i32, i32) {
    %c0_i32 = arith.constant 0 : i32
    %c0_i32_0 = arith.constant 0 : i32
    return %c0_i32, %arg1 : i32, i32
  }
  func.func @transform_3(%arg0: i32, %arg1: i32, %arg2: i32) -> (i32, i32) {
    %c0_i32 = arith.constant 0 : i32
    return %arg0, %arg1 : i32, i32
  }
}

</mosaic_0001>

<bundles_post_ra>
// kernel: _lambda_.20
= control target key start
LH: loop header
LB: loop body
LE: loop exit
PB: predicated region body
PF: predicated region fallthrough
CT: control target
= control target key end

     0   :  { %s2594_s12 = smov 0   ;;  %s2596_s13 = smov 0   ;;  %s2880_s0 = inlined_call_operand.vmem [shape: bf16[2048,256], index: 0, kind: input, shape index: {}]   ;;  %s2881_s1 = inlined_call_operand.vmem [shape: bf16[256,128], index: 1, kind: input, shape index: {}]   ;;  %s2882_s2 = inlined_call_operand.vmem [shape: f32[1,128], index: 2, kind: input, shape index: {}]   ;;  %s2883_s3 = inlined_call_operand.vmem [shape: bf16[2048,128], index: 3, kind: output, shape index: {}]  }
   0x1   :  { %s2598_s14 = smov 0  }
   0x2 LB: > { %s32_s15 = sadd.s32 1, %s2567_s13  ;;  %p1971_p0 = scmp.ge.s32.totalorder %s2571_s14, 1  ;;  %s2571_s14 = sphi %s2598_s14, %s13_s14   ;;  %s2567_s13 = sphi %s2596_s13, %s2885_s13   ;;  %s2563_s12 = sphi %s2594_s12, %s2884_s12  }
   0x3   : > { %p34_p1 = scmp.ge.s32.totalorder %s32_s15, 4  ;;  %p191_p2 = scmp.lt.s32.totalorder %s2571_s14, 5 }
   0x5   : > { %s2887_s15 = smov (%p34_p1, %s32_s15), 0  ;;  %p192_p3 = pnand %p1971_p0, %p191_p2 }
   0x6   : > { %v2437_v0 = vld [vmem:[%s2881_s1] sm:$0xff] (!%p192_p3)   ;;  %v2573_v1 = vmov (!%p192_p3), 0   ;;  %s1972_s18 = sshll.u32 (!%p192_p3), %s2563_s12, 6  ;;  %v2438_v2 = vld [vmem:[%s2881_s1 + $0x8] sm:$0xff] (!%p192_p3)   ;;  %v2439_v3 = vld [vmem:[%s2881_s1 + $0x10] sm:$0xff] (!%p192_p3)  }
   0x7   : > { %195 = sbr.rel (%p192_p3) target bundleno = 412 (0x19c), region = 32  ;;  %912 = vmatprep.subr.bf16.mxu0 (!%p192_p3), %v2573_v1  ;;  %2380 = vmatprep.subr.bf16.mxu1 (!%p192_p3), %v2573_v1  ;;  %p236_p4 = scmp.lt.s32.totalorder (!%p192_p3), %s1972_s18, 255  ;;  %v2440_v4 = vld [vmem:[%s2881_s1 + $0x18] sm:$0xff] (!%p192_p3)   ;;  %v2441_v5 = vld [vmem:[%s2881_s1 + $0x20] sm:$0xff] (!%p192_p3)   ;;  %v2442_v7 = vld [vmem:[%s2881_s1 + $0x28] sm:$0xff] (!%p192_p3)  }
   0x8   : > { %913 = vmatpush1.bf16.msra.mxu0 (!%p192_p3), %v2437_v0  ;;  %2396 = vmatpush1.bf16.msra.mxu1 (!%p192_p3), %v2437_v0  ;;  %v2443_v9 = vld [vmem:[%s2881_s1 + $0x30] sm:$0xff] (!%p192_p3)   ;;  %v2444_v10 = vld [vmem:[%s2881_s1 + $0x38] sm:$0xff] (!%p192_p3)   ;;  %v2445_v11 = vld [vmem:[%s2881_s1 + $0x40] sm:$0xff] (!%p192_p3)  }
   0x9   : > { %914 = vmatprep.subr.bf16.mxu0 (!%p192_p3), %v2573_v1  ;;  %2381 = vmatprep.subr.bf16.mxu1 (!%p192_p3), %v2573_v1  ;;  %v2446_v12 = vld [vmem:[%s2881_s1 + $0x48] sm:$0xff] (!%p192_p3)   ;;  %v2447_v13 = vld [vmem:[%s2881_s1 + $0x50] sm:$0xff] (!%p192_p3)   ;;  %v2448_v14 = vld [vmem:[%s2881_s1 + $0x58] sm:$0xff] (!%p192_p3)  }
   0xa   : > { %v2449_v15 = vld [vmem:[%s2881_s1 + $0x60] sm:$0xff] (!%p192_p3)   ;;  %v2450_v16 = vld [vmem:[%s2881_s1 + $0x68] sm:$0xff] (!%p192_p3)   ;;  %v2451_v17 = vld [vmem:[%s2881_s1 + $0x70] sm:$0xff] (!%p192_p3)  }
   0xb   : > { %v2452_v18 = vld [vmem:[%s2881_s1 + $0x78] sm:$0xff] (!%p192_p3)  }
   0xc   : > { %915 = vmatpush1.bf16.msra.mxu0 (!%p192_p3), %v2438_v2  ;;  %2397 = vmatpush1.bf16.msra.mxu1 (!%p192_p3), %v2438_v2 }
   0xd   : > { %916 = vmatprep.subr.bf16.mxu0 (!%p192_p3), %v2573_v1  ;;  %2382 = vmatprep.subr.bf16.mxu1 (!%p192_p3), %v2573_v1 }
   0xe   : > { %s2889_s18 = smov (!%p236_p4, %s1972_s18), 255 }
   0xf   : > { %s2124_s25 = sshll.u32 %s2889_s18, 3  ;;  %s1976_s6 = sshll.u32 %s2889_s18, 2 }
  0x10   : > { %917 = vmatpush1.bf16.msra.mxu0 %v2439_v3  ;;  %2398 = vmatpush1.bf16.msra.mxu1 %v2439_v3  ;;  %s2641_s30 = scalar_lea.vmem %s2880_s0, %s2124_s25  ;;  %s2777_s8 = scalar_lea.vmem %s2883_s3, %s1976_s6 }
  0x11   : > { %918 = vmatprep.subr.bf16.mxu0 %v2573_v1  ;;  %2383 = vmatprep.subr.bf16.mxu1 %v2573_v1  ;;  %v2455_v6 = vld [vmem:[%s2641_s30 + $0x4] ss:$8 sps:$4 sm:$0xff]   ;;  %v2453_v19 = vld [vmem:[%s2641_s30] ss:$8 sps:$4 sm:$0xff]   ;;  %v2459_v21 = vld [vmem:[%s2641_s30 + $0x14] ss:$8 sps:$4 sm:$0xff]  }
  0x12   : > { %v2458_v8 = vld [vmem:[%s2641_s30 + $0x104] ss:$8 sps:$4 sm:$0xff]   ;;  %944 = vmatprep.mubr.bf16.mxu0 %v2455_v6  ;;  %v2456_v20 = vld [vmem:[%s2641_s30 + $0x100] ss:$8 sps:$4 sm:$0xff]   ;;  %v2461_v22 = vld [vmem:[%s2641_s30 + $0x114] ss:$8 sps:$4 sm:$0xff]  }
  0x13   : > { %1072 = vmatprep.mubr.bf16.mxu1 %v2458_v8  ;;  %v2463_v23 = vld [vmem:[%s2641_s30 + $0x10] ss:$8 sps:$4 sm:$0xff]   ;;  %v2465_v25 = vld [vmem:[%s2641_s30 + $0x24] ss:$8 sps:$4 sm:$0xff]   ;;  %v2469_v27 = vld [vmem:[%s2641_s30 + $0x20] ss:$8 sps:$4 sm:$0xff]  }
  0x14   : > { %919 = vmatpush1.bf16.msra.mxu0 %v2440_v4  ;;  %2399 = vmatpush1.bf16.msra.mxu1 %v2440_v4  ;;  %v2464_v24 = vld [vmem:[%s2641_s30 + $0x110] ss:$8 sps:$4 sm:$0xff]   ;;  %v2467_v26 = vld [vmem:[%s2641_s30 + $0x124] ss:$8 sps:$4 sm:$0xff]   ;;  %v2470_v28 = vld [vmem:[%s2641_s30 + $0x120] ss:$8 sps:$4 sm:$0xff]  }
  0x15   : > { %920 = vmatprep.subr.bf16.mxu0 %v2573_v1  ;;  %2384 = vmatprep.subr.bf16.mxu1 %v2573_v1  ;;  %v2471_v29 = vld [vmem:[%s2641_s30 + $0x34] ss:$8 sps:$4 sm:$0xff]   ;;  %v2475_v31 = vld [vmem:[%s2641_s30 + $0x30] ss:$8 sps:$4 sm:$0xff]   ;;  %v2477_v33 = vld [vmem:[%s2641_s30 + $0x44] ss:$8 sps:$4 sm:$0xff]  }
  0x16   : > { %v2473_v30 = vld [vmem:[%s2641_s30 + $0x134] ss:$8 sps:$4 sm:$0xff]   ;;  %v2476_v32 = vld [vmem:[%s2641_s30 + $0x130] ss:$8 sps:$4 sm:$0xff]   ;;  %v2479_v34 = vld [vmem:[%s2641_s30 + $0x144] ss:$8 sps:$4 sm:$0xff]  }
  0x17   : > { %v2481_v35 = vld [vmem:[%s2641_s30 + $0x40] ss:$8 sps:$4 sm:$0xff]   ;;  %v2483_v37 = vld [vmem:[%s2641_s30 + $0x54] ss:$8 sps:$4 sm:$0xff]   ;;  %v2487_v39 = vld [vmem:[%s2641_s30 + $0x50] ss:$8 sps:$4 sm:$0xff]  }
  0x18   : > { %921 = vmatpush1.bf16.msra.mxu0 %v2441_v5  ;;  %2400 = vmatpush1.bf16.msra.mxu1 %v2441_v5  ;;  %v2482_v36 = vld [vmem:[%s2641_s30 + $0x140] ss:$8 sps:$4 sm:$0xff]   ;;  %v2485_v38 = vld [vmem:[%s2641_s30 + $0x154] ss:$8 sps:$4 sm:$0xff]   ;;  %v2488_v40 = vld [vmem:[%s2641_s30 + $0x150] ss:$8 sps:$4 sm:$0xff]  }
  0x19   : > { %922 = vmatprep.subr.bf16.mxu0 %v2573_v1  ;;  %2385 = vmatprep.subr.bf16.mxu1 %v2573_v1  ;;  %v2489_v41 = vld [vmem:[%s2641_s30 + $0x64] ss:$8 sps:$4 sm:$0xff]   ;;  %v2493_v43 = vld [vmem:[%s2641_s30 + $0x60] ss:$8 sps:$4 sm:$0xff]   ;;  %v2495_v45 = vld [vmem:[%s2641_s30 + $0x74] ss:$8 sps:$4 sm:$0xff]  }
  0x1a   : > { %v2491_v42 = vld [vmem:[%s2641_s30 + $0x164] ss:$8 sps:$4 sm:$0xff]   ;;  %v2494_v44 = vld [vmem:[%s2641_s30 + $0x160] ss:$8 sps:$4 sm:$0xff]   ;;  %v2497_v46 = vld [vmem:[%s2641_s30 + $0x174] ss:$8 sps:$4 sm:$0xff]  }
  0x1b   : > { %v2499_v47 = vld [vmem:[%s2641_s30 + $0x70] ss:$8 sps:$4 sm:$0xff]   ;;  %v2501_v49 = vld [vmem:[%s2641_s30 + $0x84] ss:$8 sps:$4 sm:$0xff]   ;;  %v2505_v51 = vld [vmem:[%s2641_s30 + $0x80] ss:$8 sps:$4 sm:$0xff]  }
  0x1c   : > { %923 = vmatpush1.bf16.msra.mxu0 %v2442_v7  ;;  %2401 = vmatpush1.bf16.msra.mxu1 %v2442_v7  ;;  %v2500_v48 = vld [vmem:[%s2641_s30 + $0x170] ss:$8 sps:$4 sm:$0xff]   ;;  %v2503_v50 = vld [vmem:[%s2641_s30 + $0x184] ss:$8 sps:$4 sm:$0xff]   ;;  %v2506_v52 = vld [vmem:[%s2641_s30 + $0x180] ss:$8 sps:$4 sm:$0xff]  }
  0x1d   : > { %924 = vmatprep.subr.bf16.mxu0 %v2573_v1  ;;  %2386 = vmatprep.subr.bf16.mxu1 %v2573_v1  ;;  %v2507_v53 = vld [vmem:[%s2641_s30 + $0x94] ss:$8 sps:$4 sm:$0xff]   ;;  %v2511_v55 = vld [vmem:[%s2641_s30 + $0x90] ss:$8 sps:$4 sm:$0xff]   ;;  %v2513_v57 = vld [vmem:[%s2641_s30 + $0xa4] ss:$8 sps:$4 sm:$0xff]  }
  0x1e   : > { %v2509_v54 = vld [vmem:[%s2641_s30 + $0x194] ss:$8 sps:$4 sm:$0xff]   ;;  %v2512_v56 = vld [vmem:[%s2641_s30 + $0x190] ss:$8 sps:$4 sm:$0xff]   ;;  %v2515_v58 = vld [vmem:[%s2641_s30 + $0x1a4] ss:$8 sps:$4 sm:$0xff]  }
  0x1f   : > { %v2517_v59 = vld [vmem:[%s2641_s30 + $0xa0] ss:$8 sps:$4 sm:$0xff]   ;;  %v2519_v61 = vld [vmem:[%s2641_s30 + $0xb4] ss:$8 sps:$4 sm:$0xff]   ;;  %v2523_v63 = vld [vmem:[%s2641_s30 + $0xb0] ss:$8 sps:$4 sm:$0xff]  }
  0x20   : > { %925 = vmatpush1.bf16.msra.mxu0 %v2443_v9  ;;  %2402 = vmatpush1.bf16.msra.mxu1 %v2443_v9  ;;  %v2518_v60 = vld [vmem:[%s2641_s30 + $0x1a0] ss:$8 sps:$4 sm:$0xff]   ;;  %v2521_v62 = vld [vmem:[%s2641_s30 + $0x1b4] ss:$8 sps:$4 sm:$0xff]   ;;  %v2524_v0 = vld [vmem:[%s2641_s30 + $0x1b0] ss:$8 sps:$4 sm:$0xff]  }
  0x21   : > { %926 = vmatprep.subr.bf16.mxu0 %v2573_v1  ;;  %2387 = vmatprep.subr.bf16.mxu1 %v2573_v1  ;;  %v2527_v2 = vld [vmem:[%s2641_s30 + $0x1c4] ss:$8 sps:$4 sm:$0xff]   ;;  %v2529_v3 = vld [vmem:[%s2641_s30 + $0xc0] ss:$8 sps:$4 sm:$0xff]   ;;  %v2531_v5 = vld [vmem:[%s2641_s30 + $0xd4] ss:$8 sps:$4 sm:$0xff]  }
  0x22   : > { %v2530_v4 = vld [vmem:[%s2641_s30 + $0x1c0] ss:$8 sps:$4 sm:$0xff]   ;;  %v2533_v6 = vld [vmem:[%s2641_s30 + $0x1d4] ss:$8 sps:$4 sm:$0xff]   ;;  %v2535_v7 = vld [vmem:[%s2641_s30 + $0xd0] ss:$8 sps:$4 sm:$0xff]  }
  0x23   : > { %v2536_v8 = vld [vmem:[%s2641_s30 + $0x1d0] ss:$8 sps:$4 sm:$0xff]   ;;  %v2537_v9 = vld [vmem:[%s2641_s30 + $0xe4] ss:$8 sps:$4 sm:$0xff]  }
  0x24   : > { %927 = vmatpush1.bf16.msra.mxu0 %v2444_v10  ;;  %2403 = vmatpush1.bf16.msra.mxu1 %v2444_v10  ;;  %v2539_v10 = vld [vmem:[%s2641_s30 + $0x1e4] ss:$8 sps:$4 sm:$0xff]  }
  0x25   : > { %928 = vmatprep.subr.bf16.mxu0 %v2573_v1  ;;  %2388 = vmatprep.subr.bf16.mxu1 %v2573_v1 }
  0x28   : > { %929 = vmatpush1.bf16.msra.mxu0 %v2445_v11  ;;  %2404 = vmatpush1.bf16.msra.mxu1 %v2445_v11  ;;  %v2541_v11 = vld [vmem:[%s2641_s30 + $0xe0] ss:$8 sps:$4 sm:$0xff]  }
  0x29   : > { %930 = vmatprep.subr.bf16.mxu0 %v2573_v1  ;;  %2389 = vmatprep.subr.bf16.mxu1 %v2573_v1 }
  0x2c   : > { %931 = vmatpush1.bf16.msra.mxu0 %v2446_v12  ;;  %2405 = vmatpush1.bf16.msra.mxu1 %v2446_v12  ;;  %v2542_v12 = vld [vmem:[%s2641_s30 + $0x1e0] ss:$8 sps:$4 sm:$0xff]  }
  0x2d   : > { %932 = vmatprep.subr.bf16.mxu0 %v2573_v1  ;;  %2390 = vmatprep.subr.bf16.mxu1 %v2573_v1 }
  0x30   : > { %933 = vmatpush1.bf16.msra.mxu0 %v2447_v13  ;;  %2406 = vmatpush1.bf16.msra.mxu1 %v2447_v13  ;;  %v2543_v13 = vld [vmem:[%s2641_s30 + $0xf4] ss:$8 sps:$4 sm:$0xff]  }
  0x31   : > { %934 = vmatprep.subr.bf16.mxu0 %v2573_v1  ;;  %2391 = vmatprep.subr.bf16.mxu1 %v2573_v1 }
  0x34   : > { %935 = vmatpush1.bf16.msra.mxu0 %v2448_v14  ;;  %2407 = vmatpush1.bf16.msra.mxu1 %v2448_v14  ;;  %v2545_v14 = vld [vmem:[%s2641_s30 + $0x1f4] ss:$8 sps:$4 sm:$0xff]  }
  0x35   : > { %936 = vmatprep.subr.bf16.mxu0 %v2573_v1  ;;  %2392 = vmatprep.subr.bf16.mxu1 %v2573_v1 }
  0x38   : > { %937 = vmatpush1.bf16.msra.mxu0 %v2449_v15  ;;  %2408 = vmatpush1.bf16.msra.mxu1 %v2449_v15  ;;  %v2547_v15 = vld [vmem:[%s2641_s30 + $0xf0] ss:$8 sps:$4 sm:$0xff]  }
  0x39   : > { %938 = vmatprep.subr.bf16.mxu0 %v2573_v1  ;;  %2393 = vmatprep.subr.bf16.mxu1 %v2573_v1 }
  0x3c   : > { %939 = vmatpush1.bf16.msra.mxu0 %v2450_v16  ;;  %2409 = vmatpush1.bf16.msra.mxu1 %v2450_v16  ;;  %v2548_v16 = vld [vmem:[%s2641_s30 + $0x1f0] ss:$8 sps:$4 sm:$0xff]  }
  0x3d   : > { %940 = vmatprep.subr.bf16.mxu0 %v2573_v1  ;;  %2394 = vmatprep.subr.bf16.mxu1 %v2573_v1 }
  0x40   : > { %941 = vmatpush1.bf16.msra.mxu0 %v2451_v17  ;;  %2410 = vmatpush1.bf16.msra.mxu1 %v2451_v17  ;;  %v2767_v17 = vld [vmem:[%s2882_s2] ss:$0 sm:$0xff] }
  0x41   : > { %942 = vmatprep.subr.bf16.mxu0 %v2573_v1  ;;  %2395 = vmatprep.subr.bf16.mxu1 %v2573_v1  ;;  %v2525_v1 = vld [vmem:[%s2641_s30 + $0xc4] ss:$8 sps:$4 sm:$0xff]  }
  0x44   : > { %943 = vmatpush1.bf16.msra.mxu0 %v2452_v18  ;;  %2411 = vmatpush1.bf16.msra.mxu1 %v2452_v18 }
  0x47   : > { %945 = vmatmul.mubr.bf16.vlgmr.msra.gmra.mrb[0].mxu0 %v2453_v19  ;;  %1073 = vmatmul.mubr.bf16.vlgmr.msra.gmra.mrb[0].mxu1 %v2456_v20 }
  0x48   : > { %952 = vmatprep.mubr.bf16.mxu0 %v2459_v21  ;;  %1080 = vmatprep.mubr.bf16.mxu1 %v2461_v22 }
  0x4f   : > { %953 = vmatmul.mubr.bf16.gmra.mrb[4].mxu0 %v2463_v23  ;;  %1081 = vmatmul.mubr.bf16.gmra.mrb[4].mxu1 %v2464_v24 }
  0x50   : > { %960 = vmatprep.mubr.bf16.mxu0 %v2465_v25  ;;  %1088 = vmatprep.mubr.bf16.mxu1 %v2467_v26 }
  0x57   : > { %961 = vmatmul.mubr.bf16.gmra.mrb[8].mxu0 %v2469_v27  ;;  %1089 = vmatmul.mubr.bf16.gmra.mrb[8].mxu1 %v2470_v28 }
  0x58   : > { %968 = vmatprep.mubr.bf16.mxu0 %v2471_v29  ;;  %1096 = vmatprep.mubr.bf16.mxu1 %v2473_v30 }
  0x5f   : > { %969 = vmatmul.mubr.bf16.gmra.mrb[12].mxu0 %v2475_v31  ;;  %1097 = vmatmul.mubr.bf16.gmra.mrb[12].mxu1 %v2476_v32 }
  0x60   : > { %976 = vmatprep.mubr.bf16.mxu0 %v2477_v33  ;;  %1104 = vmatprep.mubr.bf16.mxu1 %v2479_v34 }
  0x67   : > { %977 = vmatmul.mubr.bf16.gmra.mrb[16].mxu0 %v2481_v35  ;;  %1105 = vmatmul.mubr.bf16.gmra.mrb[16].mxu1 %v2482_v36 }
  0x68   : > { %984 = vmatprep.mubr.bf16.mxu0 %v2483_v37  ;;  %1112 = vmatprep.mubr.bf16.mxu1 %v2485_v38 }
  0x6f   : > { %985 = vmatmul.mubr.bf16.gmra.mrb[20].mxu0 %v2487_v39  ;;  %1113 = vmatmul.mubr.bf16.gmra.mrb[20].mxu1 %v2488_v40 }
  0x70   : > { %992 = vmatprep.mubr.bf16.mxu0 %v2489_v41  ;;  %1120 = vmatprep.mubr.bf16.mxu1 %v2491_v42 }
  0x77   : > { %993 = vmatmul.mubr.bf16.gmra.mrb[24].mxu0 %v2493_v43  ;;  %1121 = vmatmul.mubr.bf16.gmra.mrb[24].mxu1 %v2494_v44 }
  0x78   : > { %1000 = vmatprep.mubr.bf16.mxu0 %v2495_v45  ;;  %1128 = vmatprep.mubr.bf16.mxu1 %v2497_v46 }
  0x7f   : > { %1001 = vmatmul.mubr.bf16.gmra.mrb[28].mxu0 %v2499_v47  ;;  %1129 = vmatmul.mubr.bf16.gmra.mrb[28].mxu1 %v2500_v48 }
  0x80   : > { %1008 = vmatprep.mubr.bf16.mxu0 %v2501_v49  ;;  %1136 = vmatprep.mubr.bf16.mxu1 %v2503_v50 }
  0x87   : > { %1009 = vmatmul.mubr.bf16.gmra.mrb[32].mxu0 %v2505_v51  ;;  %1137 = vmatmul.mubr.bf16.gmra.mrb[32].mxu1 %v2506_v52 }
  0x88   : > { %1016 = vmatprep.mubr.bf16.mxu0 %v2507_v53  ;;  %1144 = vmatprep.mubr.bf16.mxu1 %v2509_v54 }
  0x8f   : > { %1017 = vmatmul.mubr.bf16.gmra.mrb[36].mxu0 %v2511_v55  ;;  %1145 = vmatmul.mubr.bf16.gmra.mrb[36].mxu1 %v2512_v56 }
  0x90   : > { %1024 = vmatprep.mubr.bf16.mxu0 %v2513_v57  ;;  %1152 = vmatprep.mubr.bf16.mxu1 %v2515_v58 }
  0x97   : > { %1025 = vmatmul.mubr.bf16.gmra.mrb[40].mxu0 %v2517_v59  ;;  %1153 = vmatmul.mubr.bf16.gmra.mrb[40].mxu1 %v2518_v60 }
  0x98   : > { %1032 = vmatprep.mubr.bf16.mxu0 %v2519_v61  ;;  %1160 = vmatprep.mubr.bf16.mxu1 %v2521_v62 }
  0x9f   : > { %1033 = vmatmul.mubr.bf16.gmra.mrb[44].mxu0 %v2523_v63  ;;  %1161 = vmatmul.mubr.bf16.gmra.mrb[44].mxu1 %v2524_v0 }
  0xa0   : > { %1040 = vmatprep.mubr.bf16.mxu0 %v2525_v1  ;;  %1168 = vmatprep.mubr.bf16.mxu1 %v2527_v2 }
  0xa7   : > { %1041 = vmatmul.mubr.bf16.gmra.mrb[48].mxu0 %v2529_v3  ;;  %1169 = vmatmul.mubr.bf16.gmra.mrb[48].mxu1 %v2530_v4 }
  0xa8   : > { %1048 = vmatprep.mubr.bf16.mxu0 %v2531_v5  ;;  %1176 = vmatprep.mubr.bf16.mxu1 %v2533_v6 }
  0xaf   : > { %1049 = vmatmul.mubr.bf16.gmra.mrb[52].mxu0 %v2535_v7  ;;  %1177 = vmatmul.mubr.bf16.gmra.mrb[52].mxu1 %v2536_v8 }
  0xb0   : > { %1056 = vmatprep.mubr.bf16.mxu0 %v2537_v9  ;;  %1184 = vmatprep.mubr.bf16.mxu1 %v2539_v10 }
  0xb7   : > { %1057 = vmatmul.mubr.bf16.gmra.mrb[56].mxu0 %v2541_v11  ;;  %1185 = vmatmul.mubr.bf16.gmra.mrb[56].mxu1 %v2542_v12 }
  0xb8   : > { %1064 = vmatprep.mubr.bf16.mxu0 %v2543_v13  ;;  %1192 = vmatprep.mubr.bf16.mxu1 %v2545_v14 }
  0xbf   : > { %1065 = vmatmul.mubr.bf16.gmra.mrb[60].mxu0 %v2547_v15  ;;  %1193 = vmatmul.mubr.bf16.gmra.mrb[60].mxu1 %v2548_v16 }
 0x11a   : > { %v946_v18 = vpop.f32.mrb[0].mxu0  ;;  %v1074_v19 = vpop.f32.mrb[0].mxu1 }
 0x11b   : > { %v1403_v20 = vadd.f32 %v2767_v17, %v946_v18  ;;  %v1435_v21 = vadd.f32 %v2767_v17, %v1074_v19  ;;  %v948_v22 = vpop.f32.mrb[1].mxu0  ;;  %v1076_v23 = vpop.f32.mrb[1].mxu1 }
 0x11c   : > { %v949_v24 = vpop.f32.mrb[2].mxu0  ;;  %v1077_v25 = vpop.f32.mrb[2].mxu1 }
 0x11d   : > { %v1404_v26 = vadd.f32 %v2767_v17, %v949_v24  ;;  %v1436_v27 = vadd.f32 %v2767_v17, %v1077_v25  ;;  %v951_v28 = vpop.f32.mrb[3].mxu0  ;;  %v1079_v29 = vpop.f32.mrb[3].mxu1  ;;  %v1467_v30 = vmax.f32 %v1403_v20, 0.0  ;;  %v1499_v31 = vmax.f32 %v1435_v21, 0.0 }
 0x11f   : > { %v1468_v32 = vmax.f32 %v1404_v26, 0.0  ;;  %v1500_v33 = vmax.f32 %v1436_v27, 0.0 }
 0x121   : > { %v2192_v34 = vpack.c.bf16 %v1468_v32, %v1467_v30  ;;  %v2272_v35 = vpack.c.bf16 %v1500_v33, %v1499_v31 }
 0x122   : > { %v954_v36 = vpop.f32.mrb[4].mxu0  ;;  %v1082_v37 = vpop.f32.mrb[4].mxu1 }
 0x123   : > { %2193 = vst [vmem:[%s2777_s8] sm:$0xff] %v2192_v34   ;;  %2364 = vst [vmem:[%s2777_s8 + $0x80] sm:$0xff] %v2272_v35   ;;  %v1405_v38 = vadd.f32 %v2767_v17, %v954_v36  ;;  %v1437_v39 = vadd.f32 %v2767_v17, %v1082_v37  ;;  %v956_v40 = vpop.f32.mrb[5].mxu0  ;;  %v1084_v41 = vpop.f32.mrb[5].mxu1 }
 0x124   : > { %v957_v42 = vpop.f32.mrb[6].mxu0  ;;  %v1085_v43 = vpop.f32.mrb[6].mxu1 }
 0x125   : > { %v1406_v44 = vadd.f32 %v2767_v17, %v957_v42  ;;  %v1438_v45 = vadd.f32 %v2767_v17, %v1085_v43  ;;  %v959_v46 = vpop.f32.mrb[7].mxu0  ;;  %v1087_v47 = vpop.f32.mrb[7].mxu1  ;;  %v1469_v48 = vmax.f32 %v1405_v38, 0.0  ;;  %v1501_v49 = vmax.f32 %v1437_v39, 0.0 }
 0x127   : > { %v1470_v50 = vmax.f32 %v1406_v44, 0.0  ;;  %v1502_v51 = vmax.f32 %v1438_v45, 0.0 }
 0x129   : > { %v2197_v52 = vpack.c.bf16 %v1470_v50, %v1469_v48  ;;  %v2277_v53 = vpack.c.bf16 %v1502_v51, %v1501_v49 }
 0x12a   : > { %v962_v54 = vpop.f32.mrb[8].mxu0  ;;  %v1090_v55 = vpop.f32.mrb[8].mxu1 }
 0x12b   : > { %2349 = vst [vmem:[%s2777_s8 + $0x8] sm:$0xff] %v2197_v52   ;;  %2365 = vst [vmem:[%s2777_s8 + $0x88] sm:$0xff] %v2277_v53   ;;  %v1407_v56 = vadd.f32 %v2767_v17, %v962_v54  ;;  %v1439_v57 = vadd.f32 %v2767_v17, %v1090_v55  ;;  %v964_v58 = vpop.f32.mrb[9].mxu0  ;;  %v1092_v59 = vpop.f32.mrb[9].mxu1 }
 0x12c   : > { %v965_v60 = vpop.f32.mrb[10].mxu0  ;;  %v1093_v61 = vpop.f32.mrb[10].mxu1 }
 0x12d   : > { %v1408_v62 = vadd.f32 %v2767_v17, %v965_v60  ;;  %v1440_v63 = vadd.f32 %v2767_v17, %v1093_v61  ;;  %v967_v0 = vpop.f32.mrb[11].mxu0  ;;  %v1095_v1 = vpop.f32.mrb[11].mxu1  ;;  %v1471_v2 = vmax.f32 %v1407_v56, 0.0  ;;  %v1503_v3 = vmax.f32 %v1439_v57, 0.0 }
 0x12f   : > { %v1472_v4 = vmax.f32 %v1408_v62, 0.0  ;;  %v1504_v5 = vmax.f32 %v1440_v63, 0.0 }
 0x131   : > { %v2202_v6 = vpack.c.bf16 %v1472_v4, %v1471_v2  ;;  %v2282_v7 = vpack.c.bf16 %v1504_v5, %v1503_v3 }
 0x132   : > { %v970_v8 = vpop.f32.mrb[12].mxu0  ;;  %v1098_v9 = vpop.f32.mrb[12].mxu1 }
 0x133   : > { %2350 = vst [vmem:[%s2777_s8 + $0x10] sm:$0xff] %v2202_v6   ;;  %2366 = vst [vmem:[%s2777_s8 + $0x90] sm:$0xff] %v2282_v7   ;;  %v1409_v10 = vadd.f32 %v2767_v17, %v970_v8  ;;  %v1441_v11 = vadd.f32 %v2767_v17, %v1098_v9  ;;  %v972_v12 = vpop.f32.mrb[13].mxu0  ;;  %v1100_v13 = vpop.f32.mrb[13].mxu1 }
 0x134   : > { %v973_v14 = vpop.f32.mrb[14].mxu0  ;;  %v1101_v15 = vpop.f32.mrb[14].mxu1 }
 0x135   : > { %v1410_v16 = vadd.f32 %v2767_v17, %v973_v14  ;;  %v1442_v18 = vadd.f32 %v2767_v17, %v1101_v15  ;;  %v975_v19 = vpop.f32.mrb[15].mxu0  ;;  %v1103_v20 = vpop.f32.mrb[15].mxu1  ;;  %v1473_v21 = vmax.f32 %v1409_v10, 0.0  ;;  %v1505_v22 = vmax.f32 %v1441_v11, 0.0 }
 0x137   : > { %v1474_v23 = vmax.f32 %v1410_v16, 0.0  ;;  %v1506_v24 = vmax.f32 %v1442_v18, 0.0 }
 0x139   : > { %v2207_v25 = vpack.c.bf16 %v1474_v23, %v1473_v21  ;;  %v2287_v26 = vpack.c.bf16 %v1506_v24, %v1505_v22 }
 0x13a   : > { %v978_v27 = vpop.f32.mrb[16].mxu0  ;;  %v1106_v28 = vpop.f32.mrb[16].mxu1 }
 0x13b   : > { %2351 = vst [vmem:[%s2777_s8 + $0x18] sm:$0xff] %v2207_v25   ;;  %2367 = vst [vmem:[%s2777_s8 + $0x98] sm:$0xff] %v2287_v26   ;;  %v1411_v29 = vadd.f32 %v2767_v17, %v978_v27  ;;  %v1443_v30 = vadd.f32 %v2767_v17, %v1106_v28  ;;  %v980_v31 = vpop.f32.mrb[17].mxu0  ;;  %v1108_v32 = vpop.f32.mrb[17].mxu1 }
 0x13c   : > { %v981_v33 = vpop.f32.mrb[18].mxu0  ;;  %v1109_v34 = vpop.f32.mrb[18].mxu1 }
 0x13d   : > { %v1412_v35 = vadd.f32 %v2767_v17, %v981_v33  ;;  %v1444_v36 = vadd.f32 %v2767_v17, %v1109_v34  ;;  %v983_v37 = vpop.f32.mrb[19].mxu0  ;;  %v1111_v38 = vpop.f32.mrb[19].mxu1  ;;  %v1475_v39 = vmax.f32 %v1411_v29, 0.0  ;;  %v1507_v40 = vmax.f32 %v1443_v30, 0.0 }
 0x13f   : > { %v1476_v41 = vmax.f32 %v1412_v35, 0.0  ;;  %v1508_v42 = vmax.f32 %v1444_v36, 0.0 }
 0x141   : > { %v2212_v43 = vpack.c.bf16 %v1476_v41, %v1475_v39  ;;  %v2292_v44 = vpack.c.bf16 %v1508_v42, %v1507_v40 }
 0x142   : > { %v986_v45 = vpop.f32.mrb[20].mxu0  ;;  %v1114_v46 = vpop.f32.mrb[20].mxu1 }
 0x143   : > { %2352 = vst [vmem:[%s2777_s8 + $0x20] sm:$0xff] %v2212_v43   ;;  %2368 = vst [vmem:[%s2777_s8 + $0xa0] sm:$0xff] %v2292_v44   ;;  %v1413_v47 = vadd.f32 %v2767_v17, %v986_v45  ;;  %v1445_v48 = vadd.f32 %v2767_v17, %v1114_v46  ;;  %v988_v49 = vpop.f32.mrb[21].mxu0  ;;  %v1116_v50 = vpop.f32.mrb[21].mxu1 }
 0x144   : > { %v989_v51 = vpop.f32.mrb[22].mxu0  ;;  %v1117_v52 = vpop.f32.mrb[22].mxu1 }
 0x145   : > { %v1414_v53 = vadd.f32 %v2767_v17, %v989_v51  ;;  %v1446_v54 = vadd.f32 %v2767_v17, %v1117_v52  ;;  %v991_v55 = vpop.f32.mrb[23].mxu0  ;;  %v1119_v56 = vpop.f32.mrb[23].mxu1  ;;  %v1477_v57 = vmax.f32 %v1413_v47, 0.0  ;;  %v1509_v58 = vmax.f32 %v1445_v48, 0.0 }
 0x147   : > { %v1478_v59 = vmax.f32 %v1414_v53, 0.0  ;;  %v1510_v60 = vmax.f32 %v1446_v54, 0.0 }
 0x149   : > { %v2217_v61 = vpack.c.bf16 %v1478_v59, %v1477_v57  ;;  %v2297_v62 = vpack.c.bf16 %v1510_v60, %v1509_v58 }
 0x14a   : > { %v994_v63 = vpop.f32.mrb[24].mxu0  ;;  %v1122_v0 = vpop.f32.mrb[24].mxu1 }
 0x14b   : > { %2353 = vst [vmem:[%s2777_s8 + $0x28] sm:$0xff] %v2217_v61   ;;  %2369 = vst [vmem:[%s2777_s8 + $0xa8] sm:$0xff] %v2297_v62   ;;  %v1415_v1 = vadd.f32 %v2767_v17, %v994_v63  ;;  %v1447_v2 = vadd.f32 %v2767_v17, %v1122_v0  ;;  %v996_v3 = vpop.f32.mrb[25].mxu0  ;;  %v1124_v4 = vpop.f32.mrb[25].mxu1 }
 0x14c   : > { %v997_v5 = vpop.f32.mrb[26].mxu0  ;;  %v1125_v6 = vpop.f32.mrb[26].mxu1 }
 0x14d   : > { %v1416_v7 = vadd.f32 %v2767_v17, %v997_v5  ;;  %v1448_v8 = vadd.f32 %v2767_v17, %v1125_v6  ;;  %v999_v9 = vpop.f32.mrb[27].mxu0  ;;  %v1127_v10 = vpop.f32.mrb[27].mxu1  ;;  %v1479_v11 = vmax.f32 %v1415_v1, 0.0  ;;  %v1511_v12 = vmax.f32 %v1447_v2, 0.0 }
 0x14f   : > { %v1480_v13 = vmax.f32 %v1416_v7, 0.0  ;;  %v1512_v14 = vmax.f32 %v1448_v8, 0.0 }
 0x151   : > { %v2222_v15 = vpack.c.bf16 %v1480_v13, %v1479_v11  ;;  %v2302_v16 = vpack.c.bf16 %v1512_v14, %v1511_v12 }
 0x152   : > { %v1002_v18 = vpop.f32.mrb[28].mxu0  ;;  %v1130_v19 = vpop.f32.mrb[28].mxu1 }
 0x153   : > { %2354 = vst [vmem:[%s2777_s8 + $0x30] sm:$0xff] %v2222_v15   ;;  %2370 = vst [vmem:[%s2777_s8 + $0xb0] sm:$0xff] %v2302_v16   ;;  %v1417_v20 = vadd.f32 %v2767_v17, %v1002_v18  ;;  %v1449_v21 = vadd.f32 %v2767_v17, %v1130_v19  ;;  %v1004_v22 = vpop.f32.mrb[29].mxu0  ;;  %v1132_v23 = vpop.f32.mrb[29].mxu1 }
 0x154   : > { %v1005_v24 = vpop.f32.mrb[30].mxu0  ;;  %v1133_v25 = vpop.f32.mrb[30].mxu1 }
 0x155   : > { %v1418_v26 = vadd.f32 %v2767_v17, %v1005_v24  ;;  %v1450_v27 = vadd.f32 %v2767_v17, %v1133_v25  ;;  %v1007_v28 = vpop.f32.mrb[31].mxu0  ;;  %v1135_v29 = vpop.f32.mrb[31].mxu1  ;;  %v1481_v30 = vmax.f32 %v1417_v20, 0.0  ;;  %v1513_v31 = vmax.f32 %v1449_v21, 0.0 }
 0x157   : > { %v1482_v32 = vmax.f32 %v1418_v26, 0.0  ;;  %v1514_v33 = vmax.f32 %v1450_v27, 0.0 }
 0x159   : > { %v2227_v34 = vpack.c.bf16 %v1482_v32, %v1481_v30  ;;  %v2307_v35 = vpack.c.bf16 %v1514_v33, %v1513_v31 }
 0x15a   : > { %v1010_v36 = vpop.f32.mrb[32].mxu0  ;;  %v1138_v37 = vpop.f32.mrb[32].mxu1 }
 0x15b   : > { %2355 = vst [vmem:[%s2777_s8 + $0x38] sm:$0xff] %v2227_v34   ;;  %2371 = vst [vmem:[%s2777_s8 + $0xb8] sm:$0xff] %v2307_v35   ;;  %v1419_v38 = vadd.f32 %v2767_v17, %v1010_v36  ;;  %v1451_v39 = vadd.f32 %v2767_v17, %v1138_v37  ;;  %v1012_v40 = vpop.f32.mrb[33].mxu0  ;;  %v1140_v41 = vpop.f32.mrb[33].mxu1 }
 0x15c   : > { %v1013_v42 = vpop.f32.mrb[34].mxu0  ;;  %v1141_v43 = vpop.f32.mrb[34].mxu1 }
 0x15d   : > { %v1420_v44 = vadd.f32 %v2767_v17, %v1013_v42  ;;  %v1452_v45 = vadd.f32 %v2767_v17, %v1141_v43  ;;  %v1015_v46 = vpop.f32.mrb[35].mxu0  ;;  %v1143_v47 = vpop.f32.mrb[35].mxu1  ;;  %v1483_v48 = vmax.f32 %v1419_v38, 0.0  ;;  %v1515_v49 = vmax.f32 %v1451_v39, 0.0 }
 0x15f   : > { %v1484_v50 = vmax.f32 %v1420_v44, 0.0  ;;  %v1516_v51 = vmax.f32 %v1452_v45, 0.0 }
 0x161   : > { %v2232_v52 = vpack.c.bf16 %v1484_v50, %v1483_v48  ;;  %v2312_v53 = vpack.c.bf16 %v1516_v51, %v1515_v49 }
 0x162   : > { %v1018_v54 = vpop.f32.mrb[36].mxu0  ;;  %v1146_v55 = vpop.f32.mrb[36].mxu1 }
 0x163   : > { %2356 = vst [vmem:[%s2777_s8 + $0x40] sm:$0xff] %v2232_v52   ;;  %2372 = vst [vmem:[%s2777_s8 + $0xc0] sm:$0xff] %v2312_v53   ;;  %v1421_v56 = vadd.f32 %v2767_v17, %v1018_v54  ;;  %v1453_v57 = vadd.f32 %v2767_v17, %v1146_v55  ;;  %v1020_v58 = vpop.f32.mrb[37].mxu0  ;;  %v1148_v59 = vpop.f32.mrb[37].mxu1 }
 0x164   : > { %v1021_v60 = vpop.f32.mrb[38].mxu0  ;;  %v1149_v61 = vpop.f32.mrb[38].mxu1 }
 0x165   : > { %v1422_v62 = vadd.f32 %v2767_v17, %v1021_v60  ;;  %v1454_v63 = vadd.f32 %v2767_v17, %v1149_v61  ;;  %v1023_v0 = vpop.f32.mrb[39].mxu0  ;;  %v1151_v1 = vpop.f32.mrb[39].mxu1  ;;  %v1485_v2 = vmax.f32 %v1421_v56, 0.0  ;;  %v1517_v3 = vmax.f32 %v1453_v57, 0.0 }
 0x167   : > { %v1486_v4 = vmax.f32 %v1422_v62, 0.0  ;;  %v1518_v5 = vmax.f32 %v1454_v63, 0.0 }
 0x169   : > { %v2237_v6 = vpack.c.bf16 %v1486_v4, %v1485_v2  ;;  %v2317_v7 = vpack.c.bf16 %v1518_v5, %v1517_v3 }
 0x16a   : > { %v1026_v8 = vpop.f32.mrb[40].mxu0  ;;  %v1154_v9 = vpop.f32.mrb[40].mxu1 }
 0x16b   : > { %2357 = vst [vmem:[%s2777_s8 + $0x48] sm:$0xff] %v2237_v6   ;;  %2373 = vst [vmem:[%s2777_s8 + $0xc8] sm:$0xff] %v2317_v7   ;;  %v1423_v10 = vadd.f32 %v2767_v17, %v1026_v8  ;;  %v1455_v11 = vadd.f32 %v2767_v17, %v1154_v9  ;;  %v1028_v12 = vpop.f32.mrb[41].mxu0  ;;  %v1156_v13 = vpop.f32.mrb[41].mxu1 }
 0x16c   : > { %v1029_v14 = vpop.f32.mrb[42].mxu0  ;;  %v1157_v15 = vpop.f32.mrb[42].mxu1 }
 0x16d   : > { %v1424_v16 = vadd.f32 %v2767_v17, %v1029_v14  ;;  %v1456_v18 = vadd.f32 %v2767_v17, %v1157_v15  ;;  %v1031_v19 = vpop.f32.mrb[43].mxu0  ;;  %v1159_v20 = vpop.f32.mrb[43].mxu1  ;;  %v1487_v21 = vmax.f32 %v1423_v10, 0.0  ;;  %v1519_v22 = vmax.f32 %v1455_v11, 0.0 }
 0x16f   : > { %v1488_v23 = vmax.f32 %v1424_v16, 0.0  ;;  %v1520_v24 = vmax.f32 %v1456_v18, 0.0 }
 0x171   : > { %v2242_v25 = vpack.c.bf16 %v1488_v23, %v1487_v21  ;;  %v2322_v26 = vpack.c.bf16 %v1520_v24, %v1519_v22 }
 0x172   : > { %v1034_v27 = vpop.f32.mrb[44].mxu0  ;;  %v1162_v28 = vpop.f32.mrb[44].mxu1 }
 0x173   : > { %2358 = vst [vmem:[%s2777_s8 + $0x50] sm:$0xff] %v2242_v25   ;;  %2374 = vst [vmem:[%s2777_s8 + $0xd0] sm:$0xff] %v2322_v26   ;;  %v1425_v29 = vadd.f32 %v2767_v17, %v1034_v27  ;;  %v1457_v30 = vadd.f32 %v2767_v17, %v1162_v28  ;;  %v1036_v31 = vpop.f32.mrb[45].mxu0  ;;  %v1164_v32 = vpop.f32.mrb[45].mxu1 }
 0x174   : > { %v1037_v33 = vpop.f32.mrb[46].mxu0  ;;  %v1165_v34 = vpop.f32.mrb[46].mxu1 }
 0x175   : > { %v1426_v35 = vadd.f32 %v2767_v17, %v1037_v33  ;;  %v1458_v36 = vadd.f32 %v2767_v17, %v1165_v34  ;;  %v1039_v37 = vpop.f32.mrb[47].mxu0  ;;  %v1167_v38 = vpop.f32.mrb[47].mxu1  ;;  %v1489_v39 = vmax.f32 %v1425_v29, 0.0  ;;  %v1521_v40 = vmax.f32 %v1457_v30, 0.0 }
 0x177   : > { %v1490_v41 = vmax.f32 %v1426_v35, 0.0  ;;  %v1522_v42 = vmax.f32 %v1458_v36, 0.0 }
 0x179   : > { %v2247_v43 = vpack.c.bf16 %v1490_v41, %v1489_v39  ;;  %v2327_v44 = vpack.c.bf16 %v1522_v42, %v1521_v40 }
 0x17a   : > { %v1042_v45 = vpop.f32.mrb[48].mxu0  ;;  %v1170_v46 = vpop.f32.mrb[48].mxu1 }
 0x17b   : > { %2359 = vst [vmem:[%s2777_s8 + $0x58] sm:$0xff] %v2247_v43   ;;  %2375 = vst [vmem:[%s2777_s8 + $0xd8] sm:$0xff] %v2327_v44   ;;  %v1427_v47 = vadd.f32 %v2767_v17, %v1042_v45  ;;  %v1459_v48 = vadd.f32 %v2767_v17, %v1170_v46  ;;  %v1044_v49 = vpop.f32.mrb[49].mxu0  ;;  %v1172_v50 = vpop.f32.mrb[49].mxu1 }
 0x17c   : > { %v1045_v51 = vpop.f32.mrb[50].mxu0  ;;  %v1173_v52 = vpop.f32.mrb[50].mxu1 }
 0x17d   : > { %v1428_v53 = vadd.f32 %v2767_v17, %v1045_v51  ;;  %v1460_v54 = vadd.f32 %v2767_v17, %v1173_v52  ;;  %v1047_v55 = vpop.f32.mrb[51].mxu0  ;;  %v1175_v56 = vpop.f32.mrb[51].mxu1  ;;  %v1491_v57 = vmax.f32 %v1427_v47, 0.0  ;;  %v1523_v58 = vmax.f32 %v1459_v48, 0.0 }
 0x17f   : > { %v1492_v59 = vmax.f32 %v1428_v53, 0.0  ;;  %v1524_v60 = vmax.f32 %v1460_v54, 0.0 }
 0x181   : > { %v2252_v61 = vpack.c.bf16 %v1492_v59, %v1491_v57  ;;  %v2332_v62 = vpack.c.bf16 %v1524_v60, %v1523_v58 }
 0x182   : > { %v1050_v63 = vpop.f32.mrb[52].mxu0  ;;  %v1178_v0 = vpop.f32.mrb[52].mxu1 }
 0x183   : > { %2360 = vst [vmem:[%s2777_s8 + $0x60] sm:$0xff] %v2252_v61   ;;  %2376 = vst [vmem:[%s2777_s8 + $0xe0] sm:$0xff] %v2332_v62   ;;  %v1429_v1 = vadd.f32 %v2767_v17, %v1050_v63  ;;  %v1461_v2 = vadd.f32 %v2767_v17, %v1178_v0  ;;  %v1052_v3 = vpop.f32.mrb[53].mxu0  ;;  %v1180_v4 = vpop.f32.mrb[53].mxu1 }
 0x184   : > { %v1053_v5 = vpop.f32.mrb[54].mxu0  ;;  %v1181_v6 = vpop.f32.mrb[54].mxu1 }
 0x185   : > { %v1430_v7 = vadd.f32 %v2767_v17, %v1053_v5  ;;  %v1462_v8 = vadd.f32 %v2767_v17, %v1181_v6  ;;  %v1055_v9 = vpop.f32.mrb[55].mxu0  ;;  %v1183_v10 = vpop.f32.mrb[55].mxu1  ;;  %v1493_v11 = vmax.f32 %v1429_v1, 0.0  ;;  %v1525_v12 = vmax.f32 %v1461_v2, 0.0 }
 0x187   : > { %v1494_v13 = vmax.f32 %v1430_v7, 0.0  ;;  %v1526_v14 = vmax.f32 %v1462_v8, 0.0 }
 0x189   : > { %v2257_v15 = vpack.c.bf16 %v1494_v13, %v1493_v11  ;;  %v2337_v16 = vpack.c.bf16 %v1526_v14, %v1525_v12 }
 0x18a   : > { %v1058_v18 = vpop.f32.mrb[56].mxu0  ;;  %v1186_v19 = vpop.f32.mrb[56].mxu1 }
 0x18b   : > { %2361 = vst [vmem:[%s2777_s8 + $0x68] sm:$0xff] %v2257_v15   ;;  %2377 = vst [vmem:[%s2777_s8 + $0xe8] sm:$0xff] %v2337_v16   ;;  %v1431_v20 = vadd.f32 %v2767_v17, %v1058_v18  ;;  %v1463_v21 = vadd.f32 %v2767_v17, %v1186_v19  ;;  %v1060_v22 = vpop.f32.mrb[57].mxu0  ;;  %v1188_v23 = vpop.f32.mrb[57].mxu1 }
 0x18c   : > { %v1061_v24 = vpop.f32.mrb[58].mxu0  ;;  %v1189_v25 = vpop.f32.mrb[58].mxu1 }
 0x18d   : > { %v1432_v26 = vadd.f32 %v2767_v17, %v1061_v24  ;;  %v1464_v27 = vadd.f32 %v2767_v17, %v1189_v25  ;;  %v1063_v28 = vpop.f32.mrb[59].mxu0  ;;  %v1191_v29 = vpop.f32.mrb[59].mxu1  ;;  %v1495_v30 = vmax.f32 %v1431_v20, 0.0  ;;  %v1527_v31 = vmax.f32 %v1463_v21, 0.0 }
 0x18f   : > { %v1496_v32 = vmax.f32 %v1432_v26, 0.0  ;;  %v1528_v33 = vmax.f32 %v1464_v27, 0.0 }
 0x191   : > { %v2262_v34 = vpack.c.bf16 %v1496_v32, %v1495_v30  ;;  %v2342_v35 = vpack.c.bf16 %v1528_v33, %v1527_v31 }
 0x192   : > { %v1066_v36 = vpop.f32.mrb[60].mxu0  ;;  %v1194_v37 = vpop.f32.mrb[60].mxu1 }
 0x193   : > { %2362 = vst [vmem:[%s2777_s8 + $0x70] sm:$0xff] %v2262_v34   ;;  %2378 = vst [vmem:[%s2777_s8 + $0xf0] sm:$0xff] %v2342_v35   ;;  %v1433_v38 = vadd.f32 %v2767_v17, %v1066_v36  ;;  %v1465_v39 = vadd.f32 %v2767_v17, %v1194_v37  ;;  %v1068_v40 = vpop.f32.mrb[61].mxu0  ;;  %v1196_v41 = vpop.f32.mrb[61].mxu1 }
 0x194   : > { %v1069_v42 = vpop.f32.mrb[62].mxu0  ;;  %v1197_v43 = vpop.f32.mrb[62].mxu1 }
 0x195   : > { %v1434_v44 = vadd.f32 %v2767_v17, %v1069_v42  ;;  %v1466_v45 = vadd.f32 %v2767_v17, %v1197_v43  ;;  %v1071_v46 = vpop.f32.mrb[63].mxu0  ;;  %v1199_v47 = vpop.f32.mrb[63].mxu1  ;;  %v1497_v48 = vmax.f32 %v1433_v38, 0.0  ;;  %v1529_v49 = vmax.f32 %v1465_v39, 0.0 }
 0x197   : > { %v1498_v50 = vmax.f32 %v1434_v44, 0.0  ;;  %v1530_v51 = vmax.f32 %v1466_v45, 0.0 }
 0x199   : > { %v2267_v52 = vpack.c.bf16 %v1498_v50, %v1497_v48  ;;  %v2347_v53 = vpack.c.bf16 %v1530_v51, %v1529_v49 }
 0x19b   : > { %2363 = vst [vmem:[%s2777_s8 + $0x78] sm:$0xff] %v2267_v52   ;;  %2379 = vst [vmem:[%s2777_s8 + $0xf8] sm:$0xff] %v2347_v53  }
 0x19c PF: > { %s13_s14 = sadd.s32 1, %s2571_s14   ;;  %s2884_s12 = smov %s2567_s13 }
 0x19d   : > { %p10_p5 = scmp.ge.s32.totalorder %s13_s14, 6   ;;  %s2885_s13 = smov %s2887_s15 }
 0x19f   :  { %12 = sbr.rel (!%p10_p5) target bundleno = 2 (0x2), region = 76 }

// kernel: _lambda_.21
= control target key start
LH: loop header
LB: loop body
LE: loop exit
PB: predicated region body
PF: predicated region fallthrough
CT: control target
= control target key end

     0   :  { %s1736_s12 = smov 0   ;;  %s1738_s13 = smov 0   ;;  %s1981_s0 = inlined_call_operand.vmem [shape: bf16[512,640], index: 0, kind: input, shape index: {}]   ;;  %s1982_s1 = inlined_call_operand.vmem [shape: bf16[640,128], index: 1, kind: input, shape index: {}]   ;;  %s1983_s2 = inlined_call_operand.vmem [shape: f32[1,128], index: 2, kind: input, shape index: {}]   ;;  %s1984_s3 = inlined_call_operand.vmem [shape: bf16[512,128], index: 3, kind: output, shape index: {}]  }
   0x1   :  { %s1740_s14 = smov 0   ;;  %s1742_s15 = smov 0  }
   0x2   :  { %s1744_s16 = smov 0   ;;  %s1746_s17 = smov 0  }
   0x3   :  { %s1748_s18 = smov 0  }
   0x4 LB: > { %s25_s19 = sadd.s32 1, %s1705_s16  ;;  %s32_s20 = sadd.s32 1, %s1709_s17  ;;  %s1713_s18 = sphi %s1748_s18, %s13_s18   ;;  %s1709_s17 = sphi %s1746_s17, %s1990_s17   ;;  %s1705_s16 = sphi %s1744_s16, %s1989_s16   ;;  %s1701_s15 = sphi %s1742_s15, %s1988_s15   ;;  %s1697_s14 = sphi %s1740_s14, %s1987_s14   ;;  %s1693_s13 = sphi %s1738_s13, %s1986_s13   ;;  %s1689_s12 = sphi %s1736_s12, %s1985_s12  }
   0x5   : > { %p26_p0 = scmp.ge.s32.totalorder %s25_s19, 5  ;;  %p48_p1 = scmp.ne.s32.totalorder %s1693_s13, %s1689_s12 }
   0x6   : > { %p49_p2 = scmp.eq.s32.totalorder %s1713_s18, 0  ;;  %s41_s24 = sadd.s32 1, %s1693_s13 }
   0x7   : > { %s1992_s19 = smov (%p26_p0, %s25_s19), 0  ;;  %s1994_s20 = smov (!%p26_p0, %s32_s20), %s1709_s17 }
   0x8   : > { %p50_p3 = por %p49_p2, %p48_p1  ;;  %p34_p4 = scmp.ge.s32.totalorder %s1994_s20, 2 }
   0x9   : > { %s37_s21 = ssub.s32 %s1705_s16, %s1992_s19  ;;  %p1290_p6 = scmp.ge.s32.totalorder %s1713_s18, 10 }
   0xa   : > { %s1996_s20 = smov (%p34_p4, %s1994_s20), 0 }
   0xb   : > { %s36_s22 = ssub.s32 %s1709_s17, %s1996_s20  ;;  %162 = sbr.rel (%p1290_p6) target bundleno = 46 (0x2e), region = 20 }
   0xc   : > { %s38_s23 = sor.u32 %s37_s21, %s36_s22 }
   0xd   : > { %p39_p5 = scmp.eq.s32.totalorder %s38_s23, 0 }
   0xf   : > { %s1787_s25 = scalar_select %p39_p5, %s1693_s13, %s41_s24  }
  0x12   : > { %165 = sbr.rel (!%p50_p3) target bundleno = 46 (0x2e), region = 24  ;;  %s167_s26 = sand.u32 (%p50_p3), 1, %s1693_s13  }
  0x13   : > { %s1577_s27 = smul.u32 (%p50_p3), 160, %s1709_s17  ;;  %s1291_s28 = sshll.u32 (%p50_p3), %s167_s26, 7 }
  0x14   : > { %s1801_s7 = scalar_lea.vmem (%p50_p3), [#allocation3], %s1291_s28 }
  0x15   : > { %s172_s29 = sadd.s32 (%p50_p3), %s1705_s16, %s1577_s27 }
  0x16   : > { %s1294_s30 = sshll.u32 (%p50_p3), %s172_s29, 2 }
  0x17   : > { %s1796_s6 = scalar_lea.vmem (%p50_p3), %s1981_s0, %s1294_s30 }
  0x18   : > { %v190_v0 = vld [vmem:[%s1796_s6] sm:$0xf] (%p50_p3)  ;;  %v192_v1 = vld [vmem:[%s1796_s6 + $0x14] sm:$0xf] (%p50_p3)  ;;  %v194_v2 = vld [vmem:[%s1796_s6 + $0x28] sm:$0xf] (%p50_p3) }
  0x19   : > { %191 = vst [vmem:[%s1801_s7] sm:$0xf] %v190_v0  ;;  %193 = vst [vmem:[%s1801_s7 + $0x4] sm:$0xf] %v192_v1  ;;  %v196_v3 = vld [vmem:[%s1796_s6 + $0x3c] sm:$0xf] }
  0x1a   : > { %195 = vst [vmem:[%s1801_s7 + $0x8] sm:$0xf] %v194_v2  ;;  %v198_v4 = vld [vmem:[%s1796_s6 + $0x50] sm:$0xf]  ;;  %v200_v5 = vld [vmem:[%s1796_s6 + $0x64] sm:$0xf] }
  0x1b   : > { %197 = vst [vmem:[%s1801_s7 + $0xc] sm:$0xf] %v196_v3  ;;  %199 = vst [vmem:[%s1801_s7 + $0x10] sm:$0xf] %v198_v4  ;;  %v202_v6 = vld [vmem:[%s1796_s6 + $0x78] sm:$0xf] }
  0x1c   : > { %201 = vst [vmem:[%s1801_s7 + $0x14] sm:$0xf] %v200_v5  ;;  %v204_v7 = vld [vmem:[%s1796_s6 + $0x8c] sm:$0xf]  ;;  %v206_v8 = vld [vmem:[%s1796_s6 + $0xa0] sm:$0xf] }
  0x1d   : > { %203 = vst [vmem:[%s1801_s7 + $0x18] sm:$0xf] %v202_v6  ;;  %205 = vst [vmem:[%s1801_s7 + $0x1c] sm:$0xf] %v204_v7  ;;  %v208_v9 = vld [vmem:[%s1796_s6 + $0xb4] sm:$0xf] }
  0x1e   : > { %207 = vst [vmem:[%s1801_s7 + $0x20] sm:$0xf] %v206_v8  ;;  %v210_v10 = vld [vmem:[%s1796_s6 + $0xc8] sm:$0xf]  ;;  %v212_v11 = vld [vmem:[%s1796_s6 + $0xdc] sm:$0xf] }
  0x1f   : > { %209 = vst [vmem:[%s1801_s7 + $0x24] sm:$0xf] %v208_v9  ;;  %211 = vst [vmem:[%s1801_s7 + $0x28] sm:$0xf] %v210_v10  ;;  %v214_v12 = vld [vmem:[%s1796_s6 + $0xf0] sm:$0xf] }
  0x20   : > { %213 = vst [vmem:[%s1801_s7 + $0x2c] sm:$0xf] %v212_v11  ;;  %v216_v13 = vld [vmem:[%s1796_s6 + $0x104] sm:$0xf]  ;;  %v218_v14 = vld [vmem:[%s1796_s6 + $0x118] sm:$0xf] }
  0x21   : > { %215 = vst [vmem:[%s1801_s7 + $0x30] sm:$0xf] %v214_v12  ;;  %217 = vst [vmem:[%s1801_s7 + $0x34] sm:$0xf] %v216_v13  ;;  %v220_v15 = vld [vmem:[%s1796_s6 + $0x12c] sm:$0xf] }
  0x22   : > { %219 = vst [vmem:[%s1801_s7 + $0x38] sm:$0xf] %v218_v14  ;;  %v222_v16 = vld [vmem:[%s1796_s6 + $0x140] sm:$0xf]  ;;  %v224_v17 = vld [vmem:[%s1796_s6 + $0x154] sm:$0xf] }
  0x23   : > { %221 = vst [vmem:[%s1801_s7 + $0x3c] sm:$0xf] %v220_v15  ;;  %223 = vst [vmem:[%s1801_s7 + $0x40] sm:$0xf] %v222_v16  ;;  %v226_v18 = vld [vmem:[%s1796_s6 + $0x168] sm:$0xf] }
  0x24   : > { %225 = vst [vmem:[%s1801_s7 + $0x44] sm:$0xf] %v224_v17  ;;  %v228_v19 = vld [vmem:[%s1796_s6 + $0x17c] sm:$0xf]  ;;  %v230_v20 = vld [vmem:[%s1796_s6 + $0x190] sm:$0xf] }
  0x25   : > { %227 = vst [vmem:[%s1801_s7 + $0x48] sm:$0xf] %v226_v18  ;;  %229 = vst [vmem:[%s1801_s7 + $0x4c] sm:$0xf] %v228_v19  ;;  %v232_v21 = vld [vmem:[%s1796_s6 + $0x1a4] sm:$0xf] }
  0x26   : > { %231 = vst [vmem:[%s1801_s7 + $0x50] sm:$0xf] %v230_v20  ;;  %v234_v22 = vld [vmem:[%s1796_s6 + $0x1b8] sm:$0xf]  ;;  %v236_v23 = vld [vmem:[%s1796_s6 + $0x1cc] sm:$0xf] }
  0x27   : > { %233 = vst [vmem:[%s1801_s7 + $0x54] sm:$0xf] %v232_v21  ;;  %235 = vst [vmem:[%s1801_s7 + $0x58] sm:$0xf] %v234_v22  ;;  %v238_v24 = vld [vmem:[%s1796_s6 + $0x1e0] sm:$0xf] }
  0x28   : > { %237 = vst [vmem:[%s1801_s7 + $0x5c] sm:$0xf] %v236_v23  ;;  %v240_v25 = vld [vmem:[%s1796_s6 + $0x1f4] sm:$0xf]  ;;  %v242_v26 = vld [vmem:[%s1796_s6 + $0x208] sm:$0xf] }
  0x29   : > { %239 = vst [vmem:[%s1801_s7 + $0x60] sm:$0xf] %v238_v24  ;;  %241 = vst [vmem:[%s1801_s7 + $0x64] sm:$0xf] %v240_v25  ;;  %v244_v27 = vld [vmem:[%s1796_s6 + $0x21c] sm:$0xf] }
  0x2a   : > { %243 = vst [vmem:[%s1801_s7 + $0x68] sm:$0xf] %v242_v26  ;;  %v246_v28 = vld [vmem:[%s1796_s6 + $0x230] sm:$0xf]  ;;  %v248_v29 = vld [vmem:[%s1796_s6 + $0x244] sm:$0xf] }
  0x2b   : > { %245 = vst [vmem:[%s1801_s7 + $0x6c] sm:$0xf] %v244_v27  ;;  %247 = vst [vmem:[%s1801_s7 + $0x70] sm:$0xf] %v246_v28  ;;  %v250_v30 = vld [vmem:[%s1796_s6 + $0x258] sm:$0xf] }
  0x2c   : > { %249 = vst [vmem:[%s1801_s7 + $0x74] sm:$0xf] %v248_v29  ;;  %v252_v31 = vld [vmem:[%s1796_s6 + $0x26c] sm:$0xf]  ;;  %251 = vst [vmem:[%s1801_s7 + $0x78] sm:$0xf] %v250_v30 }
  0x2d   : > { %253 = vst [vmem:[%s1801_s7 + $0x7c] sm:$0xf] %v252_v31 }
  0x2e PF: > { %p1295_p7 = scmp.ge.s32.totalorder %s1713_s18, 1  ;;  %p351_p8 = scmp.lt.s32.totalorder %s1713_s18, 11 }
  0x30   : > { %p352_p9 = pnand %p1295_p7, %p351_p8 }
  0x31   : > { %s358_s8 = sand.u32 (!%p352_p9), 1, %s1689_s12   ;;  %s1297_s9 = sshll.u32 (!%p352_p9), %s1697_s14, 4 }
  0x32   : > { %355 = sbr.rel (%p352_p9) target bundleno = 366 (0x16e), region = 69  ;;  %s1296_s10 = sshll.u32 (!%p352_p9), %s358_s8, 7 }
  0x33   : > { %p397_p10 = scmp.lt.s32.totalorder (!%p352_p9), %s1297_s9, 79  ;;  %s1299_s11 = sshll.u32 (!%p352_p9), %s1701_s15, 5 }
  0x34   : > { %p409_p11 = scmp.lt.s32.totalorder (!%p352_p9), %s1299_s11, 63  ;;  %s1879_s12 = scalar_lea.vmem (!%p352_p9), [#allocation3], %s1296_s10 }
  0x35   : > { %p1301_p12 = scmp.ne.s32.totalorder (!%p352_p9), %s1697_s14, 0 }
  0x39   : > { %s1998_s9 = smov (!%p397_p10, %s1297_s9), 79  ;;  %s2000_s11 = smov (!%p409_p11, %s1299_s11), 63 }
  0x3a   : > { %s1298_s21 = sshll.u32 %s1998_s9, 2  ;;  %s1300_s26 = sshll.u32 %s2000_s11, 2  ;;  %v1715_v32 = vmov (!%p1301_p12), 0.0  }
  0x3b   : > { %s1872_s24 = scalar_lea.vmem %s1982_s1, %s1298_s21  ;;  %s1877_s29 = scalar_lea.vmem %s1984_s3, %s1300_s26  ;;  %422 = vst [vmem:[#allocation2] sm:$0xff] (!%p1301_p12), %v1715_v32  ;;  %423 = vst [vmem:[#allocation2 + $0x8] sm:$0xff] (!%p1301_p12), %v1715_v32 }
  0x3c   : > { %421 = sbr.rel (%p1301_p12) target bundleno = 75 (0x4b), region = 77  ;;  %424 = vst [vmem:[#allocation2 + $0x10] sm:$0xff] (!%p1301_p12), %v1715_v32  ;;  %425 = vst [vmem:[#allocation2 + $0x18] sm:$0xff] (!%p1301_p12), %v1715_v32 }
  0x3d   : > { %426 = vst [vmem:[#allocation2 + $0x20] sm:$0xff] (!%p1301_p12), %v1715_v32  ;;  %427 = vst [vmem:[#allocation2 + $0x28] sm:$0xff] (!%p1301_p12), %v1715_v32 }
  0x3e   : > { %428 = vst [vmem:[#allocation2 + $0x30] sm:$0xff] (!%p1301_p12), %v1715_v32  ;;  %429 = vst [vmem:[#allocation2 + $0x38] sm:$0xff] (!%p1301_p12), %v1715_v32 }
  0x3f   : > { %430 = vst [vmem:[#allocation2 + $0x40] sm:$0xff] (!%p1301_p12), %v1715_v32  ;;  %431 = vst [vmem:[#allocation2 + $0x48] sm:$0xff] (!%p1301_p12), %v1715_v32 }
  0x40   : > { %432 = vst [vmem:[#allocation2 + $0x50] sm:$0xff] (!%p1301_p12), %v1715_v32  ;;  %433 = vst [vmem:[#allocation2 + $0x58] sm:$0xff] (!%p1301_p12), %v1715_v32 }
  0x41   : > { %434 = vst [vmem:[#allocation2 + $0x60] sm:$0xff] (!%p1301_p12), %v1715_v32  ;;  %435 = vst [vmem:[#allocation2 + $0x68] sm:$0xff] (!%p1301_p12), %v1715_v32 }
  0x42   : > { %436 = vst [vmem:[#allocation2 + $0x70] sm:$0xff] (!%p1301_p12), %v1715_v32  ;;  %437 = vst [vmem:[#allocation2 + $0x78] sm:$0xff] (!%p1301_p12), %v1715_v32 }
  0x43   : > { %438 = vst [vmem:[#allocation2 + $0x80] sm:$0xff] %v1715_v32  ;;  %439 = vst [vmem:[#allocation2 + $0x88] sm:$0xff] %v1715_v32 }
  0x44   : > { %440 = vst [vmem:[#allocation2 + $0x90] sm:$0xff] %v1715_v32  ;;  %441 = vst [vmem:[#allocation2 + $0x98] sm:$0xff] %v1715_v32 }
  0x45   : > { %442 = vst [vmem:[#allocation2 + $0xa0] sm:$0xff] %v1715_v32  ;;  %443 = vst [vmem:[#allocation2 + $0xa8] sm:$0xff] %v1715_v32 }
  0x46   : > { %444 = vst [vmem:[#allocation2 + $0xb0] sm:$0xff] %v1715_v32  ;;  %445 = vst [vmem:[#allocation2 + $0xb8] sm:$0xff] %v1715_v32 }
  0x47   : > { %446 = vst [vmem:[#allocation2 + $0xc0] sm:$0xff] %v1715_v32  ;;  %447 = vst [vmem:[#allocation2 + $0xc8] sm:$0xff] %v1715_v32 }
  0x48   : > { %448 = vst [vmem:[#allocation2 + $0xd0] sm:$0xff] %v1715_v32  ;;  %449 = vst [vmem:[#allocation2 + $0xd8] sm:$0xff] %v1715_v32 }
  0x49   : > { %450 = vst [vmem:[#allocation2 + $0xe0] sm:$0xff] %v1715_v32  ;;  %451 = vst [vmem:[#allocation2 + $0xe8] sm:$0xff] %v1715_v32 }
  0x4a   : > { %452 = vst [vmem:[#allocation2 + $0xf0] sm:$0xff] %v1715_v32  ;;  %453 = vst [vmem:[#allocation2 + $0xf8] sm:$0xff] %v1715_v32 }
  0x4b PF: > { %v1635_v33 = vld [vmem:[%s1872_s24] sm:$0xff]   ;;  %v1636_v34 = vld [vmem:[%s1872_s24 + $0x8] sm:$0xff]   ;;  %v1637_v35 = vld [vmem:[%s1872_s24 + $0x10] sm:$0xff]   ;;  %p1326_p13 = scmp.ne.s32.totalorder %s1697_s14, 4 }
  0x4c   : > { %1513 = vmatprep.subr.bf16.mxu0 %v1635_v33  ;;  %1561 = vmatprep.subr.bf16.mxu1 %v1635_v33  ;;  %v1638_v36 = vld [vmem:[%s1872_s24 + $0x18] sm:$0xff]   ;;  %v1643_v37 = vld [vmem:[%s1879_s12] sm:$0xff]   ;;  %v1640_v40 = vld [vmem:[%s1872_s24 + $0x28] sm:$0xff]  }
  0x4d   : > { %1514 = vmatpush3.bf16.msra.mxu0 %v1635_v33  ;;  %1569 = vmatpush3.bf16.msra.mxu1 %v1635_v33  ;;  %v1644_v38 = vld [vmem:[%s1879_s12 + $0x40] sm:$0xff]   ;;  %v1641_v41 = vld [vmem:[%s1872_s24 + $0x30] sm:$0xff]   ;;  %v1642_v42 = vld [vmem:[%s1872_s24 + $0x38] sm:$0xff]  }
  0x4e   : > { %1515 = vmatprep.subr.bf16.mxu0 %v1636_v34  ;;  %1562 = vmatprep.subr.bf16.mxu1 %v1636_v34  ;;  %v1639_v39 = vld [vmem:[%s1872_s24 + $0x20] sm:$0xff]   ;;  %v1645_v43 = vld [vmem:[%s1879_s12 + $0x8] sm:$0xff]   ;;  %v1647_v45 = vld [vmem:[%s1879_s12 + $0x10] sm:$0xff]  }
  0x4f   : > { %1529 = vmatprep.mubr.bf16.mxu0 %v1643_v37  ;;  %1545 = vmatprep.mubr.bf16.mxu1 %v1644_v38  ;;  %v1646_v44 = vld [vmem:[%s1879_s12 + $0x48] sm:$0xff]   ;;  %v1648_v46 = vld [vmem:[%s1879_s12 + $0x50] sm:$0xff]   ;;  %v1649_v47 = vld [vmem:[%s1879_s12 + $0x18] sm:$0xff]  }
  0x50   : > { %v1650_v48 = vld [vmem:[%s1879_s12 + $0x58] sm:$0xff]   ;;  %v1651_v49 = vld [vmem:[%s1879_s12 + $0x20] sm:$0xff]   ;;  %v1653_v51 = vld [vmem:[%s1879_s12 + $0x28] sm:$0xff]  }
  0x51   : > { %1516 = vmatpush3.bf16.msra.mxu0 %v1636_v34  ;;  %1570 = vmatpush3.bf16.msra.mxu1 %v1636_v34  ;;  %v1652_v50 = vld [vmem:[%s1879_s12 + $0x60] sm:$0xff]   ;;  %v1654_v52 = vld [vmem:[%s1879_s12 + $0x68] sm:$0xff]   ;;  %v1655_v53 = vld [vmem:[%s1879_s12 + $0x30] sm:$0xff]  }
  0x52   : > { %1517 = vmatprep.subr.bf16.mxu0 %v1637_v35  ;;  %1563 = vmatprep.subr.bf16.mxu1 %v1637_v35  ;;  %v1656_v54 = vld [vmem:[%s1879_s12 + $0x70] sm:$0xff]   ;;  %v1657_v55 = vld [vmem:[%s1879_s12 + $0x38] sm:$0xff]   ;;  %v454_v59 = vld [vmem:[#allocation2] sm:$0xff] }
  0x53   : > { %v1658_v56 = vld [vmem:[%s1879_s12 + $0x78] sm:$0xff]   ;;  %v456_v57 = vld [vmem:[#allocation2 + $0x10] sm:$0xff]  ;;  %v470_v60 = vld [vmem:[#allocation2 + $0x80] sm:$0xff] }
  0x54   : > { %v472_v58 = vld [vmem:[#allocation2 + $0x90] sm:$0xff]  ;;  %v457_v63 = vld [vmem:[#allocation2 + $0x18] sm:$0xff]  ;;  %v455_v5 = vld [vmem:[#allocation2 + $0x8] sm:$0xff] }
  0x55   : > { %1518 = vmatpush3.bf16.msra.mxu0 %v1637_v35  ;;  %1571 = vmatpush3.bf16.msra.mxu1 %v1637_v35  ;;  %v473_v0 = vld [vmem:[#allocation2 + $0x98] sm:$0xff]  ;;  %v471_v6 = vld [vmem:[#allocation2 + $0x88] sm:$0xff]  ;;  %v460_v17 = vld [vmem:[#allocation2 + $0x30] sm:$0xff] }
  0x56   : > { %1519 = vmatprep.subr.bf16.mxu0 %v1638_v36  ;;  %1564 = vmatprep.subr.bf16.mxu1 %v1638_v36  ;;  %v476_v18 = vld [vmem:[#allocation2 + $0xb0] sm:$0xff]  ;;  %v458_v19 = vld [vmem:[#allocation2 + $0x20] sm:$0xff]  ;;  %v461_v23 = vld [vmem:[#allocation2 + $0x38] sm:$0xff] }
  0x57   : > { %v474_v20 = vld [vmem:[#allocation2 + $0xa0] sm:$0xff]  ;;  %v477_v24 = vld [vmem:[#allocation2 + $0xb8] sm:$0xff]  ;;  %v459_v29 = vld [vmem:[#allocation2 + $0x28] sm:$0xff] }
  0x58   : > { %v475_v30 = vld [vmem:[#allocation2 + $0xa8] sm:$0xff] }
  0x59   : > { %1520 = vmatpush3.bf16.msra.mxu0 %v1638_v36  ;;  %1572 = vmatpush3.bf16.msra.mxu1 %v1638_v36 }
  0x5a   : > { %1521 = vmatprep.subr.bf16.mxu0 %v1639_v39  ;;  %1565 = vmatprep.subr.bf16.mxu1 %v1639_v39 }
  0x5d   : > { %1522 = vmatpush3.bf16.msra.mxu0 %v1639_v39  ;;  %1573 = vmatpush3.bf16.msra.mxu1 %v1639_v39 }
  0x5e   : > { %1523 = vmatprep.subr.bf16.mxu0 %v1640_v40  ;;  %1566 = vmatprep.subr.bf16.mxu1 %v1640_v40 }
  0x61   : > { %1524 = vmatpush3.bf16.msra.mxu0 %v1640_v40  ;;  %1574 = vmatpush3.bf16.msra.mxu1 %v1640_v40 }
  0x62   : > { %1525 = vmatprep.subr.bf16.mxu0 %v1641_v41  ;;  %1567 = vmatprep.subr.bf16.mxu1 %v1641_v41 }
  0x65   : > { %1526 = vmatpush3.bf16.msra.mxu0 %v1641_v41  ;;  %1575 = vmatpush3.bf16.msra.mxu1 %v1641_v41  ;;  %v464_v41 = vld [vmem:[#allocation2 + $0x50] sm:$0xff] }
  0x66   : > { %1527 = vmatprep.subr.bf16.mxu0 %v1642_v42  ;;  %1568 = vmatprep.subr.bf16.mxu1 %v1642_v42 }
  0x69   : > { %1528 = vmatpush3.bf16.msra.mxu0 %v1642_v42  ;;  %1576 = vmatpush3.bf16.msra.mxu1 %v1642_v42  ;;  %v480_v42 = vld [vmem:[#allocation2 + $0xd0] sm:$0xff] }
  0x6c   : > { %1530 = vmatmul.mubr.bf16.vlgmr.msra.gmra.mrb[0].mxu0 %v1645_v43  ;;  %1546 = vmatmul.mubr.bf16.vlgmr.msra.gmra.mrb[0].mxu1 %v1646_v44  ;;  %v462_v43 = vld [vmem:[#allocation2 + $0x40] sm:$0xff] }
  0x6d   : > { %1533 = vmatprep.mubr.bf16.mxu0 %v1647_v45  ;;  %1549 = vmatprep.mubr.bf16.mxu1 %v1648_v46  ;;  %v478_v44 = vld [vmem:[#allocation2 + $0xc0] sm:$0xff] }
  0x74   : > { %1534 = vmatmul.mubr.bf16.gmra.mrb[4].mxu0 %v1649_v47  ;;  %1550 = vmatmul.mubr.bf16.gmra.mrb[4].mxu1 %v1650_v48  ;;  %v465_v47 = vld [vmem:[#allocation2 + $0x58] sm:$0xff] }
  0x75   : > { %1537 = vmatprep.mubr.bf16.mxu0 %v1651_v49  ;;  %1553 = vmatprep.mubr.bf16.mxu1 %v1652_v50  ;;  %v481_v48 = vld [vmem:[#allocation2 + $0xd8] sm:$0xff] }
  0x7c   : > { %1538 = vmatmul.mubr.bf16.gmra.mrb[8].mxu0 %v1653_v51  ;;  %1554 = vmatmul.mubr.bf16.gmra.mrb[8].mxu1 %v1654_v52 }
  0x7d   : > { %1541 = vmatprep.mubr.bf16.mxu0 %v1655_v53  ;;  %1557 = vmatprep.mubr.bf16.mxu1 %v1656_v54  ;;  %v463_v53 = vld [vmem:[#allocation2 + $0x48] sm:$0xff] }
  0x7e   : > { %v479_v54 = vld [vmem:[#allocation2 + $0xc8] sm:$0xff] }
  0x84   : > { %1542 = vmatmul.mubr.bf16.gmra.mrb[12].mxu0 %v1657_v55  ;;  %1558 = vmatmul.mubr.bf16.gmra.mrb[12].mxu1 %v1658_v56 }
 0x13f   : > { %v1531_v61 = vpop.f32.mrb[0].mxu0  ;;  %v1547_v62 = vpop.f32.mrb[0].mxu1 }
 0x140   : > { %v841_v1 = vadd.f32 %v1531_v61, %v456_v57  ;;  %v857_v2 = vadd.f32 %v1547_v62, %v472_v58  ;;  %v712_v3 = vpop.f32.mrb[1].mxu0  ;;  %v776_v4 = vpop.f32.mrb[1].mxu1 }
 0x141   : > { %v839_v7 = vadd.f32 %v712_v3, %v454_v59  ;;  %v855_v8 = vadd.f32 %v776_v4, %v470_v60  ;;  %v1532_v9 = vpop.f32.mrb[2].mxu0  ;;  %v1548_v10 = vpop.f32.mrb[2].mxu1  ;;  %v466_v3 = vld [vmem:[#allocation2 + $0x60] sm:$0xff] }
 0x142   : > { %873 = vst [vmem:[#allocation2 + $0x10] sm:$0xff] %v841_v1  ;;  %889 = vst [vmem:[#allocation2 + $0x90] sm:$0xff] %v857_v2  ;;  %v842_v11 = vadd.f32 %v1532_v9, %v457_v63  ;;  %v858_v12 = vadd.f32 %v1548_v10, %v473_v0  ;;  %v715_v13 = vpop.f32.mrb[3].mxu0  ;;  %v779_v14 = vpop.f32.mrb[3].mxu1  ;;  %v468_v1 = vld [vmem:[#allocation2 + $0x70] sm:$0xff]  ;;  %v482_v4 = vld [vmem:[#allocation2 + $0xe0] sm:$0xff] }
 0x143   : > { %871 = vst [vmem:[#allocation2] sm:$0xff] %v839_v7  ;;  %887 = vst [vmem:[#allocation2 + $0x80] sm:$0xff] %v855_v8  ;;  %v840_v15 = vadd.f32 %v715_v13, %v455_v5  ;;  %v856_v16 = vadd.f32 %v779_v14, %v471_v6  ;;  %v484_v2 = vld [vmem:[#allocation2 + $0xf0] sm:$0xff]  ;;  %v469_v7 = vld [vmem:[#allocation2 + $0x78] sm:$0xff] }
 0x144   : > { %874 = vst [vmem:[#allocation2 + $0x18] sm:$0xff] %v842_v11  ;;  %890 = vst [vmem:[#allocation2 + $0x98] sm:$0xff] %v858_v12  ;;  %v485_v8 = vld [vmem:[#allocation2 + $0xf8] sm:$0xff]  ;;  %v467_v13 = vld [vmem:[#allocation2 + $0x68] sm:$0xff] }
 0x145   : > { %872 = vst [vmem:[#allocation2 + $0x8] sm:$0xff] %v840_v15  ;;  %888 = vst [vmem:[#allocation2 + $0x88] sm:$0xff] %v856_v16  ;;  %v483_v14 = vld [vmem:[#allocation2 + $0xe8] sm:$0xff] }
 0x147   : > { %v1535_v21 = vpop.f32.mrb[4].mxu0  ;;  %v1551_v22 = vpop.f32.mrb[4].mxu1 }
 0x148   : > { %v845_v25 = vadd.f32 %v1535_v21, %v460_v17  ;;  %v861_v26 = vadd.f32 %v1551_v22, %v476_v18  ;;  %v728_v27 = vpop.f32.mrb[5].mxu0  ;;  %v792_v28 = vpop.f32.mrb[5].mxu1 }
 0x149   : > { %v843_v31 = vadd.f32 %v728_v27, %v458_v19  ;;  %v859_v32 = vadd.f32 %v792_v28, %v474_v20  ;;  %v1536_v33 = vpop.f32.mrb[6].mxu0  ;;  %v1552_v34 = vpop.f32.mrb[6].mxu1  ;;  %v1910_v27 = vld [vmem:[%s1983_s2] ss:$0 sm:$0xff] (!%p1326_p13) }
 0x14a   : > { %877 = vst [vmem:[#allocation2 + $0x30] sm:$0xff] %v845_v25  ;;  %893 = vst [vmem:[#allocation2 + $0xb0] sm:$0xff] %v861_v26  ;;  %v846_v35 = vadd.f32 %v1536_v33, %v461_v23  ;;  %v862_v36 = vadd.f32 %v1552_v34, %v477_v24  ;;  %v731_v37 = vpop.f32.mrb[7].mxu0  ;;  %v795_v38 = vpop.f32.mrb[7].mxu1  ;;  %v907_v25 = vld [vmem:[#allocation2] sm:$0xff] (!%p1326_p13) }
 0x14b   : > { %875 = vst [vmem:[#allocation2 + $0x20] sm:$0xff] %v843_v31  ;;  %891 = vst [vmem:[#allocation2 + $0xa0] sm:$0xff] %v859_v32  ;;  %v844_v39 = vadd.f32 %v731_v37, %v459_v29  ;;  %v860_v40 = vadd.f32 %v795_v38, %v475_v30  ;;  %v946_v28 = vadd.f32 (!%p1326_p13), %v1910_v27, %v907_v25  ;;  %v909_v30 = vld [vmem:[#allocation2 + $0x10] sm:$0xff] (!%p1326_p13)  ;;  %v910_v31 = vld [vmem:[#allocation2 + $0x18] sm:$0xff] (!%p1326_p13) }
 0x14c   : > { %878 = vst [vmem:[#allocation2 + $0x38] sm:$0xff] %v846_v35  ;;  %894 = vst [vmem:[#allocation2 + $0xb8] sm:$0xff] %v862_v36  ;;  %v908_v26 = vld [vmem:[#allocation2 + $0x8] sm:$0xff] (!%p1326_p13)  ;;  %v948_v33 = vadd.f32 (!%p1326_p13), %v1910_v27, %v909_v30  ;;  %v949_v34 = vadd.f32 (!%p1326_p13), %v1910_v27, %v910_v31 }
 0x14d   : > { %876 = vst [vmem:[#allocation2 + $0x28] sm:$0xff] %v844_v39  ;;  %892 = vst [vmem:[#allocation2 + $0xa8] sm:$0xff] %v860_v40  ;;  %v947_v29 = vadd.f32 (!%p1326_p13), %v1910_v27, %v908_v26  ;;  %v978_v39 = vmax.f32 (!%p1326_p13), %v946_v28, 0.0 }
 0x14f   : > { %v1539_v45 = vpop.f32.mrb[8].mxu0  ;;  %v1555_v46 = vpop.f32.mrb[8].mxu1  ;;  %v979_v40 = vmax.f32 (!%p1326_p13), %v947_v29, 0.0 }
 0x150   : > { %v849_v49 = vadd.f32 %v1539_v45, %v464_v41  ;;  %v865_v50 = vadd.f32 %v1555_v46, %v480_v42  ;;  %v744_v51 = vpop.f32.mrb[9].mxu0  ;;  %v808_v52 = vpop.f32.mrb[9].mxu1  ;;  %v980_v46 = vmax.f32 (!%p1326_p13), %v948_v33, 0.0 }
 0x151   : > { %v847_v55 = vadd.f32 %v744_v51, %v462_v43  ;;  %v863_v56 = vadd.f32 %v808_v52, %v478_v44  ;;  %v1540_v57 = vpop.f32.mrb[10].mxu0  ;;  %v1556_v58 = vpop.f32.mrb[10].mxu1  ;;  %v913_v37 = vld [vmem:[#allocation2 + $0x30] sm:$0xff] (!%p1326_p13)  ;;  %v1397_v52 = vpack.c.bf16 (!%p1326_p13), %v979_v40, %v978_v39 }
 0x152   : > { %881 = vst [vmem:[#allocation2 + $0x50] sm:$0xff] %v849_v49  ;;  %897 = vst [vmem:[#allocation2 + $0xd0] sm:$0xff] %v865_v50  ;;  %v850_v59 = vadd.f32 %v1540_v57, %v465_v47  ;;  %v866_v60 = vadd.f32 %v1556_v58, %v481_v48  ;;  %v747_v61 = vpop.f32.mrb[11].mxu0  ;;  %v811_v62 = vpop.f32.mrb[11].mxu1  ;;  %v911_v32 = vld [vmem:[#allocation2 + $0x20] sm:$0xff] (!%p1326_p13)  ;;  %v952_v42 = vadd.f32 (!%p1326_p13), %v1910_v27, %v913_v37  ;;  %v981_v47 = vmax.f32 (!%p1326_p13), %v949_v34, 0.0 }
 0x153   : > { %879 = vst [vmem:[#allocation2 + $0x40] sm:$0xff] %v847_v55  ;;  %895 = vst [vmem:[#allocation2 + $0xc0] sm:$0xff] %v863_v56  ;;  %v848_v63 = vadd.f32 %v747_v61, %v463_v53  ;;  %v864_v0 = vadd.f32 %v811_v62, %v479_v54  ;;  %v950_v36 = vadd.f32 (!%p1326_p13), %v1910_v27, %v911_v32  ;;  %v914_v38 = vld [vmem:[#allocation2 + $0x38] sm:$0xff] (!%p1326_p13)  ;;  %v929_v25 = vld [vmem:[#allocation2 + $0xb0] sm:$0xff] (!%p1326_p13) }
 0x154   : > { %882 = vst [vmem:[#allocation2 + $0x58] sm:$0xff] %v850_v59  ;;  %898 = vst [vmem:[#allocation2 + $0xd8] sm:$0xff] %v866_v60  ;;  %v912_v35 = vld [vmem:[#allocation2 + $0x28] sm:$0xff] (!%p1326_p13)  ;;  %v953_v49 = vadd.f32 (!%p1326_p13), %v1910_v27, %v914_v38  ;;  %v984_v54 = vmax.f32 (!%p1326_p13), %v952_v42, 0.0  ;;  %v1402_v57 = vpack.c.bf16 (!%p1326_p13), %v981_v47, %v980_v46  ;;  %v930_v26 = vld [vmem:[#allocation2 + $0xb8] sm:$0xff] (!%p1326_p13) }
 0x155   : > { %880 = vst [vmem:[#allocation2 + $0x48] sm:$0xff] %v848_v63  ;;  %896 = vst [vmem:[#allocation2 + $0xc8] sm:$0xff] %v864_v0  ;;  %v951_v41 = vadd.f32 (!%p1326_p13), %v1910_v27, %v912_v35  ;;  %v982_v48 = vmax.f32 (!%p1326_p13), %v950_v36, 0.0  ;;  %v969_v42 = vadd.f32 (!%p1326_p13), %v1910_v27, %v930_v26 }
 0x156   : > { %v985_v58 = vmax.f32 (!%p1326_p13), %v953_v49, 0.0  ;;  %1398 = vst [vmem:[%s1877_s29] sm:$0xff] (!%p1326_p13), %v1397_v52   ;;  %1474 = vst [vmem:[%s1877_s29 + $0x8] sm:$0xff] (!%p1326_p13), %v1402_v57  }
 0x157   : > { %v1543_v5 = vpop.f32.mrb[12].mxu0  ;;  %v1559_v6 = vpop.f32.mrb[12].mxu1  ;;  %906 = sbr.rel (%p1326_p13) target bundleno = 366 (0x16e), region = 81  ;;  %v983_v53 = vmax.f32 (!%p1326_p13), %v951_v41, 0.0  ;;  %v968_v41 = vadd.f32 (!%p1326_p13), %v1910_v27, %v929_v25  ;;  %v1001_v52 = vmax.f32 (!%p1326_p13), %v969_v42, 0.0 }
 0x158   : > { %v853_v9 = vadd.f32 %v1543_v5, %v468_v1  ;;  %v869_v10 = vadd.f32 %v1559_v6, %v484_v2  ;;  %v760_v11 = vpop.f32.mrb[13].mxu0  ;;  %v824_v12 = vpop.f32.mrb[13].mxu1  ;;  %v1412_v5 = vpack.c.bf16 (!%p1326_p13), %v985_v58, %v984_v54 }
 0x159   : > { %v851_v15 = vadd.f32 %v760_v11, %v466_v3  ;;  %v867_v16 = vadd.f32 %v824_v12, %v482_v4  ;;  %v1544_v17 = vpop.f32.mrb[14].mxu0  ;;  %v1560_v18 = vpop.f32.mrb[14].mxu1  ;;  %v917_v45 = vld [vmem:[#allocation2 + $0x50] sm:$0xff] (!%p1326_p13)  ;;  %v1407_v63 = vpack.c.bf16 (!%p1326_p13), %v983_v53, %v982_v48  ;;  %v923_v3 = vld [vmem:[#allocation2 + $0x80] sm:$0xff] (!%p1326_p13)  ;;  %v924_v4 = vld [vmem:[#allocation2 + $0x88] sm:$0xff] (!%p1326_p13) }
 0x15a   : > { %885 = vst [vmem:[#allocation2 + $0x70] sm:$0xff] %v853_v9  ;;  %901 = vst [vmem:[#allocation2 + $0xf0] sm:$0xff] %v869_v10  ;;  %v854_v19 = vadd.f32 %v1544_v17, %v469_v7  ;;  %v870_v20 = vadd.f32 %v1560_v18, %v485_v8  ;;  %v763_v21 = vpop.f32.mrb[15].mxu0  ;;  %v827_v22 = vpop.f32.mrb[15].mxu1  ;;  %v915_v43 = vld [vmem:[#allocation2 + $0x40] sm:$0xff] (!%p1326_p13)  ;;  %v956_v60 = vadd.f32 (!%p1326_p13), %v1910_v27, %v917_v45  ;;  %v925_v9 = vld [vmem:[#allocation2 + $0x90] sm:$0xff] (!%p1326_p13) }
 0x15b   : > { %883 = vst [vmem:[#allocation2 + $0x60] sm:$0xff] %v851_v15  ;;  %899 = vst [vmem:[#allocation2 + $0xe0] sm:$0xff] %v867_v16  ;;  %v852_v23 = vadd.f32 %v763_v21, %v467_v13  ;;  %v868_v24 = vadd.f32 %v827_v22, %v483_v14  ;;  %v918_v50 = vld [vmem:[#allocation2 + $0x58] sm:$0xff] (!%p1326_p13)  ;;  %v954_v55 = vadd.f32 (!%p1326_p13), %v1910_v27, %v915_v43  ;;  %v931_v32 = vld [vmem:[#allocation2 + $0xc0] sm:$0xff] (!%p1326_p13) }
 0x15c   : > { %886 = vst [vmem:[#allocation2 + $0x78] sm:$0xff] %v854_v19  ;;  %902 = vst [vmem:[#allocation2 + $0xf8] sm:$0xff] %v870_v20  ;;  %v916_v44 = vld [vmem:[#allocation2 + $0x48] sm:$0xff] (!%p1326_p13)  ;;  %v957_v1 = vadd.f32 (!%p1326_p13), %v1910_v27, %v918_v50  ;;  %v988_v7 = vmax.f32 (!%p1326_p13), %v956_v60, 0.0  ;;  %v926_v14 = vld [vmem:[#allocation2 + $0x98] sm:$0xff] (!%p1326_p13)  ;;  %v962_v17 = vadd.f32 (!%p1326_p13), %v1910_v27, %v923_v3  ;;  %v963_v18 = vadd.f32 (!%p1326_p13), %v1910_v27, %v924_v4 }
 0x15d   : > { %884 = vst [vmem:[#allocation2 + $0x68] sm:$0xff] %v852_v23  ;;  %900 = vst [vmem:[#allocation2 + $0xe8] sm:$0xff] %v868_v24  ;;  %v955_v59 = vadd.f32 (!%p1326_p13), %v1910_v27, %v916_v44  ;;  %v986_v0 = vmax.f32 (!%p1326_p13), %v954_v55, 0.0  ;;  %v927_v19 = vld [vmem:[#allocation2 + $0xa0] sm:$0xff] (!%p1326_p13)  ;;  %v928_v20 = vld [vmem:[#allocation2 + $0xa8] sm:$0xff] (!%p1326_p13)  ;;  %v964_v24 = vadd.f32 (!%p1326_p13), %v1910_v27, %v925_v9  ;;  %v965_v31 = vadd.f32 (!%p1326_p13), %v1910_v27, %v926_v14 }
 0x15e   : > { %1475 = vst [vmem:[%s1877_s29 + $0x10] sm:$0xff] %v1407_v63   ;;  %v989_v10 = vmax.f32 %v957_v1, 0.0  ;;  %1476 = vst [vmem:[%s1877_s29 + $0x18] sm:$0xff] %v1412_v5   ;;  %v994_v29 = vmax.f32 %v962_v17, 0.0  ;;  %v995_v30 = vmax.f32 %v963_v18, 0.0  ;;  %v932_v33 = vld [vmem:[#allocation2 + $0xc8] sm:$0xff]  ;;  %v966_v36 = vadd.f32 %v1910_v27, %v927_v19 }
 0x15f   : > { %v987_v6 = vmax.f32 %v955_v59, 0.0  ;;  %v996_v35 = vmax.f32 %v964_v24, 0.0  ;;  %v967_v37 = vadd.f32 %v1910_v27, %v928_v20  ;;  %v933_v38 = vld [vmem:[#allocation2 + $0xd0] sm:$0xff]  ;;  %v997_v40 = vmax.f32 %v965_v31, 0.0  ;;  %v934_v43 = vld [vmem:[#allocation2 + $0xd8] sm:$0xff] }
 0x160   : > { %v1422_v21 = vpack.c.bf16 %v989_v10, %v988_v7  ;;  %v1437_v39 = vpack.c.bf16 %v995_v30, %v994_v29  ;;  %v998_v44 = vmax.f32 %v966_v36, 0.0  ;;  %v970_v46 = vadd.f32 %v1910_v27, %v931_v32 }
 0x161   : > { %v921_v61 = vld [vmem:[#allocation2 + $0x70] sm:$0xff]  ;;  %v1417_v15 = vpack.c.bf16 %v987_v6, %v986_v0  ;;  %v999_v45 = vmax.f32 %v967_v37, 0.0  ;;  %v971_v47 = vadd.f32 %v1910_v27, %v932_v33  ;;  %v1442_v50 = vpack.c.bf16 %v997_v40, %v996_v35 }
 0x162   : > { %v919_v51 = vld [vmem:[#allocation2 + $0x60] sm:$0xff]  ;;  %v960_v12 = vadd.f32 %v1910_v27, %v921_v61  ;;  %1478 = vst [vmem:[%s1877_s29 + $0x28] sm:$0xff] %v1422_v21   ;;  %1481 = vst [vmem:[%s1877_s29 + $0x40] sm:$0xff] %v1437_v39   ;;  %v972_v53 = vadd.f32 %v1910_v27, %v933_v38  ;;  %v937_v54 = vld [vmem:[#allocation2 + $0xf0] sm:$0xff]  ;;  %v1002_v57 = vmax.f32 %v970_v46, 0.0  ;;  %v973_v59 = vadd.f32 %v1910_v27, %v934_v43 }
 0x163   : > { %v922_v62 = vld [vmem:[#allocation2 + $0x78] sm:$0xff]  ;;  %v958_v2 = vadd.f32 %v1910_v27, %v919_v51  ;;  %1477 = vst [vmem:[%s1877_s29 + $0x20] sm:$0xff] %v1417_v15   ;;  %v935_v48 = vld [vmem:[#allocation2 + $0xe0] sm:$0xff]  ;;  %v1000_v51 = vmax.f32 %v968_v41, 0.0  ;;  %v1003_v58 = vmax.f32 %v971_v47, 0.0  ;;  %1482 = vst [vmem:[%s1877_s29 + $0x48] sm:$0xff] %v1442_v50  }
 0x164   : > { %v920_v56 = vld [vmem:[#allocation2 + $0x68] sm:$0xff]  ;;  %v961_v13 = vadd.f32 %v1910_v27, %v922_v62  ;;  %v992_v22 = vmax.f32 %v960_v12, 0.0  ;;  %v938_v55 = vld [vmem:[#allocation2 + $0xf8] sm:$0xff]  ;;  %v1004_v61 = vmax.f32 %v972_v53, 0.0  ;;  %v974_v62 = vadd.f32 %v1910_v27, %v935_v48 }
 0x165   : > { %v959_v8 = vadd.f32 %v1910_v27, %v920_v56  ;;  %v990_v11 = vmax.f32 %v958_v2, 0.0  ;;  %v936_v49 = vld [vmem:[#allocation2 + $0xe8] sm:$0xff]  ;;  %v1447_v56 = vpack.c.bf16 %v999_v45, %v998_v44  ;;  %v1452_v60 = vpack.c.bf16 %v1001_v52, %v1000_v51 }
 0x166   : > { %v993_v23 = vmax.f32 %v961_v13, 0.0  ;;  %v975_v63 = vadd.f32 %v1910_v27, %v936_v49  ;;  %v1457_v0 = vpack.c.bf16 %v1003_v58, %v1002_v57  ;;  %v1005_v1 = vmax.f32 %v973_v59, 0.0 }
 0x167   : > { %v991_v16 = vmax.f32 %v959_v8, 0.0  ;;  %1483 = vst [vmem:[%s1877_s29 + $0x50] sm:$0xff] %v1447_v56   ;;  %v976_v2 = vadd.f32 %v1910_v27, %v937_v54  ;;  %v977_v3 = vadd.f32 %v1910_v27, %v938_v55  ;;  %1484 = vst [vmem:[%s1877_s29 + $0x58] sm:$0xff] %v1452_v60   ;;  %v1006_v4 = vmax.f32 %v974_v62, 0.0 }
 0x168   : > { %v1432_v34 = vpack.c.bf16 %v993_v23, %v992_v22  ;;  %v1007_v5 = vmax.f32 %v975_v63, 0.0  ;;  %1485 = vst [vmem:[%s1877_s29 + $0x60] sm:$0xff] %v1457_v0   ;;  %v1462_v6 = vpack.c.bf16 %v1005_v1, %v1004_v61 }
 0x169   : > { %v1427_v28 = vpack.c.bf16 %v991_v16, %v990_v11  ;;  %v1008_v7 = vmax.f32 %v976_v2, 0.0  ;;  %v1009_v8 = vmax.f32 %v977_v3, 0.0 }
 0x16a   : > { %1480 = vst [vmem:[%s1877_s29 + $0x38] sm:$0xff] %v1432_v34   ;;  %v1467_v9 = vpack.c.bf16 %v1007_v5, %v1006_v4  ;;  %1486 = vst [vmem:[%s1877_s29 + $0x68] sm:$0xff] %v1462_v6  }
 0x16b   : > { %1479 = vst [vmem:[%s1877_s29 + $0x30] sm:$0xff] %v1427_v28   ;;  %v1472_v10 = vpack.c.bf16 %v1009_v8, %v1008_v7 }
 0x16c   : > { %1487 = vst [vmem:[%s1877_s29 + $0x70] sm:$0xff] %v1467_v9  }
 0x16d   : > { %1488 = vst [vmem:[%s1877_s29 + $0x78] sm:$0xff] %v1472_v10  }
 0x16e PF: > { %s13_s18 = sadd.s32 1, %s1713_s18   ;;  %s1985_s12 = smov %s1693_s13 }
 0x16f   : > { %p10_p0 = scmp.ge.s32.totalorder %s13_s18, 12   ;;  %s1986_s13 = smov %s1787_s25 }
 0x170   : > { %s1987_s14 = smov %s1705_s16  ;;  %s1988_s15 = smov %s1709_s17 }
 0x171   : > { %s1989_s16 = smov %s1992_s19  ;;  %s1990_s17 = smov %s1996_s20 }
 0x172   :  { %12 = sbr.rel (!%p10_p0) target bundleno = 4 (0x4), region = 122 }

// kernel: _lambda_.22
= control target key start
LH: loop header
LB: loop body
LE: loop exit
PB: predicated region body
PF: predicated region fallthrough
CT: control target
= control target key end

     0   :  { %s1993_s15 = smov 0   ;;  %s1995_s16 = smov 0   ;;  %s2259_s0 = inlined_call_operand.vmem [shape: bf16[512,640], index: 0, kind: input, shape index: {}]   ;;  %s2260_s1 = inlined_call_operand.vmem [shape: bf16[640,128], index: 1, kind: input, shape index: {}]   ;;  %s2261_s2 = inlined_call_operand.vmem [shape: f32[1,128], index: 2, kind: input, shape index: {}]   ;;  %s2262_s3 = inlined_call_operand.vmem [shape: bf16[512,128], index: 3, kind: input, shape index: {}]   ;;  %s2263_s4 = inlined_call_operand.vmem [shape: bf16[512,128], index: 4, kind: output, shape index: {}]  }
   0x1   :  { %s1997_s17 = smov 0   ;;  %s1999_s18 = smov 0  }
   0x2   :  { %s2001_s19 = smov 0   ;;  %s2003_s20 = smov 0  }
   0x3   :  { %s2005_s21 = smov 0  }
   0x4 LB: > { %s26_s22 = sadd.s32 1, %s1957_s19  ;;  %s33_s23 = sadd.s32 1, %s1961_s20  ;;  %s1965_s21 = sphi %s2005_s21, %s14_s21   ;;  %s1961_s20 = sphi %s2003_s20, %s2269_s20   ;;  %s1957_s19 = sphi %s2001_s19, %s2268_s19   ;;  %s1953_s18 = sphi %s1999_s18, %s2267_s18   ;;  %s1949_s17 = sphi %s1997_s17, %s2266_s17   ;;  %s1945_s16 = sphi %s1995_s16, %s2265_s16   ;;  %s1941_s15 = sphi %s1993_s15, %s2264_s15  }
   0x5   : > { %p27_p0 = scmp.ge.s32.totalorder %s26_s22, 5  ;;  %p49_p1 = scmp.ne.s32.totalorder %s1945_s16, %s1941_s15 }
   0x6   : > { %p50_p2 = scmp.eq.s32.totalorder %s1965_s21, 0  ;;  %s42_s27 = sadd.s32 1, %s1945_s16 }
   0x7   : > { %s2271_s22 = smov (%p27_p0, %s26_s22), 0  ;;  %s2273_s23 = smov (!%p27_p0, %s33_s23), %s1961_s20 }
   0x8   : > { %p51_p3 = por %p50_p2, %p49_p1  ;;  %p35_p4 = scmp.ge.s32.totalorder %s2273_s23, 2 }
   0x9   : > { %s38_s24 = ssub.s32 %s1957_s19, %s2271_s22  ;;  %p1461_p6 = scmp.ge.s32.totalorder %s1965_s21, 10 }
   0xa   : > { %s2275_s23 = smov (%p35_p4, %s2273_s23), 0 }
   0xb   : > { %s37_s25 = ssub.s32 %s1961_s20, %s2275_s23  ;;  %191 = sbr.rel (%p1461_p6) target bundleno = 46 (0x2e), region = 20 }
   0xc   : > { %s39_s26 = sor.u32 %s38_s24, %s37_s25 }
   0xd   : > { %p40_p5 = scmp.eq.s32.totalorder %s39_s26, 0 }
   0xf   : > { %s2044_s28 = scalar_select %p40_p5, %s1945_s16, %s42_s27  }
  0x12   : > { %194 = sbr.rel (!%p51_p3) target bundleno = 46 (0x2e), region = 24  ;;  %s196_s29 = sand.u32 (%p51_p3), 1, %s1945_s16  }
  0x13   : > { %s1829_s30 = smul.u32 (%p51_p3), 160, %s1961_s20  ;;  %s1462_s5 = sshll.u32 (%p51_p3), %s196_s29, 7 }
  0x14   : > { %s2058_s11 = scalar_lea.vmem (%p51_p3), [#allocation3], %s1462_s5 }
  0x15   : > { %s201_s6 = sadd.s32 (%p51_p3), %s1957_s19, %s1829_s30 }
  0x16   : > { %s1465_s7 = sshll.u32 (%p51_p3), %s201_s6, 2 }
  0x17   : > { %s2053_s10 = scalar_lea.vmem (%p51_p3), %s2259_s0, %s1465_s7 }
  0x18   : > { %v219_v0 = vld [vmem:[%s2053_s10] sm:$0xf] (%p51_p3)  ;;  %v221_v1 = vld [vmem:[%s2053_s10 + $0x14] sm:$0xf] (%p51_p3)  ;;  %v223_v2 = vld [vmem:[%s2053_s10 + $0x28] sm:$0xf] (%p51_p3) }
  0x19   : > { %220 = vst [vmem:[%s2058_s11] sm:$0xf] %v219_v0  ;;  %222 = vst [vmem:[%s2058_s11 + $0x4] sm:$0xf] %v221_v1  ;;  %v225_v3 = vld [vmem:[%s2053_s10 + $0x3c] sm:$0xf] }
  0x1a   : > { %224 = vst [vmem:[%s2058_s11 + $0x8] sm:$0xf] %v223_v2  ;;  %v227_v4 = vld [vmem:[%s2053_s10 + $0x50] sm:$0xf]  ;;  %v229_v5 = vld [vmem:[%s2053_s10 + $0x64] sm:$0xf] }
  0x1b   : > { %226 = vst [vmem:[%s2058_s11 + $0xc] sm:$0xf] %v225_v3  ;;  %228 = vst [vmem:[%s2058_s11 + $0x10] sm:$0xf] %v227_v4  ;;  %v231_v6 = vld [vmem:[%s2053_s10 + $0x78] sm:$0xf] }
  0x1c   : > { %230 = vst [vmem:[%s2058_s11 + $0x14] sm:$0xf] %v229_v5  ;;  %v233_v7 = vld [vmem:[%s2053_s10 + $0x8c] sm:$0xf]  ;;  %v235_v8 = vld [vmem:[%s2053_s10 + $0xa0] sm:$0xf] }
  0x1d   : > { %232 = vst [vmem:[%s2058_s11 + $0x18] sm:$0xf] %v231_v6  ;;  %234 = vst [vmem:[%s2058_s11 + $0x1c] sm:$0xf] %v233_v7  ;;  %v237_v9 = vld [vmem:[%s2053_s10 + $0xb4] sm:$0xf] }
  0x1e   : > { %236 = vst [vmem:[%s2058_s11 + $0x20] sm:$0xf] %v235_v8  ;;  %v239_v10 = vld [vmem:[%s2053_s10 + $0xc8] sm:$0xf]  ;;  %v241_v11 = vld [vmem:[%s2053_s10 + $0xdc] sm:$0xf] }
  0x1f   : > { %238 = vst [vmem:[%s2058_s11 + $0x24] sm:$0xf] %v237_v9  ;;  %240 = vst [vmem:[%s2058_s11 + $0x28] sm:$0xf] %v239_v10  ;;  %v243_v12 = vld [vmem:[%s2053_s10 + $0xf0] sm:$0xf] }
  0x20   : > { %242 = vst [vmem:[%s2058_s11 + $0x2c] sm:$0xf] %v241_v11  ;;  %v245_v13 = vld [vmem:[%s2053_s10 + $0x104] sm:$0xf]  ;;  %v247_v14 = vld [vmem:[%s2053_s10 + $0x118] sm:$0xf] }
  0x21   : > { %244 = vst [vmem:[%s2058_s11 + $0x30] sm:$0xf] %v243_v12  ;;  %246 = vst [vmem:[%s2058_s11 + $0x34] sm:$0xf] %v245_v13  ;;  %v249_v15 = vld [vmem:[%s2053_s10 + $0x12c] sm:$0xf] }
  0x22   : > { %248 = vst [vmem:[%s2058_s11 + $0x38] sm:$0xf] %v247_v14  ;;  %v251_v16 = vld [vmem:[%s2053_s10 + $0x140] sm:$0xf]  ;;  %v253_v17 = vld [vmem:[%s2053_s10 + $0x154] sm:$0xf] }
  0x23   : > { %250 = vst [vmem:[%s2058_s11 + $0x3c] sm:$0xf] %v249_v15  ;;  %252 = vst [vmem:[%s2058_s11 + $0x40] sm:$0xf] %v251_v16  ;;  %v255_v18 = vld [vmem:[%s2053_s10 + $0x168] sm:$0xf] }
  0x24   : > { %254 = vst [vmem:[%s2058_s11 + $0x44] sm:$0xf] %v253_v17  ;;  %v257_v19 = vld [vmem:[%s2053_s10 + $0x17c] sm:$0xf]  ;;  %v259_v20 = vld [vmem:[%s2053_s10 + $0x190] sm:$0xf] }
  0x25   : > { %256 = vst [vmem:[%s2058_s11 + $0x48] sm:$0xf] %v255_v18  ;;  %258 = vst [vmem:[%s2058_s11 + $0x4c] sm:$0xf] %v257_v19  ;;  %v261_v21 = vld [vmem:[%s2053_s10 + $0x1a4] sm:$0xf] }
  0x26   : > { %260 = vst [vmem:[%s2058_s11 + $0x50] sm:$0xf] %v259_v20  ;;  %v263_v22 = vld [vmem:[%s2053_s10 + $0x1b8] sm:$0xf]  ;;  %v265_v23 = vld [vmem:[%s2053_s10 + $0x1cc] sm:$0xf] }
  0x27   : > { %262 = vst [vmem:[%s2058_s11 + $0x54] sm:$0xf] %v261_v21  ;;  %264 = vst [vmem:[%s2058_s11 + $0x58] sm:$0xf] %v263_v22  ;;  %v267_v24 = vld [vmem:[%s2053_s10 + $0x1e0] sm:$0xf] }
  0x28   : > { %266 = vst [vmem:[%s2058_s11 + $0x5c] sm:$0xf] %v265_v23  ;;  %v269_v25 = vld [vmem:[%s2053_s10 + $0x1f4] sm:$0xf]  ;;  %v271_v26 = vld [vmem:[%s2053_s10 + $0x208] sm:$0xf] }
  0x29   : > { %268 = vst [vmem:[%s2058_s11 + $0x60] sm:$0xf] %v267_v24  ;;  %270 = vst [vmem:[%s2058_s11 + $0x64] sm:$0xf] %v269_v25  ;;  %v273_v27 = vld [vmem:[%s2053_s10 + $0x21c] sm:$0xf] }
  0x2a   : > { %272 = vst [vmem:[%s2058_s11 + $0x68] sm:$0xf] %v271_v26  ;;  %v275_v28 = vld [vmem:[%s2053_s10 + $0x230] sm:$0xf]  ;;  %v277_v29 = vld [vmem:[%s2053_s10 + $0x244] sm:$0xf] }
  0x2b   : > { %274 = vst [vmem:[%s2058_s11 + $0x6c] sm:$0xf] %v273_v27  ;;  %276 = vst [vmem:[%s2058_s11 + $0x70] sm:$0xf] %v275_v28  ;;  %v279_v30 = vld [vmem:[%s2053_s10 + $0x258] sm:$0xf] }
  0x2c   : > { %278 = vst [vmem:[%s2058_s11 + $0x74] sm:$0xf] %v277_v29  ;;  %v281_v31 = vld [vmem:[%s2053_s10 + $0x26c] sm:$0xf]  ;;  %280 = vst [vmem:[%s2058_s11 + $0x78] sm:$0xf] %v279_v30 }
  0x2d   : > { %282 = vst [vmem:[%s2058_s11 + $0x7c] sm:$0xf] %v281_v31 }
  0x2e PF: > { %p1466_p7 = scmp.ge.s32.totalorder %s1965_s21, 1  ;;  %p392_p8 = scmp.lt.s32.totalorder %s1965_s21, 11 }
  0x30   : > { %p393_p9 = pnand %p1466_p7, %p392_p8 }
  0x31   : > { %s399_s12 = sand.u32 (!%p393_p9), 1, %s1941_s15   ;;  %s1468_s13 = sshll.u32 (!%p393_p9), %s1949_s17, 4 }
  0x32   : > { %396 = sbr.rel (%p393_p9) target bundleno = 382 (0x17e), region = 73  ;;  %s1467_s14 = sshll.u32 (!%p393_p9), %s399_s12, 7 }
  0x33   : > { %p448_p10 = scmp.lt.s32.totalorder (!%p393_p9), %s1468_s13, 79  ;;  %s1470_s24 = sshll.u32 (!%p393_p9), %s1953_s18, 5 }
  0x34   : > { %p460_p11 = scmp.lt.s32.totalorder (!%p393_p9), %s1470_s24, 63  ;;  %s2141_s18 = scalar_lea.vmem (!%p393_p9), [#allocation3], %s1467_s14 }
  0x35   : > { %p1474_p12 = scmp.ne.s32.totalorder (!%p393_p9), %s1949_s17, 0 }
  0x39   : > { %s2277_s13 = smov (!%p448_p10, %s1468_s13), 79  ;;  %s2279_s24 = smov (!%p460_p11, %s1470_s24), 63 }
  0x3a   : > { %s1469_s25 = sshll.u32 %s2277_s13, 2  ;;  %s1471_s30 = sshll.u32 %s2279_s24, 2  ;;  %v1967_v32 = vmov (!%p1474_p12), 0.0  }
  0x3b   : > { %s2129_s29 = scalar_lea.vmem %s2260_s1, %s1469_s25  ;;  %s2134_s7 = scalar_lea.vmem %s2262_s3, %s1471_s30  ;;  %482 = vst [vmem:[#allocation2] sm:$0xff] (!%p1474_p12), %v1967_v32  ;;  %483 = vst [vmem:[#allocation2 + $0x8] sm:$0xff] (!%p1474_p12), %v1967_v32 }
  0x3c   : > { %s2139_s9 = scalar_lea.vmem %s2263_s4, %s1471_s30  ;;  %481 = sbr.rel (%p1474_p12) target bundleno = 75 (0x4b), region = 81  ;;  %484 = vst [vmem:[#allocation2 + $0x10] sm:$0xff] (!%p1474_p12), %v1967_v32  ;;  %485 = vst [vmem:[#allocation2 + $0x18] sm:$0xff] (!%p1474_p12), %v1967_v32 }
  0x3d   : > { %486 = vst [vmem:[#allocation2 + $0x20] sm:$0xff] (!%p1474_p12), %v1967_v32  ;;  %487 = vst [vmem:[#allocation2 + $0x28] sm:$0xff] (!%p1474_p12), %v1967_v32 }
  0x3e   : > { %488 = vst [vmem:[#allocation2 + $0x30] sm:$0xff] (!%p1474_p12), %v1967_v32  ;;  %489 = vst [vmem:[#allocation2 + $0x38] sm:$0xff] (!%p1474_p12), %v1967_v32 }
  0x3f   : > { %490 = vst [vmem:[#allocation2 + $0x40] sm:$0xff] (!%p1474_p12), %v1967_v32  ;;  %491 = vst [vmem:[#allocation2 + $0x48] sm:$0xff] (!%p1474_p12), %v1967_v32 }
  0x40   : > { %492 = vst [vmem:[#allocation2 + $0x50] sm:$0xff] (!%p1474_p12), %v1967_v32  ;;  %493 = vst [vmem:[#allocation2 + $0x58] sm:$0xff] (!%p1474_p12), %v1967_v32 }
  0x41   : > { %494 = vst [vmem:[#allocation2 + $0x60] sm:$0xff] (!%p1474_p12), %v1967_v32  ;;  %495 = vst [vmem:[#allocation2 + $0x68] sm:$0xff] (!%p1474_p12), %v1967_v32 }
  0x42   : > { %496 = vst [vmem:[#allocation2 + $0x70] sm:$0xff] (!%p1474_p12), %v1967_v32  ;;  %497 = vst [vmem:[#allocation2 + $0x78] sm:$0xff] (!%p1474_p12), %v1967_v32 }
  0x43   : > { %498 = vst [vmem:[#allocation2 + $0x80] sm:$0xff] %v1967_v32  ;;  %499 = vst [vmem:[#allocation2 + $0x88] sm:$0xff] %v1967_v32 }
  0x44   : > { %500 = vst [vmem:[#allocation2 + $0x90] sm:$0xff] %v1967_v32  ;;  %501 = vst [vmem:[#allocation2 + $0x98] sm:$0xff] %v1967_v32 }
  0x45   : > { %502 = vst [vmem:[#allocation2 + $0xa0] sm:$0xff] %v1967_v32  ;;  %503 = vst [vmem:[#allocation2 + $0xa8] sm:$0xff] %v1967_v32 }
  0x46   : > { %504 = vst [vmem:[#allocation2 + $0xb0] sm:$0xff] %v1967_v32  ;;  %505 = vst [vmem:[#allocation2 + $0xb8] sm:$0xff] %v1967_v32 }
  0x47   : > { %506 = vst [vmem:[#allocation2 + $0xc0] sm:$0xff] %v1967_v32  ;;  %507 = vst [vmem:[#allocation2 + $0xc8] sm:$0xff] %v1967_v32 }
  0x48   : > { %508 = vst [vmem:[#allocation2 + $0xd0] sm:$0xff] %v1967_v32  ;;  %509 = vst [vmem:[#allocation2 + $0xd8] sm:$0xff] %v1967_v32 }
  0x49   : > { %510 = vst [vmem:[#allocation2 + $0xe0] sm:$0xff] %v1967_v32  ;;  %511 = vst [vmem:[#allocation2 + $0xe8] sm:$0xff] %v1967_v32 }
  0x4a   : > { %512 = vst [vmem:[#allocation2 + $0xf0] sm:$0xff] %v1967_v32  ;;  %513 = vst [vmem:[#allocation2 + $0xf8] sm:$0xff] %v1967_v32 }
  0x4b PF: > { %v1887_v33 = vld [vmem:[%s2129_s29] sm:$0xff]   ;;  %v1888_v34 = vld [vmem:[%s2129_s29 + $0x8] sm:$0xff]   ;;  %v1889_v35 = vld [vmem:[%s2129_s29 + $0x10] sm:$0xff]   ;;  %p1499_p13 = scmp.ne.s32.totalorder %s1949_s17, 4 }
  0x4c   : > { %1765 = vmatprep.subr.bf16.mxu0 %v1887_v33  ;;  %1813 = vmatprep.subr.bf16.mxu1 %v1887_v33  ;;  %v1890_v36 = vld [vmem:[%s2129_s29 + $0x18] sm:$0xff]   ;;  %v1895_v37 = vld [vmem:[%s2141_s18] sm:$0xff]   ;;  %v1892_v40 = vld [vmem:[%s2129_s29 + $0x28] sm:$0xff]  }
  0x4d   : > { %1766 = vmatpush3.bf16.msra.mxu0 %v1887_v33  ;;  %1821 = vmatpush3.bf16.msra.mxu1 %v1887_v33  ;;  %v1896_v38 = vld [vmem:[%s2141_s18 + $0x40] sm:$0xff]   ;;  %v1893_v41 = vld [vmem:[%s2129_s29 + $0x30] sm:$0xff]   ;;  %v1894_v42 = vld [vmem:[%s2129_s29 + $0x38] sm:$0xff]  }
  0x4e   : > { %1767 = vmatprep.subr.bf16.mxu0 %v1888_v34  ;;  %1814 = vmatprep.subr.bf16.mxu1 %v1888_v34  ;;  %v1891_v39 = vld [vmem:[%s2129_s29 + $0x20] sm:$0xff]   ;;  %v1897_v43 = vld [vmem:[%s2141_s18 + $0x8] sm:$0xff]   ;;  %v1899_v45 = vld [vmem:[%s2141_s18 + $0x10] sm:$0xff]  }
  0x4f   : > { %1781 = vmatprep.mubr.bf16.mxu0 %v1895_v37  ;;  %1797 = vmatprep.mubr.bf16.mxu1 %v1896_v38  ;;  %v1898_v44 = vld [vmem:[%s2141_s18 + $0x48] sm:$0xff]   ;;  %v1900_v46 = vld [vmem:[%s2141_s18 + $0x50] sm:$0xff]   ;;  %v1901_v47 = vld [vmem:[%s2141_s18 + $0x18] sm:$0xff]  }
  0x50   : > { %v1902_v48 = vld [vmem:[%s2141_s18 + $0x58] sm:$0xff]   ;;  %v1903_v49 = vld [vmem:[%s2141_s18 + $0x20] sm:$0xff]   ;;  %v1905_v51 = vld [vmem:[%s2141_s18 + $0x28] sm:$0xff]  }
  0x51   : > { %1768 = vmatpush3.bf16.msra.mxu0 %v1888_v34  ;;  %1822 = vmatpush3.bf16.msra.mxu1 %v1888_v34  ;;  %v1904_v50 = vld [vmem:[%s2141_s18 + $0x60] sm:$0xff]   ;;  %v1906_v52 = vld [vmem:[%s2141_s18 + $0x68] sm:$0xff]   ;;  %v1907_v53 = vld [vmem:[%s2141_s18 + $0x30] sm:$0xff]  }
  0x52   : > { %1769 = vmatprep.subr.bf16.mxu0 %v1889_v35  ;;  %1815 = vmatprep.subr.bf16.mxu1 %v1889_v35  ;;  %v1908_v54 = vld [vmem:[%s2141_s18 + $0x70] sm:$0xff]   ;;  %v1909_v55 = vld [vmem:[%s2141_s18 + $0x38] sm:$0xff]   ;;  %v514_v59 = vld [vmem:[#allocation2] sm:$0xff] }
  0x53   : > { %v1910_v56 = vld [vmem:[%s2141_s18 + $0x78] sm:$0xff]   ;;  %v516_v57 = vld [vmem:[#allocation2 + $0x10] sm:$0xff]  ;;  %v530_v60 = vld [vmem:[#allocation2 + $0x80] sm:$0xff] }
  0x54   : > { %v532_v58 = vld [vmem:[#allocation2 + $0x90] sm:$0xff]  ;;  %v517_v63 = vld [vmem:[#allocation2 + $0x18] sm:$0xff]  ;;  %v515_v5 = vld [vmem:[#allocation2 + $0x8] sm:$0xff] }
  0x55   : > { %1770 = vmatpush3.bf16.msra.mxu0 %v1889_v35  ;;  %1823 = vmatpush3.bf16.msra.mxu1 %v1889_v35  ;;  %v533_v0 = vld [vmem:[#allocation2 + $0x98] sm:$0xff]  ;;  %v531_v6 = vld [vmem:[#allocation2 + $0x88] sm:$0xff]  ;;  %v520_v17 = vld [vmem:[#allocation2 + $0x30] sm:$0xff] }
  0x56   : > { %1771 = vmatprep.subr.bf16.mxu0 %v1890_v36  ;;  %1816 = vmatprep.subr.bf16.mxu1 %v1890_v36  ;;  %v536_v18 = vld [vmem:[#allocation2 + $0xb0] sm:$0xff]  ;;  %v518_v19 = vld [vmem:[#allocation2 + $0x20] sm:$0xff]  ;;  %v521_v23 = vld [vmem:[#allocation2 + $0x38] sm:$0xff] }
  0x57   : > { %v534_v20 = vld [vmem:[#allocation2 + $0xa0] sm:$0xff]  ;;  %v537_v24 = vld [vmem:[#allocation2 + $0xb8] sm:$0xff]  ;;  %v519_v29 = vld [vmem:[#allocation2 + $0x28] sm:$0xff] }
  0x58   : > { %v535_v30 = vld [vmem:[#allocation2 + $0xa8] sm:$0xff] }
  0x59   : > { %1772 = vmatpush3.bf16.msra.mxu0 %v1890_v36  ;;  %1824 = vmatpush3.bf16.msra.mxu1 %v1890_v36 }
  0x5a   : > { %1773 = vmatprep.subr.bf16.mxu0 %v1891_v39  ;;  %1817 = vmatprep.subr.bf16.mxu1 %v1891_v39 }
  0x5d   : > { %1774 = vmatpush3.bf16.msra.mxu0 %v1891_v39  ;;  %1825 = vmatpush3.bf16.msra.mxu1 %v1891_v39 }
  0x5e   : > { %1775 = vmatprep.subr.bf16.mxu0 %v1892_v40  ;;  %1818 = vmatprep.subr.bf16.mxu1 %v1892_v40 }
  0x61   : > { %1776 = vmatpush3.bf16.msra.mxu0 %v1892_v40  ;;  %1826 = vmatpush3.bf16.msra.mxu1 %v1892_v40 }
  0x62   : > { %1777 = vmatprep.subr.bf16.mxu0 %v1893_v41  ;;  %1819 = vmatprep.subr.bf16.mxu1 %v1893_v41 }
  0x65   : > { %1778 = vmatpush3.bf16.msra.mxu0 %v1893_v41  ;;  %1827 = vmatpush3.bf16.msra.mxu1 %v1893_v41  ;;  %v524_v41 = vld [vmem:[#allocation2 + $0x50] sm:$0xff] }
  0x66   : > { %1779 = vmatprep.subr.bf16.mxu0 %v1894_v42  ;;  %1820 = vmatprep.subr.bf16.mxu1 %v1894_v42 }
  0x69   : > { %1780 = vmatpush3.bf16.msra.mxu0 %v1894_v42  ;;  %1828 = vmatpush3.bf16.msra.mxu1 %v1894_v42  ;;  %v540_v42 = vld [vmem:[#allocation2 + $0xd0] sm:$0xff] }
  0x6c   : > { %1782 = vmatmul.mubr.bf16.vlgmr.msra.gmra.mrb[0].mxu0 %v1897_v43  ;;  %1798 = vmatmul.mubr.bf16.vlgmr.msra.gmra.mrb[0].mxu1 %v1898_v44  ;;  %v522_v43 = vld [vmem:[#allocation2 + $0x40] sm:$0xff] }
  0x6d   : > { %1785 = vmatprep.mubr.bf16.mxu0 %v1899_v45  ;;  %1801 = vmatprep.mubr.bf16.mxu1 %v1900_v46  ;;  %v538_v44 = vld [vmem:[#allocation2 + $0xc0] sm:$0xff] }
  0x74   : > { %1786 = vmatmul.mubr.bf16.gmra.mrb[4].mxu0 %v1901_v47  ;;  %1802 = vmatmul.mubr.bf16.gmra.mrb[4].mxu1 %v1902_v48  ;;  %v525_v47 = vld [vmem:[#allocation2 + $0x58] sm:$0xff] }
  0x75   : > { %1789 = vmatprep.mubr.bf16.mxu0 %v1903_v49  ;;  %1805 = vmatprep.mubr.bf16.mxu1 %v1904_v50  ;;  %v541_v48 = vld [vmem:[#allocation2 + $0xd8] sm:$0xff] }
  0x7c   : > { %1790 = vmatmul.mubr.bf16.gmra.mrb[8].mxu0 %v1905_v51  ;;  %1806 = vmatmul.mubr.bf16.gmra.mrb[8].mxu1 %v1906_v52 }
  0x7d   : > { %1793 = vmatprep.mubr.bf16.mxu0 %v1907_v53  ;;  %1809 = vmatprep.mubr.bf16.mxu1 %v1908_v54  ;;  %v523_v53 = vld [vmem:[#allocation2 + $0x48] sm:$0xff] }
  0x7e   : > { %v539_v54 = vld [vmem:[#allocation2 + $0xc8] sm:$0xff] }
  0x84   : > { %1794 = vmatmul.mubr.bf16.gmra.mrb[12].mxu0 %v1909_v55  ;;  %1810 = vmatmul.mubr.bf16.gmra.mrb[12].mxu1 %v1910_v56 }
 0x13f   : > { %v1783_v61 = vpop.f32.mrb[0].mxu0  ;;  %v1799_v62 = vpop.f32.mrb[0].mxu1 }
 0x140   : > { %v901_v1 = vadd.f32 %v1783_v61, %v516_v57  ;;  %v917_v2 = vadd.f32 %v1799_v62, %v532_v58  ;;  %v772_v3 = vpop.f32.mrb[1].mxu0  ;;  %v836_v4 = vpop.f32.mrb[1].mxu1 }
 0x141   : > { %v899_v7 = vadd.f32 %v772_v3, %v514_v59  ;;  %v915_v8 = vadd.f32 %v836_v4, %v530_v60  ;;  %v1784_v9 = vpop.f32.mrb[2].mxu0  ;;  %v1800_v10 = vpop.f32.mrb[2].mxu1  ;;  %v526_v3 = vld [vmem:[#allocation2 + $0x60] sm:$0xff] }
 0x142   : > { %933 = vst [vmem:[#allocation2 + $0x10] sm:$0xff] %v901_v1  ;;  %949 = vst [vmem:[#allocation2 + $0x90] sm:$0xff] %v917_v2  ;;  %v902_v11 = vadd.f32 %v1784_v9, %v517_v63  ;;  %v918_v12 = vadd.f32 %v1800_v10, %v533_v0  ;;  %v775_v13 = vpop.f32.mrb[3].mxu0  ;;  %v839_v14 = vpop.f32.mrb[3].mxu1  ;;  %v528_v1 = vld [vmem:[#allocation2 + $0x70] sm:$0xff]  ;;  %v542_v4 = vld [vmem:[#allocation2 + $0xe0] sm:$0xff] }
 0x143   : > { %931 = vst [vmem:[#allocation2] sm:$0xff] %v899_v7  ;;  %947 = vst [vmem:[#allocation2 + $0x80] sm:$0xff] %v915_v8  ;;  %v900_v15 = vadd.f32 %v775_v13, %v515_v5  ;;  %v916_v16 = vadd.f32 %v839_v14, %v531_v6  ;;  %v544_v2 = vld [vmem:[#allocation2 + $0xf0] sm:$0xff]  ;;  %v529_v7 = vld [vmem:[#allocation2 + $0x78] sm:$0xff] }
 0x144   : > { %934 = vst [vmem:[#allocation2 + $0x18] sm:$0xff] %v902_v11  ;;  %950 = vst [vmem:[#allocation2 + $0x98] sm:$0xff] %v918_v12  ;;  %v545_v8 = vld [vmem:[#allocation2 + $0xf8] sm:$0xff]  ;;  %v527_v13 = vld [vmem:[#allocation2 + $0x68] sm:$0xff] }
 0x145   : > { %932 = vst [vmem:[#allocation2 + $0x8] sm:$0xff] %v900_v15  ;;  %948 = vst [vmem:[#allocation2 + $0x88] sm:$0xff] %v916_v16  ;;  %v543_v14 = vld [vmem:[#allocation2 + $0xe8] sm:$0xff] }
 0x147   : > { %v1787_v21 = vpop.f32.mrb[4].mxu0  ;;  %v1803_v22 = vpop.f32.mrb[4].mxu1 }
 0x148   : > { %v905_v25 = vadd.f32 %v1787_v21, %v520_v17  ;;  %v921_v26 = vadd.f32 %v1803_v22, %v536_v18  ;;  %v788_v27 = vpop.f32.mrb[5].mxu0  ;;  %v852_v28 = vpop.f32.mrb[5].mxu1 }
 0x149   : > { %v903_v31 = vadd.f32 %v788_v27, %v518_v19  ;;  %v919_v32 = vadd.f32 %v852_v28, %v534_v20  ;;  %v1788_v33 = vpop.f32.mrb[6].mxu0  ;;  %v1804_v34 = vpop.f32.mrb[6].mxu1  ;;  %v2172_v27 = vld [vmem:[%s2261_s2] ss:$0 sm:$0xff] (!%p1499_p13) }
 0x14a   : > { %937 = vst [vmem:[#allocation2 + $0x30] sm:$0xff] %v905_v25  ;;  %953 = vst [vmem:[#allocation2 + $0xb0] sm:$0xff] %v921_v26  ;;  %v906_v35 = vadd.f32 %v1788_v33, %v521_v23  ;;  %v922_v36 = vadd.f32 %v1804_v34, %v537_v24  ;;  %v791_v37 = vpop.f32.mrb[7].mxu0  ;;  %v855_v38 = vpop.f32.mrb[7].mxu1  ;;  %v967_v25 = vld [vmem:[#allocation2] sm:$0xff] (!%p1499_p13) }
 0x14b   : > { %935 = vst [vmem:[#allocation2 + $0x20] sm:$0xff] %v903_v31  ;;  %951 = vst [vmem:[#allocation2 + $0xa0] sm:$0xff] %v919_v32  ;;  %v904_v39 = vadd.f32 %v791_v37, %v519_v29  ;;  %v920_v40 = vadd.f32 %v855_v38, %v535_v30  ;;  %v1006_v28 = vadd.f32 (!%p1499_p13), %v2172_v27, %v967_v25  ;;  %v1568_v30 = vld [vmem:[%s2134_s7] sm:$0xff] (!%p1499_p13)   ;;  %v969_v31 = vld [vmem:[#allocation2 + $0x10] sm:$0xff] (!%p1499_p13) }
 0x14c   : > { %938 = vst [vmem:[#allocation2 + $0x38] sm:$0xff] %v906_v35  ;;  %954 = vst [vmem:[#allocation2 + $0xb8] sm:$0xff] %v922_v36  ;;  %v968_v26 = vld [vmem:[#allocation2 + $0x8] sm:$0xff] (!%p1499_p13)  ;;  %v970_v32 = vld [vmem:[#allocation2 + $0x18] sm:$0xff] (!%p1499_p13)  ;;  %v1569_v33 = vunpack.c.l.bf16 (!%p1499_p13), %v1568_v30  ;;  %v1570_v34 = vunpack.c.h.bf16 (!%p1499_p13), %v1568_v30  ;;  %v1008_v35 = vadd.f32 (!%p1499_p13), %v2172_v27, %v969_v31 }
 0x14d   : > { %936 = vst [vmem:[#allocation2 + $0x28] sm:$0xff] %v904_v39  ;;  %952 = vst [vmem:[#allocation2 + $0xa8] sm:$0xff] %v920_v40  ;;  %v1007_v29 = vadd.f32 (!%p1499_p13), %v2172_v27, %v968_v26  ;;  %v1009_v36 = vadd.f32 (!%p1499_p13), %v2172_v27, %v970_v32  ;;  %v1711_v37 = vld [vmem:[%s2134_s7 + $0x8] sm:$0xff] (!%p1499_p13)  }
 0x14e   : > { %v1573_v40 = vunpack.c.l.bf16 (!%p1499_p13), %v1711_v37 }
 0x14f   : > { %v1791_v45 = vpop.f32.mrb[8].mxu0  ;;  %v1807_v46 = vpop.f32.mrb[8].mxu1 }
 0x150   : > { %v909_v49 = vadd.f32 %v1791_v45, %v524_v41  ;;  %v925_v50 = vadd.f32 %v1807_v46, %v540_v42  ;;  %v804_v51 = vpop.f32.mrb[9].mxu0  ;;  %v868_v52 = vpop.f32.mrb[9].mxu1  ;;  %v1574_v41 = vunpack.c.h.bf16 (!%p1499_p13), %v1711_v37 }
 0x151   : > { %v907_v55 = vadd.f32 %v804_v51, %v522_v43  ;;  %v923_v56 = vadd.f32 %v868_v52, %v538_v44  ;;  %v1792_v57 = vpop.f32.mrb[10].mxu0  ;;  %v1808_v58 = vpop.f32.mrb[10].mxu1  ;;  %v1712_v44 = vld [vmem:[%s2134_s7 + $0x10] sm:$0xff] (!%p1499_p13)   ;;  %v1713_v51 = vld [vmem:[%s2134_s7 + $0x18] sm:$0xff] (!%p1499_p13)   ;;  %v1104_v52 = vadd.f32 (!%p1499_p13), %v1573_v40, %v1008_v35 }
 0x152   : > { %941 = vst [vmem:[#allocation2 + $0x50] sm:$0xff] %v909_v49  ;;  %957 = vst [vmem:[#allocation2 + $0xd0] sm:$0xff] %v925_v50  ;;  %v910_v59 = vadd.f32 %v1792_v57, %v525_v47  ;;  %v926_v60 = vadd.f32 %v1808_v58, %v541_v48  ;;  %v807_v61 = vpop.f32.mrb[11].mxu0  ;;  %v871_v62 = vpop.f32.mrb[11].mxu1  ;;  %v971_v38 = vld [vmem:[#allocation2 + $0x20] sm:$0xff] (!%p1499_p13)  ;;  %v973_v45 = vld [vmem:[#allocation2 + $0x30] sm:$0xff] (!%p1499_p13)  ;;  %v1102_v47 = vadd.f32 (!%p1499_p13), %v1569_v33, %v1006_v28  ;;  %v1577_v49 = vunpack.c.l.bf16 (!%p1499_p13), %v1712_v44 }
 0x153   : > { %939 = vst [vmem:[#allocation2 + $0x40] sm:$0xff] %v907_v55  ;;  %955 = vst [vmem:[#allocation2 + $0xc0] sm:$0xff] %v923_v56  ;;  %v908_v63 = vadd.f32 %v807_v61, %v523_v53  ;;  %v924_v0 = vadd.f32 %v871_v62, %v539_v54  ;;  %v1010_v42 = vadd.f32 (!%p1499_p13), %v2172_v27, %v971_v38  ;;  %v974_v46 = vld [vmem:[#allocation2 + $0x38] sm:$0xff] (!%p1499_p13)  ;;  %v1578_v50 = vunpack.c.h.bf16 (!%p1499_p13), %v1712_v44 }
 0x154   : > { %942 = vst [vmem:[#allocation2 + $0x58] sm:$0xff] %v910_v59  ;;  %958 = vst [vmem:[#allocation2 + $0xd8] sm:$0xff] %v926_v60  ;;  %v972_v39 = vld [vmem:[#allocation2 + $0x28] sm:$0xff] (!%p1499_p13)  ;;  %v1103_v48 = vadd.f32 (!%p1499_p13), %v1570_v34, %v1007_v29  ;;  %v1105_v53 = vadd.f32 (!%p1499_p13), %v1574_v41, %v1009_v36  ;;  %v1012_v54 = vadd.f32 (!%p1499_p13), %v2172_v27, %v973_v45  ;;  %v1134_v57 = vmax.f32 (!%p1499_p13), %v1102_v47, 0.0  ;;  %v1717_v36 = vld [vmem:[%s2134_s7 + $0x38] sm:$0xff] (!%p1499_p13)  }
 0x155   : > { %940 = vst [vmem:[#allocation2 + $0x48] sm:$0xff] %v908_v63  ;;  %956 = vst [vmem:[#allocation2 + $0xc8] sm:$0xff] %v924_v0  ;;  %v1011_v43 = vadd.f32 (!%p1499_p13), %v2172_v27, %v972_v39  ;;  %v1013_v55 = vadd.f32 (!%p1499_p13), %v2172_v27, %v974_v46  ;;  %v1106_v59 = vadd.f32 (!%p1499_p13), %v1577_v49, %v1010_v42  ;;  %v1136_v62 = vmax.f32 (!%p1499_p13), %v1104_v52, 0.0  ;;  %v983_v41 = vld [vmem:[#allocation2 + $0x80] sm:$0xff] (!%p1499_p13)  ;;  %v984_v42 = vld [vmem:[#allocation2 + $0x88] sm:$0xff] (!%p1499_p13) }
 0x156   : > { %v1135_v58 = vmax.f32 (!%p1499_p13), %v1103_v48, 0.0  ;;  %v1137_v63 = vmax.f32 (!%p1499_p13), %v1105_v53, 0.0  ;;  %v1581_v0 = vunpack.c.l.bf16 (!%p1499_p13), %v1713_v51  ;;  %v1718_v47 = vld [vmem:[%s2134_s7 + $0x40] sm:$0xff] (!%p1499_p13)   ;;  %v985_v52 = vld [vmem:[#allocation2 + $0x90] sm:$0xff] (!%p1499_p13)  ;;  %v986_v53 = vld [vmem:[#allocation2 + $0x98] sm:$0xff] (!%p1499_p13) }
 0x157   : > { %v1795_v5 = vpop.f32.mrb[12].mxu0  ;;  %v1811_v6 = vpop.f32.mrb[12].mxu1  ;;  %966 = sbr.rel (%p1499_p13) target bundleno = 382 (0x17e), region = 85  ;;  %v1107_v60 = vadd.f32 (!%p1499_p13), %v1578_v50, %v1011_v43 }
 0x158   : > { %v913_v9 = vadd.f32 %v1795_v5, %v528_v1  ;;  %v929_v10 = vadd.f32 %v1811_v6, %v544_v2  ;;  %v820_v11 = vpop.f32.mrb[13].mxu0  ;;  %v884_v12 = vpop.f32.mrb[13].mxu1  ;;  %v1582_v1 = vunpack.c.h.bf16 (!%p1499_p13), %v1713_v51  ;;  %v1714_v2 = vld [vmem:[%s2134_s7 + $0x20] sm:$0xff] (!%p1499_p13)   ;;  %v1138_v5 = vmax.f32 (!%p1499_p13), %v1106_v59, 0.0 }
 0x159   : > { %v911_v15 = vadd.f32 %v820_v11, %v526_v3  ;;  %v927_v16 = vadd.f32 %v884_v12, %v542_v4  ;;  %v1796_v17 = vpop.f32.mrb[14].mxu0  ;;  %v1812_v18 = vpop.f32.mrb[14].mxu1  ;;  %v977_v3 = vld [vmem:[#allocation2 + $0x50] sm:$0xff] (!%p1499_p13)  ;;  %v1634_v4 = vpack.c.bf16 (!%p1499_p13), %v1135_v58, %v1134_v57  ;;  %v1139_v6 = vmax.f32 (!%p1499_p13), %v1107_v60, 0.0  ;;  %v1719_v58 = vld [vmem:[%s2134_s7 + $0x48] sm:$0xff] (!%p1499_p13)  }
 0x15a   : > { %945 = vst [vmem:[#allocation2 + $0x70] sm:$0xff] %v913_v9  ;;  %961 = vst [vmem:[#allocation2 + $0xf0] sm:$0xff] %v929_v10  ;;  %v914_v19 = vadd.f32 %v1796_v17, %v529_v7  ;;  %v930_v20 = vadd.f32 %v1812_v18, %v545_v8  ;;  %v823_v21 = vpop.f32.mrb[15].mxu0  ;;  %v887_v22 = vpop.f32.mrb[15].mxu1  ;;  %v975_v56 = vld [vmem:[#allocation2 + $0x40] sm:$0xff] (!%p1499_p13)  ;;  %v1715_v9 = vld [vmem:[%s2134_s7 + $0x28] sm:$0xff] (!%p1499_p13)   ;;  %v1639_v10 = vpack.c.bf16 (!%p1499_p13), %v1137_v63, %v1136_v62  ;;  %v1586_v17 = vunpack.c.h.bf16 (!%p1499_p13), %v1714_v2 }
 0x15b   : > { %943 = vst [vmem:[#allocation2 + $0x60] sm:$0xff] %v911_v15  ;;  %959 = vst [vmem:[#allocation2 + $0xe0] sm:$0xff] %v927_v16  ;;  %v912_v23 = vadd.f32 %v823_v21, %v527_v13  ;;  %v928_v24 = vadd.f32 %v887_v22, %v543_v14  ;;  %v1014_v7 = vadd.f32 (!%p1499_p13), %v2172_v27, %v975_v56  ;;  %v978_v8 = vld [vmem:[#allocation2 + $0x58] sm:$0xff] (!%p1499_p13)  ;;  %v1585_v16 = vunpack.c.l.bf16 (!%p1499_p13), %v1714_v2  ;;  %v987_v63 = vld [vmem:[#allocation2 + $0xa0] sm:$0xff] (!%p1499_p13) }
 0x15c   : > { %946 = vst [vmem:[#allocation2 + $0x78] sm:$0xff] %v914_v19  ;;  %962 = vst [vmem:[#allocation2 + $0xf8] sm:$0xff] %v930_v20  ;;  %v976_v61 = vld [vmem:[#allocation2 + $0x48] sm:$0xff] (!%p1499_p13)  ;;  %v1108_v11 = vadd.f32 (!%p1499_p13), %v1581_v0, %v1012_v54  ;;  %v1109_v12 = vadd.f32 (!%p1499_p13), %v1582_v1, %v1013_v55  ;;  %v1644_v15 = vpack.c.bf16 (!%p1499_p13), %v1139_v6, %v1138_v5  ;;  %v1716_v20 = vld [vmem:[%s2134_s7 + $0x30] sm:$0xff] (!%p1499_p13)   ;;  %v1590_v28 = vunpack.c.h.bf16 (!%p1499_p13), %v1715_v9 }
 0x15d   : > { %944 = vst [vmem:[#allocation2 + $0x68] sm:$0xff] %v912_v23  ;;  %960 = vst [vmem:[#allocation2 + $0xe8] sm:$0xff] %v928_v24  ;;  %v1015_v13 = vadd.f32 (!%p1499_p13), %v2172_v27, %v976_v61  ;;  %v1016_v18 = vadd.f32 (!%p1499_p13), %v2172_v27, %v977_v3  ;;  %v1017_v23 = vadd.f32 (!%p1499_p13), %v2172_v27, %v978_v8  ;;  %v1589_v24 = vunpack.c.l.bf16 (!%p1499_p13), %v1715_v9  ;;  %v1720_v5 = vld [vmem:[%s2134_s7 + $0x50] sm:$0xff] (!%p1499_p13)  }
 0x15e   : > { %1635 = vst [vmem:[%s2139_s9] sm:$0xff] %v1634_v4   ;;  %1726 = vst [vmem:[%s2139_s9 + $0x8] sm:$0xff] %v1639_v10   ;;  %v1140_v21 = vmax.f32 %v1108_v11, 0.0  ;;  %v1141_v22 = vmax.f32 %v1109_v12, 0.0  ;;  %v1110_v25 = vadd.f32 %v1585_v16, %v1014_v7  ;;  %v1593_v35 = vunpack.c.l.bf16 %v1716_v20  ;;  %v988_v4 = vld [vmem:[#allocation2 + $0xa8] sm:$0xff] }
 0x15f   : > { %1727 = vst [vmem:[%s2139_s9 + $0x10] sm:$0xff] %v1644_v15   ;;  %v1111_v26 = vadd.f32 %v1586_v17, %v1015_v13  ;;  %v1112_v33 = vadd.f32 %v1589_v24, %v1016_v18  ;;  %v1113_v39 = vadd.f32 %v1590_v28, %v1017_v23  ;;  %v1594_v40 = vunpack.c.h.bf16 %v1716_v20  ;;  %v990_v15 = vld [vmem:[#allocation2 + $0xb8] sm:$0xff] }
 0x160   : > { %v1649_v32 = vpack.c.bf16 %v1141_v22, %v1140_v21  ;;  %v1142_v37 = vmax.f32 %v1110_v25, 0.0  ;;  %v1597_v51 = vunpack.c.l.bf16 %v1717_v36  ;;  %v1598_v55 = vunpack.c.h.bf16 %v1717_v36  ;;  %v1721_v20 = vld [vmem:[%s2134_s7 + $0x58] sm:$0xff]   ;;  %v991_v25 = vld [vmem:[#allocation2 + $0xc0] sm:$0xff] }
 0x161   : > { %v981_v30 = vld [vmem:[#allocation2 + $0x70] sm:$0xff]  ;;  %v1143_v38 = vmax.f32 %v1111_v26, 0.0  ;;  %v1144_v43 = vmax.f32 %v1112_v33, 0.0  ;;  %v1145_v49 = vmax.f32 %v1113_v39, 0.0  ;;  %v1022_v56 = vadd.f32 %v2172_v27, %v983_v41  ;;  %v992_v26 = vld [vmem:[#allocation2 + $0xc8] sm:$0xff] }
 0x162   : > { %v979_v14 = vld [vmem:[#allocation2 + $0x60] sm:$0xff]  ;;  %1728 = vst [vmem:[%s2139_s9 + $0x18] sm:$0xff] %v1649_v32   ;;  %v1020_v45 = vadd.f32 %v2172_v27, %v981_v30  ;;  %v1023_v57 = vadd.f32 %v2172_v27, %v984_v42  ;;  %v1601_v62 = vunpack.c.l.bf16 %v1718_v47  ;;  %v1602_v1 = vunpack.c.h.bf16 %v1718_v47 }
 0x163   : > { %v1018_v29 = vadd.f32 %v2172_v27, %v979_v14  ;;  %v982_v31 = vld [vmem:[#allocation2 + $0x78] sm:$0xff]  ;;  %v1654_v48 = vpack.c.bf16 %v1143_v38, %v1142_v37  ;;  %v1659_v59 = vpack.c.bf16 %v1145_v49, %v1144_v43  ;;  %v1024_v2 = vadd.f32 %v2172_v27, %v985_v52  ;;  %v989_v14 = vld [vmem:[#allocation2 + $0xb0] sm:$0xff]  ;;  %v1722_v32 = vld [vmem:[%s2134_s7 + $0x60] sm:$0xff]  }
 0x164   : > { %v980_v19 = vld [vmem:[#allocation2 + $0x68] sm:$0xff]  ;;  %v1021_v46 = vadd.f32 %v2172_v27, %v982_v31  ;;  %v1116_v61 = vadd.f32 %v1597_v51, %v1020_v45  ;;  %v1025_v3 = vadd.f32 %v2172_v27, %v986_v53  ;;  %v1118_v8 = vadd.f32 %v1601_v62, %v1022_v56  ;;  %v993_v37 = vld [vmem:[#allocation2 + $0xd0] sm:$0xff]  ;;  %v994_v38 = vld [vmem:[#allocation2 + $0xd8] sm:$0xff] }
 0x165   : > { %v1019_v34 = vadd.f32 %v2172_v27, %v980_v19  ;;  %v1114_v44 = vadd.f32 %v1593_v35, %v1018_v29  ;;  %1729 = vst [vmem:[%s2139_s9 + $0x20] sm:$0xff] %v1654_v48   ;;  %1730 = vst [vmem:[%s2139_s9 + $0x28] sm:$0xff] %v1659_v59   ;;  %v1605_v9 = vunpack.c.l.bf16 %v1719_v58  ;;  %v1119_v11 = vadd.f32 %v1602_v1, %v1023_v57  ;;  %v1723_v43 = vld [vmem:[%s2134_s7 + $0x68] sm:$0xff]   ;;  %v995_v48 = vld [vmem:[#allocation2 + $0xe0] sm:$0xff] }
 0x166   : > { %v1117_v0 = vadd.f32 %v1598_v55, %v1021_v46  ;;  %v1148_v7 = vmax.f32 %v1116_v61, 0.0  ;;  %v1606_v12 = vunpack.c.h.bf16 %v1719_v58  ;;  %v1026_v13 = vadd.f32 %v2172_v27, %v987_v63  ;;  %v996_v53 = vld [vmem:[#allocation2 + $0xe8] sm:$0xff]  ;;  %v997_v63 = vld [vmem:[#allocation2 + $0xf0] sm:$0xff] }
 0x167   : > { %v1115_v50 = vadd.f32 %v1594_v40, %v1019_v34  ;;  %v1146_v54 = vmax.f32 %v1114_v44, 0.0  ;;  %v1150_v16 = vmax.f32 %v1118_v8, 0.0  ;;  %v1120_v17 = vadd.f32 %v1605_v9, %v1024_v2 }
 0x168   : > { %v1149_v10 = vmax.f32 %v1117_v0, 0.0  ;;  %v1027_v18 = vadd.f32 %v2172_v27, %v988_v4  ;;  %v1609_v19 = vunpack.c.l.bf16 %v1720_v5  ;;  %v1151_v22 = vmax.f32 %v1119_v11, 0.0  ;;  %v998_v0 = vld [vmem:[#allocation2 + $0xf8] sm:$0xff] }
 0x169   : > { %v1147_v60 = vmax.f32 %v1115_v50, 0.0  ;;  %v1121_v23 = vadd.f32 %v1606_v12, %v1025_v3  ;;  %v1610_v24 = vunpack.c.h.bf16 %v1720_v5  ;;  %v1152_v28 = vmax.f32 %v1120_v17, 0.0  ;;  %v1725_v5 = vld [vmem:[%s2134_s7 + $0x78] sm:$0xff]  }
 0x16a   : > { %v1669_v21 = vpack.c.bf16 %v1149_v10, %v1148_v7  ;;  %v1122_v29 = vadd.f32 %v1609_v19, %v1026_v13  ;;  %v1028_v30 = vadd.f32 %v2172_v27, %v989_v14  ;;  %v1029_v31 = vadd.f32 %v2172_v27, %v990_v15 }
 0x16b   : > { %v1664_v6 = vpack.c.bf16 %v1147_v60, %v1146_v54  ;;  %v1674_v33 = vpack.c.bf16 %v1151_v22, %v1150_v16  ;;  %v1153_v34 = vmax.f32 %v1121_v23, 0.0  ;;  %v1123_v35 = vadd.f32 %v1610_v24, %v1027_v18  ;;  %v1724_v54 = vld [vmem:[%s2134_s7 + $0x70] sm:$0xff]  }
 0x16c   : > { %1732 = vst [vmem:[%s2139_s9 + $0x38] sm:$0xff] %v1669_v21   ;;  %v1613_v36 = vunpack.c.l.bf16 %v1721_v20  ;;  %v1154_v39 = vmax.f32 %v1122_v29, 0.0  ;;  %v1614_v40 = vunpack.c.h.bf16 %v1721_v20  ;;  %v1030_v41 = vadd.f32 %v2172_v27, %v991_v25 }
 0x16d   : > { %1731 = vst [vmem:[%s2139_s9 + $0x30] sm:$0xff] %v1664_v6   ;;  %v1031_v42 = vadd.f32 %v2172_v27, %v992_v26  ;;  %1733 = vst [vmem:[%s2139_s9 + $0x40] sm:$0xff] %v1674_v33   ;;  %v1679_v44 = vpack.c.bf16 %v1153_v34, %v1152_v28  ;;  %v1155_v45 = vmax.f32 %v1123_v35, 0.0  ;;  %v1617_v47 = vunpack.c.l.bf16 %v1722_v32 }
 0x16e   : > { %v1124_v46 = vadd.f32 %v1613_v36, %v1028_v30  ;;  %v1125_v49 = vadd.f32 %v1614_v40, %v1029_v31  ;;  %v1618_v50 = vunpack.c.h.bf16 %v1722_v32  ;;  %v1032_v51 = vadd.f32 %v2172_v27, %v993_v37 }
 0x16f   : > { %v1033_v52 = vadd.f32 %v2172_v27, %v994_v38  ;;  %1734 = vst [vmem:[%s2139_s9 + $0x48] sm:$0xff] %v1679_v44   ;;  %v1684_v55 = vpack.c.bf16 %v1155_v45, %v1154_v39  ;;  %v1126_v57 = vadd.f32 %v1617_v47, %v1030_v41  ;;  %v1621_v58 = vunpack.c.l.bf16 %v1723_v43 }
 0x170   : > { %v1156_v56 = vmax.f32 %v1124_v46, 0.0  ;;  %v1157_v59 = vmax.f32 %v1125_v49, 0.0  ;;  %v1127_v60 = vadd.f32 %v1618_v50, %v1031_v42  ;;  %v1622_v61 = vunpack.c.h.bf16 %v1723_v43 }
 0x171   : > { %v1034_v62 = vadd.f32 %v2172_v27, %v995_v48  ;;  %1735 = vst [vmem:[%s2139_s9 + $0x50] sm:$0xff] %v1684_v55   ;;  %v1158_v1 = vmax.f32 %v1126_v57, 0.0  ;;  %v1128_v2 = vadd.f32 %v1621_v58, %v1032_v51  ;;  %v1035_v3 = vadd.f32 %v2172_v27, %v996_v53 }
 0x172   : > { %v1625_v4 = vunpack.c.l.bf16 %v1724_v54  ;;  %v1689_v6 = vpack.c.bf16 %v1157_v59, %v1156_v56  ;;  %v1159_v7 = vmax.f32 %v1127_v60, 0.0  ;;  %v1129_v8 = vadd.f32 %v1622_v61, %v1033_v52 }
 0x173   : > { %v1626_v9 = vunpack.c.h.bf16 %v1724_v54  ;;  %v1160_v10 = vmax.f32 %v1128_v2, 0.0  ;;  %v1036_v12 = vadd.f32 %v2172_v27, %v997_v63  ;;  %v1037_v13 = vadd.f32 %v2172_v27, %v998_v0 }
 0x174   : > { %v1130_v11 = vadd.f32 %v1625_v4, %v1034_v62  ;;  %1736 = vst [vmem:[%s2139_s9 + $0x58] sm:$0xff] %v1689_v6   ;;  %v1694_v14 = vpack.c.bf16 %v1159_v7, %v1158_v1  ;;  %v1161_v15 = vmax.f32 %v1129_v8, 0.0  ;;  %v1629_v17 = vunpack.c.l.bf16 %v1725_v5 }
 0x175   : > { %v1131_v16 = vadd.f32 %v1626_v9, %v1035_v3  ;;  %v1630_v19 = vunpack.c.h.bf16 %v1725_v5 }
 0x176   : > { %v1162_v18 = vmax.f32 %v1130_v11, 0.0  ;;  %1737 = vst [vmem:[%s2139_s9 + $0x60] sm:$0xff] %v1694_v14   ;;  %v1699_v20 = vpack.c.bf16 %v1161_v15, %v1160_v10  ;;  %v1132_v22 = vadd.f32 %v1629_v17, %v1036_v12 }
 0x177   : > { %v1163_v21 = vmax.f32 %v1131_v16, 0.0  ;;  %v1133_v23 = vadd.f32 %v1630_v19, %v1037_v13 }
 0x178   : > { %1738 = vst [vmem:[%s2139_s9 + $0x68] sm:$0xff] %v1699_v20   ;;  %v1164_v25 = vmax.f32 %v1132_v22, 0.0 }
 0x179   : > { %v1704_v24 = vpack.c.bf16 %v1163_v21, %v1162_v18  ;;  %v1165_v26 = vmax.f32 %v1133_v23, 0.0 }
 0x17b   : > { %1739 = vst [vmem:[%s2139_s9 + $0x70] sm:$0xff] %v1704_v24   ;;  %v1709_v27 = vpack.c.bf16 %v1165_v26, %v1164_v25 }
 0x17d   : > { %1740 = vst [vmem:[%s2139_s9 + $0x78] sm:$0xff] %v1709_v27  }
 0x17e PF: > { %s14_s21 = sadd.s32 1, %s1965_s21   ;;  %s2264_s15 = smov %s1945_s16 }
 0x17f   : > { %p11_p0 = scmp.ge.s32.totalorder %s14_s21, 12   ;;  %s2265_s16 = smov %s2044_s28 }
 0x180   : > { %s2266_s17 = smov %s1957_s19  ;;  %s2267_s18 = smov %s1961_s20 }
 0x181   : > { %s2268_s19 = smov %s2271_s22  ;;  %s2269_s20 = smov %s2275_s23 }
 0x182   :  { %13 = sbr.rel (!%p11_p0) target bundleno = 4 (0x4), region = 129 }

// kernel: _lambda_.25
= control target key start
LH: loop header
LB: loop body
LE: loop exit
PB: predicated region body
PF: predicated region fallthrough
CT: control target
= control target key end

     0   :  { %s1190_s12 = smov 0   ;;  %s1192_s13 = smov 0   ;;  %s1322_s0 = inlined_call_operand.vmem [shape: bf16[128,640], index: 0, kind: input, shape index: {}]   ;;  %s1323_s1 = inlined_call_operand.vmem [shape: bf16[640,128], index: 1, kind: input, shape index: {}]   ;;  %s1324_s2 = inlined_call_operand.vmem [shape: f32[1,128], index: 2, kind: input, shape index: {}]   ;;  %s1325_s3 = inlined_call_operand.vmem [shape: bf16[128,128], index: 3, kind: output, shape index: {}]  }
   0x1   :  { %s1194_s14 = smov 0   ;;  %s1196_s15 = smov 0  }
   0x2   :  { %s1198_s16 = smov 0  }
   0x3 LB: > { %s25_s17 = sadd.s32 1, %s1163_s15  ;;  %p48_p1 = scmp.ne.s32.totalorder %s1155_s13, %s1151_s12  ;;  %s1167_s16 = sphi %s1198_s16, %s13_s16   ;;  %s1163_s15 = sphi %s1196_s15, %s1329_s15   ;;  %s1159_s14 = sphi %s1194_s14, %s1328_s14   ;;  %s1155_s13 = sphi %s1192_s13, %s1327_s13   ;;  %s1151_s12 = sphi %s1190_s12, %s1326_s12  }
   0x4   : > { %p26_p0 = scmp.ge.s32.totalorder %s25_s17, 5  ;;  %p49_p2 = scmp.eq.s32.totalorder %s1167_s16, 0 }
   0x5   : > { %s41_s19 = sadd.s32 1, %s1155_s13  ;;  %p899_p5 = scmp.ge.s32.totalorder %s1167_s16, 5 }
   0x6   : > { %s1331_s17 = smov (%p26_p0, %s25_s17), 0  ;;  %p50_p3 = por %p49_p2, %p48_p1 }
   0x7   : > { %s37_s18 = ssub.s32 %s1163_s15, %s1331_s17  ;;  %162 = sbr.rel (%p899_p5) target bundleno = 28 (0x1c), region = 20 }
   0x8   : > { %p39_p4 = scmp.eq.s32.totalorder %s37_s18, 0 }
   0xa   : > { %s1225_s20 = scalar_select %p39_p4, %s1155_s13, %s41_s19  }
   0xe   : > { %165 = sbr.rel (!%p50_p3) target bundleno = 28 (0x1c), region = 24  ;;  %s167_s21 = sand.u32 (%p50_p3), 1, %s1155_s13  }
   0xf   : > { %s901_s22 = sshll.u32 (%p50_p3), %s1163_s15, 2  ;;  %s900_s23 = sshll.u32 (%p50_p3), %s167_s21, 6 }
  0x10   : > { %s1233_s26 = scalar_lea.vmem (%p50_p3), %s1322_s0, %s901_s22  ;;  %s169_s27 = scalar_lea.vmem (%p50_p3), [#allocation3], %s900_s23 }
  0x11   : > { %v190_v0 = vld [vmem:[%s1233_s26] sm:$0xf] (%p50_p3)  ;;  %v192_v1 = vld [vmem:[%s1233_s26 + $0x14] sm:$0xf] (%p50_p3)  ;;  %v194_v2 = vld [vmem:[%s1233_s26 + $0x28] sm:$0xf] (%p50_p3) }
  0x12   : > { %191 = vst [vmem:[%s169_s27] sm:$0xf] (%p50_p3), %v190_v0  ;;  %193 = vst [vmem:[%s169_s27 + $0x4] sm:$0xf] (%p50_p3), %v192_v1  ;;  %v196_v3 = vld [vmem:[%s1233_s26 + $0x3c] sm:$0xf] (%p50_p3) }
  0x13   : > { %v198_v4 = vld [vmem:[%s1233_s26 + $0x50] sm:$0xf] (%p50_p3)  ;;  %195 = vst [vmem:[%s169_s27 + $0x8] sm:$0xf] (%p50_p3), %v194_v2  ;;  %197 = vst [vmem:[%s169_s27 + $0xc] sm:$0xf] (%p50_p3), %v196_v3 }
  0x14   : > { %199 = vst [vmem:[%s169_s27 + $0x10] sm:$0xf] (%p50_p3), %v198_v4  ;;  %v200_v5 = vld [vmem:[%s1233_s26 + $0x64] sm:$0xf] (%p50_p3)  ;;  %v202_v6 = vld [vmem:[%s1233_s26 + $0x78] sm:$0xf] (%p50_p3) }
  0x15   : > { %v204_v7 = vld [vmem:[%s1233_s26 + $0x8c] sm:$0xf]  ;;  %201 = vst [vmem:[%s169_s27 + $0x14] sm:$0xf] %v200_v5  ;;  %203 = vst [vmem:[%s169_s27 + $0x18] sm:$0xf] %v202_v6 }
  0x16   : > { %205 = vst [vmem:[%s169_s27 + $0x1c] sm:$0xf] %v204_v7  ;;  %v206_v8 = vld [vmem:[%s1233_s26 + $0xa0] sm:$0xf]  ;;  %v208_v9 = vld [vmem:[%s1233_s26 + $0xb4] sm:$0xf] }
  0x17   : > { %v210_v10 = vld [vmem:[%s1233_s26 + $0xc8] sm:$0xf]  ;;  %207 = vst [vmem:[%s169_s27 + $0x20] sm:$0xf] %v206_v8  ;;  %209 = vst [vmem:[%s169_s27 + $0x24] sm:$0xf] %v208_v9 }
  0x18   : > { %211 = vst [vmem:[%s169_s27 + $0x28] sm:$0xf] %v210_v10  ;;  %v212_v11 = vld [vmem:[%s1233_s26 + $0xdc] sm:$0xf]  ;;  %v214_v12 = vld [vmem:[%s1233_s26 + $0xf0] sm:$0xf] }
  0x19   : > { %v216_v13 = vld [vmem:[%s1233_s26 + $0x104] sm:$0xf]  ;;  %213 = vst [vmem:[%s169_s27 + $0x2c] sm:$0xf] %v212_v11  ;;  %215 = vst [vmem:[%s169_s27 + $0x30] sm:$0xf] %v214_v12 }
  0x1a   : > { %217 = vst [vmem:[%s169_s27 + $0x34] sm:$0xf] %v216_v13  ;;  %v218_v14 = vld [vmem:[%s1233_s26 + $0x118] sm:$0xf]  ;;  %v220_v15 = vld [vmem:[%s1233_s26 + $0x12c] sm:$0xf] }
  0x1b   : > { %219 = vst [vmem:[%s169_s27 + $0x38] sm:$0xf] %v218_v14  ;;  %221 = vst [vmem:[%s169_s27 + $0x3c] sm:$0xf] %v220_v15 }
  0x1c PF: > { %p902_p6 = scmp.ge.s32.totalorder %s1167_s16, 1  ;;  %p287_p7 = scmp.lt.s32.totalorder %s1167_s16, 6 }
  0x1e   : > { %p288_p8 = pnand %p902_p6, %p287_p7 }
  0x1f   : > { %s294_s28 = sand.u32 (!%p288_p8), 1, %s1151_s12   ;;  %s904_s29 = sshll.u32 (!%p288_p8), %s1159_s14, 4 }
  0x20   : > { %291 = sbr.rel (%p288_p8) target bundleno = 323 (0x143), region = 69  ;;  %s903_s30 = sshll.u32 (!%p288_p8), %s294_s28, 6 }
  0x21   : > { %p333_p9 = scmp.lt.s32.totalorder (!%p288_p8), %s904_s29, 79  ;;  %s1260_s8 = scalar_lea.vmem (!%p288_p8), [#allocation3], %s903_s30 }
  0x22   : > { %p906_p10 = scmp.ne.s32.totalorder (!%p288_p8), %s1159_s14, 0 }
  0x27   : > { %s1333_s29 = smov (!%p333_p9, %s904_s29), 79  ;;  %357 = sbr.rel (%p906_p10) target bundleno = 49 (0x31), region = 77 }
  0x28   : > { %s905_s4 = sshll.u32 %s1333_s29, 2  ;;  %v1169_v16 = vmov (!%p906_p10), 0.0  }
  0x29   : > { %s1258_s7 = scalar_lea.vmem %s1323_s1, %s905_s4  ;;  %358 = vst [vmem:[#allocation2] sm:$0xff] (!%p906_p10), %v1169_v16  ;;  %359 = vst [vmem:[#allocation2 + $0x8] sm:$0xff] (!%p906_p10), %v1169_v16 }
  0x2a   : > { %360 = vst [vmem:[#allocation2 + $0x10] sm:$0xff] (!%p906_p10), %v1169_v16  ;;  %361 = vst [vmem:[#allocation2 + $0x18] sm:$0xff] (!%p906_p10), %v1169_v16 }
  0x2b   : > { %362 = vst [vmem:[#allocation2 + $0x20] sm:$0xff] (!%p906_p10), %v1169_v16  ;;  %363 = vst [vmem:[#allocation2 + $0x28] sm:$0xff] (!%p906_p10), %v1169_v16 }
  0x2c   : > { %364 = vst [vmem:[#allocation2 + $0x30] sm:$0xff] (!%p906_p10), %v1169_v16  ;;  %365 = vst [vmem:[#allocation2 + $0x38] sm:$0xff] (!%p906_p10), %v1169_v16 }
  0x2d   : > { %366 = vst [vmem:[#allocation2 + $0x40] sm:$0xff] (!%p906_p10), %v1169_v16  ;;  %367 = vst [vmem:[#allocation2 + $0x48] sm:$0xff] (!%p906_p10), %v1169_v16 }
  0x2e   : > { %368 = vst [vmem:[#allocation2 + $0x50] sm:$0xff] %v1169_v16  ;;  %369 = vst [vmem:[#allocation2 + $0x58] sm:$0xff] %v1169_v16 }
  0x2f   : > { %370 = vst [vmem:[#allocation2 + $0x60] sm:$0xff] %v1169_v16  ;;  %371 = vst [vmem:[#allocation2 + $0x68] sm:$0xff] %v1169_v16 }
  0x30   : > { %372 = vst [vmem:[#allocation2 + $0x70] sm:$0xff] %v1169_v16  ;;  %373 = vst [vmem:[#allocation2 + $0x78] sm:$0xff] %v1169_v16 }
  0x31 PF: > { %v1113_v17 = vld [vmem:[%s1258_s7] sm:$0xff]   ;;  %v1114_v18 = vld [vmem:[%s1258_s7 + $0x8] sm:$0xff]   ;;  %v1115_v19 = vld [vmem:[%s1258_s7 + $0x10] sm:$0xff]   ;;  %p923_p11 = scmp.ne.s32.totalorder %s1159_s14, 4 }
  0x32   : > { %1024 = vmatprep.subr.bf16.mxu0 %v1113_v17  ;;  %1056 = vmatprep.subr.bf16.mxu1 %v1113_v17  ;;  %v1116_v20 = vld [vmem:[%s1258_s7 + $0x18] sm:$0xff]   ;;  %v1121_v21 = vld [vmem:[%s1260_s8] sm:$0xff]   ;;  %v1118_v24 = vld [vmem:[%s1258_s7 + $0x28] sm:$0xff]  }
  0x33   : > { %1025 = vmatpush3.bf16.msra.mxu0 %v1113_v17  ;;  %1064 = vmatpush3.bf16.msra.mxu1 %v1113_v17  ;;  %v1122_v22 = vld [vmem:[%s1260_s8 + $0x20] sm:$0xff]   ;;  %v1119_v25 = vld [vmem:[%s1258_s7 + $0x30] sm:$0xff]   ;;  %v1120_v26 = vld [vmem:[%s1258_s7 + $0x38] sm:$0xff]  }
  0x34   : > { %1026 = vmatprep.subr.bf16.mxu0 %v1114_v18  ;;  %1057 = vmatprep.subr.bf16.mxu1 %v1114_v18  ;;  %v1117_v23 = vld [vmem:[%s1258_s7 + $0x20] sm:$0xff]   ;;  %v1123_v27 = vld [vmem:[%s1260_s8 + $0x8] sm:$0xff]   ;;  %v1125_v29 = vld [vmem:[%s1260_s8 + $0x10] sm:$0xff]  }
  0x35   : > { %1040 = vmatprep.mubr.bf16.mxu0 %v1121_v21  ;;  %1048 = vmatprep.mubr.bf16.mxu1 %v1122_v22  ;;  %v1124_v28 = vld [vmem:[%s1260_s8 + $0x28] sm:$0xff]   ;;  %v1126_v30 = vld [vmem:[%s1260_s8 + $0x30] sm:$0xff]   ;;  %v1127_v31 = vld [vmem:[%s1260_s8 + $0x18] sm:$0xff]  }
  0x36   : > { %v1128_v32 = vld [vmem:[%s1260_s8 + $0x38] sm:$0xff]   ;;  %v376_v33 = vld [vmem:[#allocation2 + $0x10] sm:$0xff]  ;;  %v374_v35 = vld [vmem:[#allocation2] sm:$0xff] }
  0x37   : > { %1027 = vmatpush3.bf16.msra.mxu0 %v1114_v18  ;;  %1065 = vmatpush3.bf16.msra.mxu1 %v1114_v18  ;;  %v384_v34 = vld [vmem:[#allocation2 + $0x50] sm:$0xff]  ;;  %v382_v36 = vld [vmem:[#allocation2 + $0x40] sm:$0xff]  ;;  %v377_v39 = vld [vmem:[#allocation2 + $0x18] sm:$0xff] }
  0x38   : > { %1028 = vmatprep.subr.bf16.mxu0 %v1115_v19  ;;  %1058 = vmatprep.subr.bf16.mxu1 %v1115_v19  ;;  %v385_v40 = vld [vmem:[#allocation2 + $0x58] sm:$0xff]  ;;  %v375_v45 = vld [vmem:[#allocation2 + $0x8] sm:$0xff]  ;;  %v380_v57 = vld [vmem:[#allocation2 + $0x30] sm:$0xff] }
  0x39   : > { %v383_v46 = vld [vmem:[#allocation2 + $0x48] sm:$0xff]  ;;  %v388_v58 = vld [vmem:[#allocation2 + $0x70] sm:$0xff]  ;;  %v378_v59 = vld [vmem:[#allocation2 + $0x20] sm:$0xff] }
  0x3a   : > { %v386_v60 = vld [vmem:[#allocation2 + $0x60] sm:$0xff]  ;;  %v381_v63 = vld [vmem:[#allocation2 + $0x38] sm:$0xff]  ;;  %v379_v5 = vld [vmem:[#allocation2 + $0x28] sm:$0xff] }
  0x3b   : > { %1029 = vmatpush3.bf16.msra.mxu0 %v1115_v19  ;;  %1066 = vmatpush3.bf16.msra.mxu1 %v1115_v19  ;;  %v389_v0 = vld [vmem:[#allocation2 + $0x78] sm:$0xff]  ;;  %v387_v6 = vld [vmem:[#allocation2 + $0x68] sm:$0xff]  ;;  %v924_v19 = vld [vmem:[%s1324_s2] ss:$0 sm:$0xff] (!%p923_p11) }
  0x3c   : > { %1030 = vmatprep.subr.bf16.mxu0 %v1116_v20  ;;  %1059 = vmatprep.subr.bf16.mxu1 %v1116_v20 }
  0x3f   : > { %1031 = vmatpush3.bf16.msra.mxu0 %v1116_v20  ;;  %1067 = vmatpush3.bf16.msra.mxu1 %v1116_v20 }
  0x40   : > { %1032 = vmatprep.subr.bf16.mxu0 %v1117_v23  ;;  %1060 = vmatprep.subr.bf16.mxu1 %v1117_v23 }
  0x43   : > { %1033 = vmatpush3.bf16.msra.mxu0 %v1117_v23  ;;  %1068 = vmatpush3.bf16.msra.mxu1 %v1117_v23 }
  0x44   : > { %1034 = vmatprep.subr.bf16.mxu0 %v1118_v24  ;;  %1061 = vmatprep.subr.bf16.mxu1 %v1118_v24 }
  0x47   : > { %1035 = vmatpush3.bf16.msra.mxu0 %v1118_v24  ;;  %1069 = vmatpush3.bf16.msra.mxu1 %v1118_v24 }
  0x48   : > { %1036 = vmatprep.subr.bf16.mxu0 %v1119_v25  ;;  %1062 = vmatprep.subr.bf16.mxu1 %v1119_v25 }
  0x4b   : > { %1037 = vmatpush3.bf16.msra.mxu0 %v1119_v25  ;;  %1070 = vmatpush3.bf16.msra.mxu1 %v1119_v25 }
  0x4c   : > { %1038 = vmatprep.subr.bf16.mxu0 %v1120_v26  ;;  %1063 = vmatprep.subr.bf16.mxu1 %v1120_v26 }
  0x4f   : > { %1039 = vmatpush3.bf16.msra.mxu0 %v1120_v26  ;;  %1071 = vmatpush3.bf16.msra.mxu1 %v1120_v26 }
  0x52   : > { %1041 = vmatmul.mubr.bf16.vlgmr.msra.gmra.mrb[0].mxu0 %v1123_v27  ;;  %1049 = vmatmul.mubr.bf16.vlgmr.msra.gmra.mrb[0].mxu1 %v1124_v28 }
  0x53   : > { %1044 = vmatprep.mubr.bf16.mxu0 %v1125_v29  ;;  %1052 = vmatprep.mubr.bf16.mxu1 %v1126_v30 }
  0x5a   : > { %1045 = vmatmul.mubr.bf16.gmra.mrb[4].mxu0 %v1127_v31  ;;  %1053 = vmatmul.mubr.bf16.gmra.mrb[4].mxu1 %v1128_v32 }
 0x125   : > { %v1042_v37 = vpop.f32.mrb[0].mxu0  ;;  %v1050_v38 = vpop.f32.mrb[0].mxu1 }
 0x126   : > { %v617_v41 = vadd.f32 %v1042_v37, %v376_v33  ;;  %v625_v42 = vadd.f32 %v1050_v38, %v384_v34  ;;  %v552_v43 = vpop.f32.mrb[1].mxu0  ;;  %v584_v44 = vpop.f32.mrb[1].mxu1 }
 0x127   : > { %v615_v47 = vadd.f32 %v552_v43, %v374_v35  ;;  %v623_v48 = vadd.f32 %v584_v44, %v382_v36  ;;  %v1043_v49 = vpop.f32.mrb[2].mxu0  ;;  %v1051_v50 = vpop.f32.mrb[2].mxu1 }
 0x128   : > { %633 = vst [vmem:[#allocation2 + $0x10] sm:$0xff] %v617_v41  ;;  %641 = vst [vmem:[#allocation2 + $0x50] sm:$0xff] %v625_v42  ;;  %v618_v51 = vadd.f32 %v1043_v49, %v377_v39  ;;  %v626_v52 = vadd.f32 %v1051_v50, %v385_v40  ;;  %v555_v53 = vpop.f32.mrb[3].mxu0  ;;  %v587_v54 = vpop.f32.mrb[3].mxu1 }
 0x129   : > { %631 = vst [vmem:[#allocation2] sm:$0xff] %v615_v47  ;;  %639 = vst [vmem:[#allocation2 + $0x40] sm:$0xff] %v623_v48  ;;  %v616_v55 = vadd.f32 %v555_v53, %v375_v45  ;;  %v624_v56 = vadd.f32 %v587_v54, %v383_v46 }
 0x12a   : > { %634 = vst [vmem:[#allocation2 + $0x18] sm:$0xff] %v618_v51  ;;  %642 = vst [vmem:[#allocation2 + $0x58] sm:$0xff] %v626_v52 }
 0x12b   : > { %632 = vst [vmem:[#allocation2 + $0x8] sm:$0xff] %v616_v55  ;;  %640 = vst [vmem:[#allocation2 + $0x48] sm:$0xff] %v624_v56 }
 0x12d   : > { %v1046_v61 = vpop.f32.mrb[4].mxu0  ;;  %v1054_v62 = vpop.f32.mrb[4].mxu1  ;;  %650 = sbr.rel (%p923_p11) target bundleno = 323 (0x143), region = 81 }
 0x12e   : > { %v621_v1 = vadd.f32 %v1046_v61, %v380_v57  ;;  %v629_v2 = vadd.f32 %v1054_v62, %v388_v58  ;;  %v568_v3 = vpop.f32.mrb[5].mxu0  ;;  %v600_v4 = vpop.f32.mrb[5].mxu1 }
 0x12f   : > { %v619_v7 = vadd.f32 %v568_v3, %v378_v59  ;;  %v627_v8 = vadd.f32 %v600_v4, %v386_v60  ;;  %v1047_v9 = vpop.f32.mrb[6].mxu0  ;;  %v1055_v10 = vpop.f32.mrb[6].mxu1  ;;  %v653_v22 = vld [vmem:[#allocation2 + $0x10] sm:$0xff] (!%p923_p11) }
 0x130   : > { %637 = vst [vmem:[#allocation2 + $0x30] sm:$0xff] %v621_v1  ;;  %645 = vst [vmem:[#allocation2 + $0x70] sm:$0xff] %v629_v2  ;;  %v622_v11 = vadd.f32 %v1047_v9, %v381_v63  ;;  %v630_v12 = vadd.f32 %v1055_v10, %v389_v0  ;;  %v571_v13 = vpop.f32.mrb[7].mxu0  ;;  %v603_v14 = vpop.f32.mrb[7].mxu1  ;;  %v651_v17 = vld [vmem:[#allocation2] sm:$0xff] (!%p923_p11)  ;;  %v676_v25 = vadd.f32 (!%p923_p11), %v924_v19, %v653_v22  ;;  %v661_v37 = vld [vmem:[#allocation2 + $0x50] sm:$0xff] (!%p923_p11) }
 0x131   : > { %635 = vst [vmem:[#allocation2 + $0x20] sm:$0xff] %v619_v7  ;;  %643 = vst [vmem:[#allocation2 + $0x60] sm:$0xff] %v627_v8  ;;  %v620_v15 = vadd.f32 %v571_v13, %v379_v5  ;;  %v628_v16 = vadd.f32 %v603_v14, %v387_v6  ;;  %v674_v20 = vadd.f32 (!%p923_p11), %v924_v19, %v651_v17  ;;  %v654_v23 = vld [vmem:[#allocation2 + $0x18] sm:$0xff] (!%p923_p11)  ;;  %v659_v35 = vld [vmem:[#allocation2 + $0x40] sm:$0xff] (!%p923_p11) }
 0x132   : > { %638 = vst [vmem:[#allocation2 + $0x38] sm:$0xff] %v622_v11  ;;  %646 = vst [vmem:[#allocation2 + $0x78] sm:$0xff] %v630_v12  ;;  %v652_v18 = vld [vmem:[#allocation2 + $0x8] sm:$0xff] (!%p923_p11)  ;;  %v677_v26 = vadd.f32 (!%p923_p11), %v924_v19, %v654_v23  ;;  %v692_v38 = vmax.f32 (!%p923_p11), %v676_v25, 0.0  ;;  %v662_v42 = vld [vmem:[#allocation2 + $0x58] sm:$0xff] (!%p923_p11)  ;;  %v682_v47 = vadd.f32 (!%p923_p11), %v924_v19, %v659_v35  ;;  %v684_v52 = vadd.f32 (!%p923_p11), %v924_v19, %v661_v37 }
 0x133   : > { %636 = vst [vmem:[#allocation2 + $0x28] sm:$0xff] %v620_v15  ;;  %644 = vst [vmem:[#allocation2 + $0x68] sm:$0xff] %v628_v16  ;;  %v675_v21 = vadd.f32 (!%p923_p11), %v924_v19, %v652_v18  ;;  %v690_v31 = vmax.f32 (!%p923_p11), %v674_v20, 0.0  ;;  %v660_v36 = vld [vmem:[#allocation2 + $0x48] sm:$0xff] (!%p923_p11)  ;;  %v685_v57 = vadd.f32 (!%p923_p11), %v924_v19, %v662_v42 }
 0x134   : > { %v693_v39 = vmax.f32 %v677_v26, 0.0  ;;  %v683_v51 = vadd.f32 %v924_v19, %v660_v36  ;;  %v698_v56 = vmax.f32 %v682_v47, 0.0  ;;  %v700_v61 = vmax.f32 %v684_v52, 0.0 }
 0x135   : > { %v691_v32 = vmax.f32 %v675_v21, 0.0  ;;  %v701_v63 = vmax.f32 %v685_v57, 0.0 }
 0x136   : > { %v969_v49 = vpack.c.bf16 %v693_v39, %v692_v38  ;;  %v699_v60 = vmax.f32 %v683_v51, 0.0 }
 0x137   : > { %v657_v29 = vld [vmem:[#allocation2 + $0x30] sm:$0xff]  ;;  %v964_v44 = vpack.c.bf16 %v691_v32, %v690_v31  ;;  %v989_v5 = vpack.c.bf16 %v701_v63, %v700_v61 }
 0x138   : > { %v655_v24 = vld [vmem:[#allocation2 + $0x20] sm:$0xff]  ;;  %v680_v34 = vadd.f32 %v924_v19, %v657_v29  ;;  %v665_v53 = vld [vmem:[#allocation2 + $0x70] sm:$0xff]  ;;  %1001 = vst [vmem:[%s1325_s3 + $0x8] sm:$0xff] %v969_v49   ;;  %v984_v3 = vpack.c.bf16 %v699_v60, %v698_v56 }
 0x139   : > { %v678_v28 = vadd.f32 %v924_v19, %v655_v24  ;;  %v658_v30 = vld [vmem:[#allocation2 + $0x38] sm:$0xff]  ;;  %v663_v43 = vld [vmem:[#allocation2 + $0x60] sm:$0xff]  ;;  %965 = vst [vmem:[%s1325_s3] sm:$0xff] %v964_v44   ;;  %v688_v1 = vadd.f32 %v924_v19, %v665_v53  ;;  %1005 = vst [vmem:[%s1325_s3 + $0x28] sm:$0xff] %v989_v5  }
 0x13a   : > { %v656_v27 = vld [vmem:[#allocation2 + $0x28] sm:$0xff]  ;;  %v681_v41 = vadd.f32 %v924_v19, %v658_v30  ;;  %v696_v46 = vmax.f32 %v680_v34, 0.0  ;;  %v666_v54 = vld [vmem:[#allocation2 + $0x78] sm:$0xff]  ;;  %v686_v58 = vadd.f32 %v924_v19, %v663_v43  ;;  %1004 = vst [vmem:[%s1325_s3 + $0x20] sm:$0xff] %v984_v3  }
 0x13b   : > { %v679_v33 = vadd.f32 %v924_v19, %v656_v27  ;;  %v694_v40 = vmax.f32 %v678_v28, 0.0  ;;  %v664_v48 = vld [vmem:[#allocation2 + $0x68] sm:$0xff]  ;;  %v689_v2 = vadd.f32 %v924_v19, %v666_v54  ;;  %v704_v6 = vmax.f32 %v688_v1, 0.0 }
 0x13c   : > { %v697_v50 = vmax.f32 %v681_v41, 0.0  ;;  %v687_v62 = vadd.f32 %v924_v19, %v664_v48  ;;  %v702_v0 = vmax.f32 %v686_v58, 0.0 }
 0x13d   : > { %v695_v45 = vmax.f32 %v679_v33, 0.0  ;;  %v705_v7 = vmax.f32 %v689_v2, 0.0 }
 0x13e   : > { %v979_v59 = vpack.c.bf16 %v697_v50, %v696_v46  ;;  %v703_v4 = vmax.f32 %v687_v62, 0.0 }
 0x13f   : > { %v974_v55 = vpack.c.bf16 %v695_v45, %v694_v40  ;;  %v999_v9 = vpack.c.bf16 %v705_v7, %v704_v6 }
 0x140   : > { %1003 = vst [vmem:[%s1325_s3 + $0x18] sm:$0xff] %v979_v59   ;;  %v994_v8 = vpack.c.bf16 %v703_v4, %v702_v0 }
 0x141   : > { %1002 = vst [vmem:[%s1325_s3 + $0x10] sm:$0xff] %v974_v55   ;;  %1007 = vst [vmem:[%s1325_s3 + $0x38] sm:$0xff] %v999_v9  }
 0x142   : > { %1006 = vst [vmem:[%s1325_s3 + $0x30] sm:$0xff] %v994_v8  }
 0x143 PF: > { %s13_s16 = sadd.s32 1, %s1167_s16   ;;  %s1326_s12 = smov %s1155_s13 }
 0x144   : > { %p10_p12 = scmp.ge.s32.totalorder %s13_s16, 7   ;;  %s1327_s13 = smov %s1225_s20 }
 0x145   : > { %s1328_s14 = smov %s1163_s15  ;;  %s1329_s15 = smov %s1331_s17 }
 0x146   :  { %12 = sbr.rel (!%p10_p12) target bundleno = 3 (0x3), region = 122 }

// kernel: _lambda_.26
= control target key start
LH: loop header
LB: loop body
LE: loop exit
PB: predicated region body
PF: predicated region fallthrough
CT: control target
= control target key end

     0   :  { %s705_s1 = inlined_call_operand.vmem [shape: bf16[128,128], index: 1, kind: input, shape index: {}]   ;;  %s706_s0 = inlined_call_operand.vmem [shape: bf16[128,128], index: 0, kind: input, shape index: {}]   ;;  %s707_s2 = inlined_call_operand.vmem [shape: f32[1,128], index: 2, kind: input, shape index: {}]   ;;  %s708_s3 = inlined_call_operand.vmem [shape: bf16[128,128], index: 3, kind: output, shape index: {}]  }
   0x1   :  { %v594_v0 = vld [vmem:[%s705_s1] sm:$0xff]   ;;  %v595_v1 = vld [vmem:[%s705_s1 + $0x8] sm:$0xff]   ;;  %v596_v2 = vld [vmem:[%s705_s1 + $0x10] sm:$0xff]  }
   0x2   :  { %546 = vmatprep.subr.bf16.mxu0 %v594_v0  ;;  %578 = vmatprep.subr.bf16.mxu1 %v594_v0  ;;  %v597_v3 = vld [vmem:[%s705_s1 + $0x18] sm:$0xff]   ;;  %v602_v4 = vld [vmem:[%s706_s0] sm:$0xff]   ;;  %v599_v7 = vld [vmem:[%s705_s1 + $0x28] sm:$0xff]  }
   0x3   :  { %547 = vmatpush3.bf16.msra.mxu0 %v594_v0  ;;  %586 = vmatpush3.bf16.msra.mxu1 %v594_v0  ;;  %v603_v5 = vld [vmem:[%s706_s0 + $0x20] sm:$0xff]   ;;  %v600_v8 = vld [vmem:[%s705_s1 + $0x30] sm:$0xff]   ;;  %v601_v9 = vld [vmem:[%s705_s1 + $0x38] sm:$0xff]  }
   0x4   :  { %548 = vmatprep.subr.bf16.mxu0 %v595_v1  ;;  %579 = vmatprep.subr.bf16.mxu1 %v595_v1  ;;  %v598_v6 = vld [vmem:[%s705_s1 + $0x20] sm:$0xff]   ;;  %v604_v10 = vld [vmem:[%s706_s0 + $0x8] sm:$0xff]   ;;  %v606_v12 = vld [vmem:[%s706_s0 + $0x10] sm:$0xff]  }
   0x5   :  { %562 = vmatprep.mubr.bf16.mxu0 %v602_v4  ;;  %570 = vmatprep.mubr.bf16.mxu1 %v603_v5  ;;  %v605_v11 = vld [vmem:[%s706_s0 + $0x28] sm:$0xff]   ;;  %v607_v13 = vld [vmem:[%s706_s0 + $0x30] sm:$0xff]   ;;  %v608_v14 = vld [vmem:[%s706_s0 + $0x18] sm:$0xff]  }
   0x6   :  { %v609_v15 = vld [vmem:[%s706_s0 + $0x38] sm:$0xff]   ;;  %v450_v17 = vld [vmem:[%s707_s2] ss:$0 sm:$0xff] }
   0x7   :  { %549 = vmatpush3.bf16.msra.mxu0 %v595_v1  ;;  %587 = vmatpush3.bf16.msra.mxu1 %v595_v1 }
   0x8   :  { %550 = vmatprep.subr.bf16.mxu0 %v596_v2  ;;  %580 = vmatprep.subr.bf16.mxu1 %v596_v2 }
   0xb   :  { %551 = vmatpush3.bf16.msra.mxu0 %v596_v2  ;;  %588 = vmatpush3.bf16.msra.mxu1 %v596_v2 }
   0xc   :  { %552 = vmatprep.subr.bf16.mxu0 %v597_v3  ;;  %581 = vmatprep.subr.bf16.mxu1 %v597_v3 }
   0xf   :  { %553 = vmatpush3.bf16.msra.mxu0 %v597_v3  ;;  %589 = vmatpush3.bf16.msra.mxu1 %v597_v3 }
  0x10   :  { %554 = vmatprep.subr.bf16.mxu0 %v598_v6  ;;  %582 = vmatprep.subr.bf16.mxu1 %v598_v6 }
  0x13   :  { %555 = vmatpush3.bf16.msra.mxu0 %v598_v6  ;;  %590 = vmatpush3.bf16.msra.mxu1 %v598_v6 }
  0x14   :  { %556 = vmatprep.subr.bf16.mxu0 %v599_v7  ;;  %583 = vmatprep.subr.bf16.mxu1 %v599_v7 }
  0x17   :  { %557 = vmatpush3.bf16.msra.mxu0 %v599_v7  ;;  %591 = vmatpush3.bf16.msra.mxu1 %v599_v7 }
  0x18   :  { %558 = vmatprep.subr.bf16.mxu0 %v600_v8  ;;  %584 = vmatprep.subr.bf16.mxu1 %v600_v8 }
  0x1b   :  { %559 = vmatpush3.bf16.msra.mxu0 %v600_v8  ;;  %592 = vmatpush3.bf16.msra.mxu1 %v600_v8 }
  0x1c   :  { %560 = vmatprep.subr.bf16.mxu0 %v601_v9  ;;  %585 = vmatprep.subr.bf16.mxu1 %v601_v9 }
  0x1f   :  { %561 = vmatpush3.bf16.msra.mxu0 %v601_v9  ;;  %593 = vmatpush3.bf16.msra.mxu1 %v601_v9 }
  0x22   :  { %563 = vmatmul.mubr.bf16.vlgmr.msra.gmra.mrb[0].mxu0 %v604_v10  ;;  %571 = vmatmul.mubr.bf16.vlgmr.msra.gmra.mrb[0].mxu1 %v605_v11 }
  0x23   :  { %566 = vmatprep.mubr.bf16.mxu0 %v606_v12  ;;  %574 = vmatprep.mubr.bf16.mxu1 %v607_v13 }
  0x2a   :  { %567 = vmatmul.mubr.bf16.gmra.mrb[4].mxu0 %v608_v14  ;;  %575 = vmatmul.mubr.bf16.gmra.mrb[4].mxu1 %v609_v15 }
  0xf5   :  { %v564_v16 = vpop.f32.mrb[0].mxu0  ;;  %v572_v18 = vpop.f32.mrb[0].mxu1 }
  0xf6   :  { %v213_v19 = vpop.f32.mrb[1].mxu0  ;;  %v245_v20 = vpop.f32.mrb[1].mxu1  ;;  %v336_v23 = vadd.f32 %v564_v16, %v450_v17  ;;  %v344_v24 = vadd.f32 %v572_v18, %v450_v17 }
  0xf7   :  { %v565_v21 = vpop.f32.mrb[2].mxu0  ;;  %v573_v22 = vpop.f32.mrb[2].mxu1  ;;  %v334_v29 = vadd.f32 %v450_v17, %v213_v19  ;;  %v342_v30 = vadd.f32 %v450_v17, %v245_v20 }
  0xf8   :  { %v337_v25 = vadd.f32 %v565_v21, %v450_v17  ;;  %v345_v26 = vadd.f32 %v573_v22, %v450_v17  ;;  %v216_v27 = vpop.f32.mrb[3].mxu0  ;;  %v248_v28 = vpop.f32.mrb[3].mxu1 }
  0xf9   :  { %v335_v31 = vadd.f32 %v450_v17, %v216_v27  ;;  %v343_v32 = vadd.f32 %v450_v17, %v248_v28 }
  0xfa   :  { %v491_v33 = vpack.c.bf16 %v337_v25, %v336_v23  ;;  %v511_v34 = vpack.c.bf16 %v345_v26, %v344_v24 }
  0xfb   :  { %v486_v35 = vpack.c.bf16 %v335_v31, %v334_v29  ;;  %v506_v36 = vpack.c.bf16 %v343_v32, %v342_v30 }
  0xfc   :  { %523 = vst [vmem:[%s708_s3 + $0x8] sm:$0xff] %v491_v33   ;;  %527 = vst [vmem:[%s708_s3 + $0x28] sm:$0xff] %v511_v34  }
  0xfd   :  { %487 = vst [vmem:[%s708_s3] sm:$0xff] %v486_v35   ;;  %526 = vst [vmem:[%s708_s3 + $0x20] sm:$0xff] %v506_v36   ;;  %v568_v37 = vpop.f32.mrb[4].mxu0  ;;  %v576_v38 = vpop.f32.mrb[4].mxu1 }
  0xfe   :  { %v229_v39 = vpop.f32.mrb[5].mxu0  ;;  %v261_v40 = vpop.f32.mrb[5].mxu1  ;;  %v340_v43 = vadd.f32 %v568_v37, %v450_v17  ;;  %v348_v44 = vadd.f32 %v576_v38, %v450_v17 }
  0xff   :  { %v569_v41 = vpop.f32.mrb[6].mxu0  ;;  %v577_v42 = vpop.f32.mrb[6].mxu1  ;;  %v338_v49 = vadd.f32 %v450_v17, %v229_v39  ;;  %v346_v50 = vadd.f32 %v450_v17, %v261_v40 }
 0x100   :  { %v341_v45 = vadd.f32 %v569_v41, %v450_v17  ;;  %v349_v46 = vadd.f32 %v577_v42, %v450_v17  ;;  %v232_v47 = vpop.f32.mrb[7].mxu0  ;;  %v264_v48 = vpop.f32.mrb[7].mxu1 }
 0x101   :  { %v339_v51 = vadd.f32 %v450_v17, %v232_v47  ;;  %v347_v52 = vadd.f32 %v450_v17, %v264_v48 }
 0x102   :  { %v501_v53 = vpack.c.bf16 %v341_v45, %v340_v43  ;;  %v521_v54 = vpack.c.bf16 %v349_v46, %v348_v44 }
 0x103   :  { %v496_v55 = vpack.c.bf16 %v339_v51, %v338_v49  ;;  %v516_v56 = vpack.c.bf16 %v347_v52, %v346_v50 }
 0x104   :  { %525 = vst [vmem:[%s708_s3 + $0x18] sm:$0xff] %v501_v53   ;;  %529 = vst [vmem:[%s708_s3 + $0x38] sm:$0xff] %v521_v54  }
 0x105   :  { %524 = vst [vmem:[%s708_s3 + $0x10] sm:$0xff] %v496_v55   ;;  %528 = vst [vmem:[%s708_s3 + $0x30] sm:$0xff] %v516_v56  }

// kernel: _lambda_.27
= control target key start
LH: loop header
LB: loop body
LE: loop exit
PB: predicated region body
PF: predicated region fallthrough
CT: control target
= control target key end

     0   :  { %s1361_s15 = smov 0   ;;  %s1363_s16 = smov 0   ;;  %s1535_s0 = inlined_call_operand.vmem [shape: bf16[128,1152], index: 0, kind: input, shape index: {}]   ;;  %s1536_s1 = inlined_call_operand.vmem [shape: bf16[1152,128], index: 1, kind: input, shape index: {}]   ;;  %s1537_s2 = inlined_call_operand.vmem [shape: f32[1,128], index: 2, kind: input, shape index: {}]   ;;  %s1538_s3 = inlined_call_operand.vmem [shape: bf16[128,128], index: 3, kind: input, shape index: {}]   ;;  %s1539_s4 = inlined_call_operand.vmem [shape: bf16[128,128], index: 4, kind: output, shape index: {}]  }
   0x1   :  { %s1365_s17 = smov 0   ;;  %s1367_s18 = smov 0  }
   0x2   :  { %s1369_s19 = smov 0  }
   0x3 LB: > { %s26_s20 = sadd.s32 1, %s1329_s18  ;;  %p49_p1 = scmp.ne.s32.totalorder %s1321_s16, %s1317_s15  ;;  %s1333_s19 = sphi %s1369_s19, %s14_s19   ;;  %s1329_s18 = sphi %s1367_s18, %s1543_s18   ;;  %s1325_s17 = sphi %s1365_s17, %s1542_s17   ;;  %s1321_s16 = sphi %s1363_s16, %s1541_s16   ;;  %s1317_s15 = sphi %s1361_s15, %s1540_s15  }
   0x4   : > { %p27_p0 = scmp.ge.s32.totalorder %s26_s20, 9  ;;  %p50_p2 = scmp.eq.s32.totalorder %s1333_s19, 0 }
   0x5   : > { %s42_s22 = sadd.s32 1, %s1321_s16  ;;  %p1026_p5 = scmp.ge.s32.totalorder %s1333_s19, 9 }
   0x6   : > { %s1545_s20 = smov (%p27_p0, %s26_s20), 0  ;;  %p51_p3 = por %p50_p2, %p49_p1 }
   0x7   : > { %s38_s21 = ssub.s32 %s1329_s18, %s1545_s20  ;;  %203 = sbr.rel (%p1026_p5) target bundleno = 28 (0x1c), region = 24 }
   0x8   : > { %p40_p4 = scmp.eq.s32.totalorder %s38_s21, 0 }
   0xa   : > { %s1396_s23 = scalar_select %p40_p4, %s1321_s16, %s42_s22  }
   0xe   : > { %206 = sbr.rel (!%p51_p3) target bundleno = 28 (0x1c), region = 28  ;;  %s208_s24 = sand.u32 (%p51_p3), 1, %s1321_s16  }
   0xf   : > { %s1028_s25 = sshll.u32 (%p51_p3), %s1329_s18, 2  ;;  %s1027_s26 = sshll.u32 (%p51_p3), %s208_s24, 6 }
  0x10   : > { %s1404_s29 = scalar_lea.vmem (%p51_p3), %s1535_s0, %s1028_s25  ;;  %s210_s30 = scalar_lea.vmem (%p51_p3), [#allocation3], %s1027_s26 }
  0x11   : > { %v231_v0 = vld [vmem:[%s1404_s29] sm:$0xf] (%p51_p3)  ;;  %v233_v1 = vld [vmem:[%s1404_s29 + $0x24] sm:$0xf] (%p51_p3)  ;;  %v235_v2 = vld [vmem:[%s1404_s29 + $0x48] sm:$0xf] (%p51_p3) }
  0x12   : > { %232 = vst [vmem:[%s210_s30] sm:$0xf] (%p51_p3), %v231_v0  ;;  %234 = vst [vmem:[%s210_s30 + $0x4] sm:$0xf] (%p51_p3), %v233_v1  ;;  %v237_v3 = vld [vmem:[%s1404_s29 + $0x6c] sm:$0xf] (%p51_p3) }
  0x13   : > { %v239_v4 = vld [vmem:[%s1404_s29 + $0x90] sm:$0xf] (%p51_p3)  ;;  %236 = vst [vmem:[%s210_s30 + $0x8] sm:$0xf] (%p51_p3), %v235_v2  ;;  %238 = vst [vmem:[%s210_s30 + $0xc] sm:$0xf] (%p51_p3), %v237_v3 }
  0x14   : > { %240 = vst [vmem:[%s210_s30 + $0x10] sm:$0xf] (%p51_p3), %v239_v4  ;;  %v241_v5 = vld [vmem:[%s1404_s29 + $0xb4] sm:$0xf] (%p51_p3)  ;;  %v243_v6 = vld [vmem:[%s1404_s29 + $0xd8] sm:$0xf] (%p51_p3) }
  0x15   : > { %v245_v7 = vld [vmem:[%s1404_s29 + $0xfc] sm:$0xf]  ;;  %242 = vst [vmem:[%s210_s30 + $0x14] sm:$0xf] %v241_v5  ;;  %244 = vst [vmem:[%s210_s30 + $0x18] sm:$0xf] %v243_v6 }
  0x16   : > { %246 = vst [vmem:[%s210_s30 + $0x1c] sm:$0xf] %v245_v7  ;;  %v247_v8 = vld [vmem:[%s1404_s29 + $0x120] sm:$0xf]  ;;  %v249_v9 = vld [vmem:[%s1404_s29 + $0x144] sm:$0xf] }
  0x17   : > { %v251_v10 = vld [vmem:[%s1404_s29 + $0x168] sm:$0xf]  ;;  %248 = vst [vmem:[%s210_s30 + $0x20] sm:$0xf] %v247_v8  ;;  %250 = vst [vmem:[%s210_s30 + $0x24] sm:$0xf] %v249_v9 }
  0x18   : > { %252 = vst [vmem:[%s210_s30 + $0x28] sm:$0xf] %v251_v10  ;;  %v253_v11 = vld [vmem:[%s1404_s29 + $0x18c] sm:$0xf]  ;;  %v255_v12 = vld [vmem:[%s1404_s29 + $0x1b0] sm:$0xf] }
  0x19   : > { %v257_v13 = vld [vmem:[%s1404_s29 + $0x1d4] sm:$0xf]  ;;  %254 = vst [vmem:[%s210_s30 + $0x2c] sm:$0xf] %v253_v11  ;;  %256 = vst [vmem:[%s210_s30 + $0x30] sm:$0xf] %v255_v12 }
  0x1a   : > { %258 = vst [vmem:[%s210_s30 + $0x34] sm:$0xf] %v257_v13  ;;  %v259_v14 = vld [vmem:[%s1404_s29 + $0x1f8] sm:$0xf]  ;;  %v261_v15 = vld [vmem:[%s1404_s29 + $0x21c] sm:$0xf] }
  0x1b   : > { %260 = vst [vmem:[%s210_s30 + $0x38] sm:$0xf] %v259_v14  ;;  %262 = vst [vmem:[%s210_s30 + $0x3c] sm:$0xf] %v261_v15 }
  0x1c PF: > { %p1029_p6 = scmp.ge.s32.totalorder %s1333_s19, 1  ;;  %p328_p7 = scmp.lt.s32.totalorder %s1333_s19, 10 }
  0x1e   : > { %p329_p8 = pnand %p1029_p6, %p328_p7 }
  0x1f   : > { %s335_s5 = sand.u32 (!%p329_p8), 1, %s1317_s15   ;;  %s1031_s6 = sshll.u32 (!%p329_p8), %s1325_s17, 4 }
  0x20   : > { %332 = sbr.rel (%p329_p8) target bundleno = 328 (0x148), region = 73  ;;  %s1030_s7 = sshll.u32 (!%p329_p8), %s335_s5, 6 }
  0x21   : > { %p384_p9 = scmp.lt.s32.totalorder (!%p329_p8), %s1031_s6, 143  ;;  %s1431_s12 = scalar_lea.vmem (!%p329_p8), [#allocation3], %s1030_s7 }
  0x22   : > { %p1033_p10 = scmp.ne.s32.totalorder (!%p329_p8), %s1325_s17, 0 }
  0x27   : > { %s1547_s6 = smov (!%p384_p9, %s1031_s6), 143  ;;  %417 = sbr.rel (%p1033_p10) target bundleno = 49 (0x31), region = 81 }
  0x28   : > { %s1032_s8 = sshll.u32 %s1547_s6, 2  ;;  %v1335_v16 = vmov (!%p1033_p10), 0.0  }
  0x29   : > { %s1429_s11 = scalar_lea.vmem %s1536_s1, %s1032_s8  ;;  %418 = vst [vmem:[#allocation2] sm:$0xff] (!%p1033_p10), %v1335_v16  ;;  %419 = vst [vmem:[#allocation2 + $0x8] sm:$0xff] (!%p1033_p10), %v1335_v16 }
  0x2a   : > { %420 = vst [vmem:[#allocation2 + $0x10] sm:$0xff] (!%p1033_p10), %v1335_v16  ;;  %421 = vst [vmem:[#allocation2 + $0x18] sm:$0xff] (!%p1033_p10), %v1335_v16 }
  0x2b   : > { %422 = vst [vmem:[#allocation2 + $0x20] sm:$0xff] (!%p1033_p10), %v1335_v16  ;;  %423 = vst [vmem:[#allocation2 + $0x28] sm:$0xff] (!%p1033_p10), %v1335_v16 }
  0x2c   : > { %424 = vst [vmem:[#allocation2 + $0x30] sm:$0xff] (!%p1033_p10), %v1335_v16  ;;  %425 = vst [vmem:[#allocation2 + $0x38] sm:$0xff] (!%p1033_p10), %v1335_v16 }
  0x2d   : > { %426 = vst [vmem:[#allocation2 + $0x40] sm:$0xff] (!%p1033_p10), %v1335_v16  ;;  %427 = vst [vmem:[#allocation2 + $0x48] sm:$0xff] (!%p1033_p10), %v1335_v16 }
  0x2e   : > { %428 = vst [vmem:[#allocation2 + $0x50] sm:$0xff] %v1335_v16  ;;  %429 = vst [vmem:[#allocation2 + $0x58] sm:$0xff] %v1335_v16 }
  0x2f   : > { %430 = vst [vmem:[#allocation2 + $0x60] sm:$0xff] %v1335_v16  ;;  %431 = vst [vmem:[#allocation2 + $0x68] sm:$0xff] %v1335_v16 }
  0x30   : > { %432 = vst [vmem:[#allocation2 + $0x70] sm:$0xff] %v1335_v16  ;;  %433 = vst [vmem:[#allocation2 + $0x78] sm:$0xff] %v1335_v16 }
  0x31 PF: > { %v1279_v17 = vld [vmem:[%s1429_s11] sm:$0xff]   ;;  %v1280_v18 = vld [vmem:[%s1429_s11 + $0x8] sm:$0xff]   ;;  %v1281_v19 = vld [vmem:[%s1429_s11 + $0x10] sm:$0xff]   ;;  %p1050_p11 = scmp.ne.s32.totalorder %s1325_s17, 8 }
  0x32   : > { %1190 = vmatprep.subr.bf16.mxu0 %v1279_v17  ;;  %1222 = vmatprep.subr.bf16.mxu1 %v1279_v17  ;;  %v1282_v20 = vld [vmem:[%s1429_s11 + $0x18] sm:$0xff]   ;;  %v1287_v21 = vld [vmem:[%s1431_s12] sm:$0xff]   ;;  %v1284_v24 = vld [vmem:[%s1429_s11 + $0x28] sm:$0xff]  }
  0x33   : > { %1191 = vmatpush3.bf16.msra.mxu0 %v1279_v17  ;;  %1230 = vmatpush3.bf16.msra.mxu1 %v1279_v17  ;;  %v1288_v22 = vld [vmem:[%s1431_s12 + $0x20] sm:$0xff]   ;;  %v1285_v25 = vld [vmem:[%s1429_s11 + $0x30] sm:$0xff]   ;;  %v1286_v26 = vld [vmem:[%s1429_s11 + $0x38] sm:$0xff]  }
  0x34   : > { %1192 = vmatprep.subr.bf16.mxu0 %v1280_v18  ;;  %1223 = vmatprep.subr.bf16.mxu1 %v1280_v18  ;;  %v1283_v23 = vld [vmem:[%s1429_s11 + $0x20] sm:$0xff]   ;;  %v1289_v27 = vld [vmem:[%s1431_s12 + $0x8] sm:$0xff]   ;;  %v1291_v29 = vld [vmem:[%s1431_s12 + $0x10] sm:$0xff]  }
  0x35   : > { %1206 = vmatprep.mubr.bf16.mxu0 %v1287_v21  ;;  %1214 = vmatprep.mubr.bf16.mxu1 %v1288_v22  ;;  %v1290_v28 = vld [vmem:[%s1431_s12 + $0x28] sm:$0xff]   ;;  %v1292_v30 = vld [vmem:[%s1431_s12 + $0x30] sm:$0xff]   ;;  %v1293_v31 = vld [vmem:[%s1431_s12 + $0x18] sm:$0xff]  }
  0x36   : > { %v1294_v32 = vld [vmem:[%s1431_s12 + $0x38] sm:$0xff]   ;;  %v436_v33 = vld [vmem:[#allocation2 + $0x10] sm:$0xff]  ;;  %v434_v35 = vld [vmem:[#allocation2] sm:$0xff] }
  0x37   : > { %1193 = vmatpush3.bf16.msra.mxu0 %v1280_v18  ;;  %1231 = vmatpush3.bf16.msra.mxu1 %v1280_v18  ;;  %v444_v34 = vld [vmem:[#allocation2 + $0x50] sm:$0xff]  ;;  %v442_v36 = vld [vmem:[#allocation2 + $0x40] sm:$0xff]  ;;  %v437_v39 = vld [vmem:[#allocation2 + $0x18] sm:$0xff] }
  0x38   : > { %1194 = vmatprep.subr.bf16.mxu0 %v1281_v19  ;;  %1224 = vmatprep.subr.bf16.mxu1 %v1281_v19  ;;  %v445_v40 = vld [vmem:[#allocation2 + $0x58] sm:$0xff]  ;;  %v435_v45 = vld [vmem:[#allocation2 + $0x8] sm:$0xff]  ;;  %v440_v57 = vld [vmem:[#allocation2 + $0x30] sm:$0xff] }
  0x39   : > { %v443_v46 = vld [vmem:[#allocation2 + $0x48] sm:$0xff]  ;;  %v448_v58 = vld [vmem:[#allocation2 + $0x70] sm:$0xff]  ;;  %v438_v59 = vld [vmem:[#allocation2 + $0x20] sm:$0xff] }
  0x3a   : > { %v446_v60 = vld [vmem:[#allocation2 + $0x60] sm:$0xff]  ;;  %v441_v63 = vld [vmem:[#allocation2 + $0x38] sm:$0xff]  ;;  %v439_v5 = vld [vmem:[#allocation2 + $0x28] sm:$0xff] }
  0x3b   : > { %1195 = vmatpush3.bf16.msra.mxu0 %v1281_v19  ;;  %1232 = vmatpush3.bf16.msra.mxu1 %v1281_v19  ;;  %v449_v0 = vld [vmem:[#allocation2 + $0x78] sm:$0xff]  ;;  %v447_v6 = vld [vmem:[#allocation2 + $0x68] sm:$0xff]  ;;  %v1454_v19 = vld [vmem:[%s1537_s2] ss:$0 sm:$0xff] (!%p1050_p11) }
  0x3c   : > { %1196 = vmatprep.subr.bf16.mxu0 %v1282_v20  ;;  %1225 = vmatprep.subr.bf16.mxu1 %v1282_v20  ;;  %v1089_v22 = vld [vmem:[%s1538_s3] sm:$0xff] (!%p1050_p11)  }
  0x3f   : > { %1197 = vmatpush3.bf16.msra.mxu0 %v1282_v20  ;;  %1233 = vmatpush3.bf16.msra.mxu1 %v1282_v20 }
  0x40   : > { %1198 = vmatprep.subr.bf16.mxu0 %v1283_v23  ;;  %1226 = vmatprep.subr.bf16.mxu1 %v1283_v23 }
  0x43   : > { %1199 = vmatpush3.bf16.msra.mxu0 %v1283_v23  ;;  %1234 = vmatpush3.bf16.msra.mxu1 %v1283_v23 }
  0x44   : > { %1200 = vmatprep.subr.bf16.mxu0 %v1284_v24  ;;  %1227 = vmatprep.subr.bf16.mxu1 %v1284_v24 }
  0x47   : > { %1201 = vmatpush3.bf16.msra.mxu0 %v1284_v24  ;;  %1235 = vmatpush3.bf16.msra.mxu1 %v1284_v24 }
  0x48   : > { %1202 = vmatprep.subr.bf16.mxu0 %v1285_v25  ;;  %1228 = vmatprep.subr.bf16.mxu1 %v1285_v25 }
  0x4b   : > { %1203 = vmatpush3.bf16.msra.mxu0 %v1285_v25  ;;  %1236 = vmatpush3.bf16.msra.mxu1 %v1285_v25  ;;  %v1090_v25 = vunpack.c.l.bf16 (!%p1050_p11), %v1089_v22 }
  0x4c   : > { %1204 = vmatprep.subr.bf16.mxu0 %v1286_v26  ;;  %1229 = vmatprep.subr.bf16.mxu1 %v1286_v26 }
  0x4f   : > { %1205 = vmatpush3.bf16.msra.mxu0 %v1286_v26  ;;  %1237 = vmatpush3.bf16.msra.mxu1 %v1286_v26  ;;  %v1091_v26 = vunpack.c.h.bf16 (!%p1050_p11), %v1089_v22 }
  0x52   : > { %1207 = vmatmul.mubr.bf16.vlgmr.msra.gmra.mrb[0].mxu0 %v1289_v27  ;;  %1215 = vmatmul.mubr.bf16.vlgmr.msra.gmra.mrb[0].mxu1 %v1290_v28 }
  0x53   : > { %1210 = vmatprep.mubr.bf16.mxu0 %v1291_v29  ;;  %1218 = vmatprep.mubr.bf16.mxu1 %v1292_v30  ;;  %v1160_v29 = vld [vmem:[%s1538_s3 + $0x8] sm:$0xff] (!%p1050_p11)  }
  0x5a   : > { %1211 = vmatmul.mubr.bf16.gmra.mrb[4].mxu0 %v1293_v31  ;;  %1219 = vmatmul.mubr.bf16.gmra.mrb[4].mxu1 %v1294_v32  ;;  %v1094_v32 = vunpack.c.l.bf16 (!%p1050_p11), %v1160_v29 }
 0x125   : > { %v1208_v37 = vpop.f32.mrb[0].mxu0  ;;  %v1216_v38 = vpop.f32.mrb[0].mxu1 }
 0x126   : > { %v677_v41 = vadd.f32 %v1208_v37, %v436_v33  ;;  %v685_v42 = vadd.f32 %v1216_v38, %v444_v34  ;;  %v612_v43 = vpop.f32.mrb[1].mxu0  ;;  %v644_v44 = vpop.f32.mrb[1].mxu1  ;;  %v1095_v33 = vunpack.c.h.bf16 (!%p1050_p11), %v1160_v29 }
 0x127   : > { %v675_v47 = vadd.f32 %v612_v43, %v434_v35  ;;  %v683_v48 = vadd.f32 %v644_v44, %v442_v36  ;;  %v1209_v49 = vpop.f32.mrb[2].mxu0  ;;  %v1217_v50 = vpop.f32.mrb[2].mxu1  ;;  %v1161_v36 = vld [vmem:[%s1538_s3 + $0x10] sm:$0xff] (!%p1050_p11)   ;;  %v1162_v43 = vld [vmem:[%s1538_s3 + $0x18] sm:$0xff] (!%p1050_p11)  }
 0x128   : > { %693 = vst [vmem:[#allocation2 + $0x10] sm:$0xff] %v677_v41  ;;  %701 = vst [vmem:[#allocation2 + $0x50] sm:$0xff] %v685_v42  ;;  %v678_v51 = vadd.f32 %v1209_v49, %v437_v39  ;;  %v686_v52 = vadd.f32 %v1217_v50, %v445_v40  ;;  %v615_v53 = vpop.f32.mrb[3].mxu0  ;;  %v647_v54 = vpop.f32.mrb[3].mxu1  ;;  %v1098_v41 = vunpack.c.l.bf16 (!%p1050_p11), %v1161_v36  ;;  %v1099_v42 = vunpack.c.h.bf16 (!%p1050_p11), %v1161_v36 }
 0x129   : > { %691 = vst [vmem:[#allocation2] sm:$0xff] %v675_v47  ;;  %699 = vst [vmem:[#allocation2 + $0x40] sm:$0xff] %v683_v48  ;;  %v676_v55 = vadd.f32 %v615_v53, %v435_v45  ;;  %v684_v56 = vadd.f32 %v647_v54, %v443_v46 }
 0x12a   : > { %694 = vst [vmem:[#allocation2 + $0x18] sm:$0xff] %v678_v51  ;;  %702 = vst [vmem:[#allocation2 + $0x58] sm:$0xff] %v686_v52 }
 0x12b   : > { %692 = vst [vmem:[#allocation2 + $0x8] sm:$0xff] %v676_v55  ;;  %700 = vst [vmem:[#allocation2 + $0x48] sm:$0xff] %v684_v56  ;;  %v1102_v56 = vunpack.c.l.bf16 (!%p1050_p11), %v1162_v43 }
 0x12d   : > { %v1212_v61 = vpop.f32.mrb[4].mxu0  ;;  %v1220_v62 = vpop.f32.mrb[4].mxu1  ;;  %710 = sbr.rel (%p1050_p11) target bundleno = 328 (0x148), region = 85 }
 0x12e   : > { %v681_v1 = vadd.f32 %v1212_v61, %v440_v57  ;;  %v689_v2 = vadd.f32 %v1220_v62, %v448_v58  ;;  %v628_v3 = vpop.f32.mrb[5].mxu0  ;;  %v660_v4 = vpop.f32.mrb[5].mxu1  ;;  %v1103_v57 = vunpack.c.h.bf16 (!%p1050_p11), %v1162_v43  ;;  %v1163_v58 = vld [vmem:[%s1538_s3 + $0x20] sm:$0xff] (!%p1050_p11)  }
 0x12f   : > { %v679_v7 = vadd.f32 %v628_v3, %v438_v59  ;;  %v687_v8 = vadd.f32 %v660_v4, %v446_v60  ;;  %v1213_v9 = vpop.f32.mrb[6].mxu0  ;;  %v1221_v10 = vpop.f32.mrb[6].mxu1  ;;  %v713_v23 = vld [vmem:[#allocation2 + $0x10] sm:$0xff] (!%p1050_p11) }
 0x130   : > { %697 = vst [vmem:[#allocation2 + $0x30] sm:$0xff] %v681_v1  ;;  %705 = vst [vmem:[#allocation2 + $0x70] sm:$0xff] %v689_v2  ;;  %v682_v11 = vadd.f32 %v1213_v9, %v441_v63  ;;  %v690_v12 = vadd.f32 %v1221_v10, %v449_v0  ;;  %v631_v13 = vpop.f32.mrb[7].mxu0  ;;  %v663_v14 = vpop.f32.mrb[7].mxu1  ;;  %v711_v17 = vld [vmem:[#allocation2] sm:$0xff] (!%p1050_p11)  ;;  %v736_v27 = vadd.f32 (!%p1050_p11), %v1454_v19, %v713_v23  ;;  %v721_v59 = vld [vmem:[#allocation2 + $0x50] sm:$0xff] (!%p1050_p11)  ;;  %v1107_v9 = vunpack.c.h.bf16 (!%p1050_p11), %v1163_v58 }
 0x131   : > { %695 = vst [vmem:[#allocation2 + $0x20] sm:$0xff] %v679_v7  ;;  %703 = vst [vmem:[#allocation2 + $0x60] sm:$0xff] %v687_v8  ;;  %v680_v15 = vadd.f32 %v631_v13, %v439_v5  ;;  %v688_v16 = vadd.f32 %v663_v14, %v447_v6  ;;  %v734_v20 = vadd.f32 (!%p1050_p11), %v1454_v19, %v711_v17  ;;  %v714_v24 = vld [vmem:[#allocation2 + $0x18] sm:$0xff] (!%p1050_p11)  ;;  %v719_v48 = vld [vmem:[#allocation2 + $0x40] sm:$0xff] (!%p1050_p11)  ;;  %v1106_v8 = vunpack.c.l.bf16 (!%p1050_p11), %v1163_v58 }
 0x132   : > { %698 = vst [vmem:[#allocation2 + $0x38] sm:$0xff] %v682_v11  ;;  %706 = vst [vmem:[#allocation2 + $0x78] sm:$0xff] %v690_v12  ;;  %v712_v18 = vld [vmem:[#allocation2 + $0x8] sm:$0xff] (!%p1050_p11)  ;;  %v737_v28 = vadd.f32 (!%p1050_p11), %v1454_v19, %v714_v24  ;;  %v784_v44 = vadd.f32 (!%p1050_p11), %v1094_v32, %v736_v27  ;;  %v742_v63 = vadd.f32 (!%p1050_p11), %v1454_v19, %v719_v48  ;;  %v722_v0 = vld [vmem:[#allocation2 + $0x58] sm:$0xff] (!%p1050_p11) }
 0x133   : > { %696 = vst [vmem:[#allocation2 + $0x28] sm:$0xff] %v680_v15  ;;  %704 = vst [vmem:[#allocation2 + $0x68] sm:$0xff] %v688_v16  ;;  %v735_v21 = vadd.f32 (!%p1050_p11), %v1454_v19, %v712_v18  ;;  %v782_v39 = vadd.f32 (!%p1050_p11), %v1090_v25, %v734_v20  ;;  %v720_v53 = vld [vmem:[#allocation2 + $0x48] sm:$0xff] (!%p1050_p11)  ;;  %v744_v10 = vadd.f32 (!%p1050_p11), %v1454_v19, %v721_v59  ;;  %v1165_v12 = vld [vmem:[%s1538_s3 + $0x30] sm:$0xff] (!%p1050_p11)  }
 0x134   : > { %v785_v45 = vadd.f32 %v1095_v33, %v737_v28  ;;  %v800_v54 = vmax.f32 %v784_v44, 0.0  ;;  %v1164_v1 = vld [vmem:[%s1538_s3 + $0x28] sm:$0xff]   ;;  %v743_v5 = vadd.f32 %v1454_v19, %v720_v53  ;;  %v745_v15 = vadd.f32 %v1454_v19, %v722_v0  ;;  %v1166_v28 = vld [vmem:[%s1538_s3 + $0x38] sm:$0xff]  }
 0x135   : > { %v783_v40 = vadd.f32 %v1091_v26, %v735_v21  ;;  %v798_v49 = vmax.f32 %v782_v39, 0.0  ;;  %v1110_v16 = vunpack.c.l.bf16 %v1164_v1  ;;  %v790_v17 = vadd.f32 %v1106_v8, %v742_v63 }
 0x136   : > { %v801_v55 = vmax.f32 %v785_v45, 0.0  ;;  %v791_v18 = vadd.f32 %v1107_v9, %v743_v5  ;;  %v1111_v20 = vunpack.c.h.bf16 %v1164_v1  ;;  %v1114_v27 = vunpack.c.l.bf16 %v1165_v12 }
 0x137   : > { %v717_v37 = vld [vmem:[#allocation2 + $0x30] sm:$0xff]  ;;  %v799_v50 = vmax.f32 %v783_v40, 0.0  ;;  %v792_v25 = vadd.f32 %v1110_v16, %v744_v10  ;;  %v806_v29 = vmax.f32 %v790_v17, 0.0  ;;  %v1115_v32 = vunpack.c.h.bf16 %v1165_v12 }
 0x138   : > { %v715_v30 = vld [vmem:[#allocation2 + $0x20] sm:$0xff]  ;;  %v740_v46 = vadd.f32 %v1454_v19, %v717_v37  ;;  %v1128_v2 = vpack.c.bf16 %v801_v55, %v800_v54  ;;  %v725_v22 = vld [vmem:[#allocation2 + $0x70] sm:$0xff]  ;;  %v1118_v40 = vunpack.c.l.bf16 %v1166_v28 }
 0x139   : > { %v738_v34 = vadd.f32 %v1454_v19, %v715_v30  ;;  %v718_v38 = vld [vmem:[#allocation2 + $0x38] sm:$0xff]  ;;  %v1123_v60 = vpack.c.bf16 %v799_v50, %v798_v49  ;;  %v723_v6 = vld [vmem:[#allocation2 + $0x60] sm:$0xff]  ;;  %v807_v30 = vmax.f32 %v791_v18, 0.0  ;;  %v808_v33 = vmax.f32 %v792_v25, 0.0 }
 0x13a   : > { %v716_v31 = vld [vmem:[#allocation2 + $0x28] sm:$0xff]  ;;  %v741_v47 = vadd.f32 %v1454_v19, %v718_v38  ;;  %v788_v3 = vadd.f32 %v1102_v56, %v740_v46  ;;  %1167 = vst [vmem:[%s1539_s4 + $0x8] sm:$0xff] %v1128_v2   ;;  %v746_v21 = vadd.f32 %v1454_v19, %v723_v6  ;;  %v726_v23 = vld [vmem:[#allocation2 + $0x78] sm:$0xff] }
 0x13b   : > { %v739_v35 = vadd.f32 %v1454_v19, %v716_v31  ;;  %v786_v51 = vadd.f32 %v1098_v41, %v738_v34  ;;  %1124 = vst [vmem:[%s1539_s4] sm:$0xff] %v1123_v60   ;;  %v724_v11 = vld [vmem:[#allocation2 + $0x68] sm:$0xff]  ;;  %v793_v31 = vadd.f32 %v1111_v20, %v745_v15  ;;  %v749_v36 = vadd.f32 %v1454_v19, %v726_v23 }
 0x13c   : > { %v789_v4 = vadd.f32 %v1103_v57, %v741_v47  ;;  %v804_v13 = vmax.f32 %v788_v3, 0.0  ;;  %v747_v26 = vadd.f32 %v1454_v19, %v724_v11  ;;  %v794_v34 = vadd.f32 %v1114_v27, %v746_v21 }
 0x13d   : > { %v787_v52 = vadd.f32 %v1099_v42, %v739_v35  ;;  %v802_v61 = vmax.f32 %v786_v51, 0.0  ;;  %v748_v35 = vadd.f32 %v1454_v19, %v725_v22  ;;  %v1143_v37 = vpack.c.bf16 %v807_v30, %v806_v29 }
 0x13e   : > { %v805_v14 = vmax.f32 %v789_v4, 0.0  ;;  %v809_v38 = vmax.f32 %v793_v31, 0.0  ;;  %v795_v39 = vadd.f32 %v1115_v32, %v747_v26  ;;  %v810_v41 = vmax.f32 %v794_v34, 0.0 }
 0x13f   : > { %v803_v62 = vmax.f32 %v787_v52, 0.0  ;;  %v1119_v42 = vunpack.c.h.bf16 %v1166_v28  ;;  %1170 = vst [vmem:[%s1539_s4 + $0x20] sm:$0xff] %v1143_v37   ;;  %v796_v45 = vadd.f32 %v1118_v40, %v748_v35 }
 0x140   : > { %v1138_v24 = vpack.c.bf16 %v805_v14, %v804_v13  ;;  %v1148_v43 = vpack.c.bf16 %v809_v38, %v808_v33  ;;  %v811_v44 = vmax.f32 %v795_v39, 0.0 }
 0x141   : > { %v1133_v7 = vpack.c.bf16 %v803_v62, %v802_v61  ;;  %v797_v46 = vadd.f32 %v1119_v42, %v749_v36  ;;  %v812_v19 = vmax.f32 %v796_v45, 0.0 }
 0x142   : > { %1169 = vst [vmem:[%s1539_s4 + $0x18] sm:$0xff] %v1138_v24   ;;  %1171 = vst [vmem:[%s1539_s4 + $0x28] sm:$0xff] %v1148_v43   ;;  %v1153_v47 = vpack.c.bf16 %v811_v44, %v810_v41 }
 0x143   : > { %1168 = vst [vmem:[%s1539_s4 + $0x10] sm:$0xff] %v1133_v7   ;;  %v813_v48 = vmax.f32 %v797_v46, 0.0 }
 0x144   : > { %1172 = vst [vmem:[%s1539_s4 + $0x30] sm:$0xff] %v1153_v47  }
 0x145   : > { %v1158_v49 = vpack.c.bf16 %v813_v48, %v812_v19 }
 0x147   : > { %1173 = vst [vmem:[%s1539_s4 + $0x38] sm:$0xff] %v1158_v49  }
 0x148 PF: > { %s14_s19 = sadd.s32 1, %s1333_s19   ;;  %s1540_s15 = smov %s1321_s16 }
 0x149   : > { %p11_p12 = scmp.ge.s32.totalorder %s14_s19, 11   ;;  %s1541_s16 = smov %s1396_s23 }
 0x14a   : > { %s1542_s17 = smov %s1329_s18  ;;  %s1543_s18 = smov %s1545_s20 }
 0x14b   :  { %13 = sbr.rel (!%p11_p12) target bundleno = 3 (0x3), region = 129 }

// kernel: _lambda_.28
= control target key start
LH: loop header
LB: loop body
LE: loop exit
PB: predicated region body
PF: predicated region fallthrough
CT: control target
= control target key end

     0   :  { %s1190_s12 = smov 0   ;;  %s1192_s13 = smov 0   ;;  %s1322_s0 = inlined_call_operand.vmem [shape: bf16[128,1152], index: 0, kind: input, shape index: {}]   ;;  %s1323_s1 = inlined_call_operand.vmem [shape: bf16[1152,128], index: 1, kind: input, shape index: {}]   ;;  %s1324_s2 = inlined_call_operand.vmem [shape: f32[1,128], index: 2, kind: input, shape index: {}]   ;;  %s1325_s3 = inlined_call_operand.vmem [shape: bf16[128,128], index: 3, kind: output, shape index: {}]  }
   0x1   :  { %s1194_s14 = smov 0   ;;  %s1196_s15 = smov 0  }
   0x2   :  { %s1198_s16 = smov 0  }
   0x3 LB: > { %s25_s17 = sadd.s32 1, %s1163_s15  ;;  %p48_p1 = scmp.ne.s32.totalorder %s1155_s13, %s1151_s12  ;;  %s1167_s16 = sphi %s1198_s16, %s13_s16   ;;  %s1163_s15 = sphi %s1196_s15, %s1329_s15   ;;  %s1159_s14 = sphi %s1194_s14, %s1328_s14   ;;  %s1155_s13 = sphi %s1192_s13, %s1327_s13   ;;  %s1151_s12 = sphi %s1190_s12, %s1326_s12  }
   0x4   : > { %p26_p0 = scmp.ge.s32.totalorder %s25_s17, 9  ;;  %p49_p2 = scmp.eq.s32.totalorder %s1167_s16, 0 }
   0x5   : > { %s41_s19 = sadd.s32 1, %s1155_s13  ;;  %p899_p5 = scmp.ge.s32.totalorder %s1167_s16, 9 }
   0x6   : > { %s1331_s17 = smov (%p26_p0, %s25_s17), 0  ;;  %p50_p3 = por %p49_p2, %p48_p1 }
   0x7   : > { %s37_s18 = ssub.s32 %s1163_s15, %s1331_s17  ;;  %162 = sbr.rel (%p899_p5) target bundleno = 28 (0x1c), region = 20 }
   0x8   : > { %p39_p4 = scmp.eq.s32.totalorder %s37_s18, 0 }
   0xa   : > { %s1225_s20 = scalar_select %p39_p4, %s1155_s13, %s41_s19  }
   0xe   : > { %165 = sbr.rel (!%p50_p3) target bundleno = 28 (0x1c), region = 24  ;;  %s167_s21 = sand.u32 (%p50_p3), 1, %s1155_s13  }
   0xf   : > { %s901_s22 = sshll.u32 (%p50_p3), %s1163_s15, 2  ;;  %s900_s23 = sshll.u32 (%p50_p3), %s167_s21, 6 }
  0x10   : > { %s1233_s26 = scalar_lea.vmem (%p50_p3), %s1322_s0, %s901_s22  ;;  %s169_s27 = scalar_lea.vmem (%p50_p3), [#allocation3], %s900_s23 }
  0x11   : > { %v190_v0 = vld [vmem:[%s1233_s26] sm:$0xf] (%p50_p3)  ;;  %v192_v1 = vld [vmem:[%s1233_s26 + $0x24] sm:$0xf] (%p50_p3)  ;;  %v194_v2 = vld [vmem:[%s1233_s26 + $0x48] sm:$0xf] (%p50_p3) }
  0x12   : > { %191 = vst [vmem:[%s169_s27] sm:$0xf] (%p50_p3), %v190_v0  ;;  %193 = vst [vmem:[%s169_s27 + $0x4] sm:$0xf] (%p50_p3), %v192_v1  ;;  %v196_v3 = vld [vmem:[%s1233_s26 + $0x6c] sm:$0xf] (%p50_p3) }
  0x13   : > { %v198_v4 = vld [vmem:[%s1233_s26 + $0x90] sm:$0xf] (%p50_p3)  ;;  %195 = vst [vmem:[%s169_s27 + $0x8] sm:$0xf] (%p50_p3), %v194_v2  ;;  %197 = vst [vmem:[%s169_s27 + $0xc] sm:$0xf] (%p50_p3), %v196_v3 }
  0x14   : > { %199 = vst [vmem:[%s169_s27 + $0x10] sm:$0xf] (%p50_p3), %v198_v4  ;;  %v200_v5 = vld [vmem:[%s1233_s26 + $0xb4] sm:$0xf] (%p50_p3)  ;;  %v202_v6 = vld [vmem:[%s1233_s26 + $0xd8] sm:$0xf] (%p50_p3) }
  0x15   : > { %v204_v7 = vld [vmem:[%s1233_s26 + $0xfc] sm:$0xf]  ;;  %201 = vst [vmem:[%s169_s27 + $0x14] sm:$0xf] %v200_v5  ;;  %203 = vst [vmem:[%s169_s27 + $0x18] sm:$0xf] %v202_v6 }
  0x16   : > { %205 = vst [vmem:[%s169_s27 + $0x1c] sm:$0xf] %v204_v7  ;;  %v206_v8 = vld [vmem:[%s1233_s26 + $0x120] sm:$0xf]  ;;  %v208_v9 = vld [vmem:[%s1233_s26 + $0x144] sm:$0xf] }
  0x17   : > { %v210_v10 = vld [vmem:[%s1233_s26 + $0x168] sm:$0xf]  ;;  %207 = vst [vmem:[%s169_s27 + $0x20] sm:$0xf] %v206_v8  ;;  %209 = vst [vmem:[%s169_s27 + $0x24] sm:$0xf] %v208_v9 }
  0x18   : > { %211 = vst [vmem:[%s169_s27 + $0x28] sm:$0xf] %v210_v10  ;;  %v212_v11 = vld [vmem:[%s1233_s26 + $0x18c] sm:$0xf]  ;;  %v214_v12 = vld [vmem:[%s1233_s26 + $0x1b0] sm:$0xf] }
  0x19   : > { %v216_v13 = vld [vmem:[%s1233_s26 + $0x1d4] sm:$0xf]  ;;  %213 = vst [vmem:[%s169_s27 + $0x2c] sm:$0xf] %v212_v11  ;;  %215 = vst [vmem:[%s169_s27 + $0x30] sm:$0xf] %v214_v12 }
  0x1a   : > { %217 = vst [vmem:[%s169_s27 + $0x34] sm:$0xf] %v216_v13  ;;  %v218_v14 = vld [vmem:[%s1233_s26 + $0x1f8] sm:$0xf]  ;;  %v220_v15 = vld [vmem:[%s1233_s26 + $0x21c] sm:$0xf] }
  0x1b   : > { %219 = vst [vmem:[%s169_s27 + $0x38] sm:$0xf] %v218_v14  ;;  %221 = vst [vmem:[%s169_s27 + $0x3c] sm:$0xf] %v220_v15 }
  0x1c PF: > { %p902_p6 = scmp.ge.s32.totalorder %s1167_s16, 1  ;;  %p287_p7 = scmp.lt.s32.totalorder %s1167_s16, 10 }
  0x1e   : > { %p288_p8 = pnand %p902_p6, %p287_p7 }
  0x1f   : > { %s294_s28 = sand.u32 (!%p288_p8), 1, %s1151_s12   ;;  %s904_s29 = sshll.u32 (!%p288_p8), %s1159_s14, 4 }
  0x20   : > { %291 = sbr.rel (%p288_p8) target bundleno = 323 (0x143), region = 69  ;;  %s903_s30 = sshll.u32 (!%p288_p8), %s294_s28, 6 }
  0x21   : > { %p333_p9 = scmp.lt.s32.totalorder (!%p288_p8), %s904_s29, 143  ;;  %s1260_s8 = scalar_lea.vmem (!%p288_p8), [#allocation3], %s903_s30 }
  0x22   : > { %p906_p10 = scmp.ne.s32.totalorder (!%p288_p8), %s1159_s14, 0 }
  0x27   : > { %s1333_s29 = smov (!%p333_p9, %s904_s29), 143  ;;  %357 = sbr.rel (%p906_p10) target bundleno = 49 (0x31), region = 77 }
  0x28   : > { %s905_s4 = sshll.u32 %s1333_s29, 2  ;;  %v1169_v16 = vmov (!%p906_p10), 0.0  }
  0x29   : > { %s1258_s7 = scalar_lea.vmem %s1323_s1, %s905_s4  ;;  %358 = vst [vmem:[#allocation2] sm:$0xff] (!%p906_p10), %v1169_v16  ;;  %359 = vst [vmem:[#allocation2 + $0x8] sm:$0xff] (!%p906_p10), %v1169_v16 }
  0x2a   : > { %360 = vst [vmem:[#allocation2 + $0x10] sm:$0xff] (!%p906_p10), %v1169_v16  ;;  %361 = vst [vmem:[#allocation2 + $0x18] sm:$0xff] (!%p906_p10), %v1169_v16 }
  0x2b   : > { %362 = vst [vmem:[#allocation2 + $0x20] sm:$0xff] (!%p906_p10), %v1169_v16  ;;  %363 = vst [vmem:[#allocation2 + $0x28] sm:$0xff] (!%p906_p10), %v1169_v16 }
  0x2c   : > { %364 = vst [vmem:[#allocation2 + $0x30] sm:$0xff] (!%p906_p10), %v1169_v16  ;;  %365 = vst [vmem:[#allocation2 + $0x38] sm:$0xff] (!%p906_p10), %v1169_v16 }
  0x2d   : > { %366 = vst [vmem:[#allocation2 + $0x40] sm:$0xff] (!%p906_p10), %v1169_v16  ;;  %367 = vst [vmem:[#allocation2 + $0x48] sm:$0xff] (!%p906_p10), %v1169_v16 }
  0x2e   : > { %368 = vst [vmem:[#allocation2 + $0x50] sm:$0xff] %v1169_v16  ;;  %369 = vst [vmem:[#allocation2 + $0x58] sm:$0xff] %v1169_v16 }
  0x2f   : > { %370 = vst [vmem:[#allocation2 + $0x60] sm:$0xff] %v1169_v16  ;;  %371 = vst [vmem:[#allocation2 + $0x68] sm:$0xff] %v1169_v16 }
  0x30   : > { %372 = vst [vmem:[#allocation2 + $0x70] sm:$0xff] %v1169_v16  ;;  %373 = vst [vmem:[#allocation2 + $0x78] sm:$0xff] %v1169_v16 }
  0x31 PF: > { %v1113_v17 = vld [vmem:[%s1258_s7] sm:$0xff]   ;;  %v1114_v18 = vld [vmem:[%s1258_s7 + $0x8] sm:$0xff]   ;;  %v1115_v19 = vld [vmem:[%s1258_s7 + $0x10] sm:$0xff]   ;;  %p923_p11 = scmp.ne.s32.totalorder %s1159_s14, 8 }
  0x32   : > { %1024 = vmatprep.subr.bf16.mxu0 %v1113_v17  ;;  %1056 = vmatprep.subr.bf16.mxu1 %v1113_v17  ;;  %v1116_v20 = vld [vmem:[%s1258_s7 + $0x18] sm:$0xff]   ;;  %v1121_v21 = vld [vmem:[%s1260_s8] sm:$0xff]   ;;  %v1118_v24 = vld [vmem:[%s1258_s7 + $0x28] sm:$0xff]  }
  0x33   : > { %1025 = vmatpush3.bf16.msra.mxu0 %v1113_v17  ;;  %1064 = vmatpush3.bf16.msra.mxu1 %v1113_v17  ;;  %v1122_v22 = vld [vmem:[%s1260_s8 + $0x20] sm:$0xff]   ;;  %v1119_v25 = vld [vmem:[%s1258_s7 + $0x30] sm:$0xff]   ;;  %v1120_v26 = vld [vmem:[%s1258_s7 + $0x38] sm:$0xff]  }
  0x34   : > { %1026 = vmatprep.subr.bf16.mxu0 %v1114_v18  ;;  %1057 = vmatprep.subr.bf16.mxu1 %v1114_v18  ;;  %v1117_v23 = vld [vmem:[%s1258_s7 + $0x20] sm:$0xff]   ;;  %v1123_v27 = vld [vmem:[%s1260_s8 + $0x8] sm:$0xff]   ;;  %v1125_v29 = vld [vmem:[%s1260_s8 + $0x10] sm:$0xff]  }
  0x35   : > { %1040 = vmatprep.mubr.bf16.mxu0 %v1121_v21  ;;  %1048 = vmatprep.mubr.bf16.mxu1 %v1122_v22  ;;  %v1124_v28 = vld [vmem:[%s1260_s8 + $0x28] sm:$0xff]   ;;  %v1126_v30 = vld [vmem:[%s1260_s8 + $0x30] sm:$0xff]   ;;  %v1127_v31 = vld [vmem:[%s1260_s8 + $0x18] sm:$0xff]  }
  0x36   : > { %v1128_v32 = vld [vmem:[%s1260_s8 + $0x38] sm:$0xff]   ;;  %v376_v33 = vld [vmem:[#allocation2 + $0x10] sm:$0xff]  ;;  %v374_v35 = vld [vmem:[#allocation2] sm:$0xff] }
  0x37   : > { %1027 = vmatpush3.bf16.msra.mxu0 %v1114_v18  ;;  %1065 = vmatpush3.bf16.msra.mxu1 %v1114_v18  ;;  %v384_v34 = vld [vmem:[#allocation2 + $0x50] sm:$0xff]  ;;  %v382_v36 = vld [vmem:[#allocation2 + $0x40] sm:$0xff]  ;;  %v377_v39 = vld [vmem:[#allocation2 + $0x18] sm:$0xff] }
  0x38   : > { %1028 = vmatprep.subr.bf16.mxu0 %v1115_v19  ;;  %1058 = vmatprep.subr.bf16.mxu1 %v1115_v19  ;;  %v385_v40 = vld [vmem:[#allocation2 + $0x58] sm:$0xff]  ;;  %v375_v45 = vld [vmem:[#allocation2 + $0x8] sm:$0xff]  ;;  %v380_v57 = vld [vmem:[#allocation2 + $0x30] sm:$0xff] }
  0x39   : > { %v383_v46 = vld [vmem:[#allocation2 + $0x48] sm:$0xff]  ;;  %v388_v58 = vld [vmem:[#allocation2 + $0x70] sm:$0xff]  ;;  %v378_v59 = vld [vmem:[#allocation2 + $0x20] sm:$0xff] }
  0x3a   : > { %v386_v60 = vld [vmem:[#allocation2 + $0x60] sm:$0xff]  ;;  %v381_v63 = vld [vmem:[#allocation2 + $0x38] sm:$0xff]  ;;  %v379_v5 = vld [vmem:[#allocation2 + $0x28] sm:$0xff] }
  0x3b   : > { %1029 = vmatpush3.bf16.msra.mxu0 %v1115_v19  ;;  %1066 = vmatpush3.bf16.msra.mxu1 %v1115_v19  ;;  %v389_v0 = vld [vmem:[#allocation2 + $0x78] sm:$0xff]  ;;  %v387_v6 = vld [vmem:[#allocation2 + $0x68] sm:$0xff]  ;;  %v924_v19 = vld [vmem:[%s1324_s2] ss:$0 sm:$0xff] (!%p923_p11) }
  0x3c   : > { %1030 = vmatprep.subr.bf16.mxu0 %v1116_v20  ;;  %1059 = vmatprep.subr.bf16.mxu1 %v1116_v20 }
  0x3f   : > { %1031 = vmatpush3.bf16.msra.mxu0 %v1116_v20  ;;  %1067 = vmatpush3.bf16.msra.mxu1 %v1116_v20 }
  0x40   : > { %1032 = vmatprep.subr.bf16.mxu0 %v1117_v23  ;;  %1060 = vmatprep.subr.bf16.mxu1 %v1117_v23 }
  0x43   : > { %1033 = vmatpush3.bf16.msra.mxu0 %v1117_v23  ;;  %1068 = vmatpush3.bf16.msra.mxu1 %v1117_v23 }
  0x44   : > { %1034 = vmatprep.subr.bf16.mxu0 %v1118_v24  ;;  %1061 = vmatprep.subr.bf16.mxu1 %v1118_v24 }
  0x47   : > { %1035 = vmatpush3.bf16.msra.mxu0 %v1118_v24  ;;  %1069 = vmatpush3.bf16.msra.mxu1 %v1118_v24 }
  0x48   : > { %1036 = vmatprep.subr.bf16.mxu0 %v1119_v25  ;;  %1062 = vmatprep.subr.bf16.mxu1 %v1119_v25 }
  0x4b   : > { %1037 = vmatpush3.bf16.msra.mxu0 %v1119_v25  ;;  %1070 = vmatpush3.bf16.msra.mxu1 %v1119_v25 }
  0x4c   : > { %1038 = vmatprep.subr.bf16.mxu0 %v1120_v26  ;;  %1063 = vmatprep.subr.bf16.mxu1 %v1120_v26 }
  0x4f   : > { %1039 = vmatpush3.bf16.msra.mxu0 %v1120_v26  ;;  %1071 = vmatpush3.bf16.msra.mxu1 %v1120_v26 }
  0x52   : > { %1041 = vmatmul.mubr.bf16.vlgmr.msra.gmra.mrb[0].mxu0 %v1123_v27  ;;  %1049 = vmatmul.mubr.bf16.vlgmr.msra.gmra.mrb[0].mxu1 %v1124_v28 }
  0x53   : > { %1044 = vmatprep.mubr.bf16.mxu0 %v1125_v29  ;;  %1052 = vmatprep.mubr.bf16.mxu1 %v1126_v30 }
  0x5a   : > { %1045 = vmatmul.mubr.bf16.gmra.mrb[4].mxu0 %v1127_v31  ;;  %1053 = vmatmul.mubr.bf16.gmra.mrb[4].mxu1 %v1128_v32 }
 0x125   : > { %v1042_v37 = vpop.f32.mrb[0].mxu0  ;;  %v1050_v38 = vpop.f32.mrb[0].mxu1 }
 0x126   : > { %v617_v41 = vadd.f32 %v1042_v37, %v376_v33  ;;  %v625_v42 = vadd.f32 %v1050_v38, %v384_v34  ;;  %v552_v43 = vpop.f32.mrb[1].mxu0  ;;  %v584_v44 = vpop.f32.mrb[1].mxu1 }
 0x127   : > { %v615_v47 = vadd.f32 %v552_v43, %v374_v35  ;;  %v623_v48 = vadd.f32 %v584_v44, %v382_v36  ;;  %v1043_v49 = vpop.f32.mrb[2].mxu0  ;;  %v1051_v50 = vpop.f32.mrb[2].mxu1 }
 0x128   : > { %633 = vst [vmem:[#allocation2 + $0x10] sm:$0xff] %v617_v41  ;;  %641 = vst [vmem:[#allocation2 + $0x50] sm:$0xff] %v625_v42  ;;  %v618_v51 = vadd.f32 %v1043_v49, %v377_v39  ;;  %v626_v52 = vadd.f32 %v1051_v50, %v385_v40  ;;  %v555_v53 = vpop.f32.mrb[3].mxu0  ;;  %v587_v54 = vpop.f32.mrb[3].mxu1 }
 0x129   : > { %631 = vst [vmem:[#allocation2] sm:$0xff] %v615_v47  ;;  %639 = vst [vmem:[#allocation2 + $0x40] sm:$0xff] %v623_v48  ;;  %v616_v55 = vadd.f32 %v555_v53, %v375_v45  ;;  %v624_v56 = vadd.f32 %v587_v54, %v383_v46 }
 0x12a   : > { %634 = vst [vmem:[#allocation2 + $0x18] sm:$0xff] %v618_v51  ;;  %642 = vst [vmem:[#allocation2 + $0x58] sm:$0xff] %v626_v52 }
 0x12b   : > { %632 = vst [vmem:[#allocation2 + $0x8] sm:$0xff] %v616_v55  ;;  %640 = vst [vmem:[#allocation2 + $0x48] sm:$0xff] %v624_v56 }
 0x12d   : > { %v1046_v61 = vpop.f32.mrb[4].mxu0  ;;  %v1054_v62 = vpop.f32.mrb[4].mxu1  ;;  %650 = sbr.rel (%p923_p11) target bundleno = 323 (0x143), region = 81 }
 0x12e   : > { %v621_v1 = vadd.f32 %v1046_v61, %v380_v57  ;;  %v629_v2 = vadd.f32 %v1054_v62, %v388_v58  ;;  %v568_v3 = vpop.f32.mrb[5].mxu0  ;;  %v600_v4 = vpop.f32.mrb[5].mxu1 }
 0x12f   : > { %v619_v7 = vadd.f32 %v568_v3, %v378_v59  ;;  %v627_v8 = vadd.f32 %v600_v4, %v386_v60  ;;  %v1047_v9 = vpop.f32.mrb[6].mxu0  ;;  %v1055_v10 = vpop.f32.mrb[6].mxu1  ;;  %v653_v22 = vld [vmem:[#allocation2 + $0x10] sm:$0xff] (!%p923_p11) }
 0x130   : > { %637 = vst [vmem:[#allocation2 + $0x30] sm:$0xff] %v621_v1  ;;  %645 = vst [vmem:[#allocation2 + $0x70] sm:$0xff] %v629_v2  ;;  %v622_v11 = vadd.f32 %v1047_v9, %v381_v63  ;;  %v630_v12 = vadd.f32 %v1055_v10, %v389_v0  ;;  %v571_v13 = vpop.f32.mrb[7].mxu0  ;;  %v603_v14 = vpop.f32.mrb[7].mxu1  ;;  %v651_v17 = vld [vmem:[#allocation2] sm:$0xff] (!%p923_p11)  ;;  %v676_v25 = vadd.f32 (!%p923_p11), %v924_v19, %v653_v22  ;;  %v661_v37 = vld [vmem:[#allocation2 + $0x50] sm:$0xff] (!%p923_p11) }
 0x131   : > { %635 = vst [vmem:[#allocation2 + $0x20] sm:$0xff] %v619_v7  ;;  %643 = vst [vmem:[#allocation2 + $0x60] sm:$0xff] %v627_v8  ;;  %v620_v15 = vadd.f32 %v571_v13, %v379_v5  ;;  %v628_v16 = vadd.f32 %v603_v14, %v387_v6  ;;  %v674_v20 = vadd.f32 (!%p923_p11), %v924_v19, %v651_v17  ;;  %v654_v23 = vld [vmem:[#allocation2 + $0x18] sm:$0xff] (!%p923_p11)  ;;  %v659_v35 = vld [vmem:[#allocation2 + $0x40] sm:$0xff] (!%p923_p11) }
 0x132   : > { %638 = vst [vmem:[#allocation2 + $0x38] sm:$0xff] %v622_v11  ;;  %646 = vst [vmem:[#allocation2 + $0x78] sm:$0xff] %v630_v12  ;;  %v652_v18 = vld [vmem:[#allocation2 + $0x8] sm:$0xff] (!%p923_p11)  ;;  %v677_v26 = vadd.f32 (!%p923_p11), %v924_v19, %v654_v23  ;;  %v692_v38 = vmax.f32 (!%p923_p11), %v676_v25, 0.0  ;;  %v662_v42 = vld [vmem:[#allocation2 + $0x58] sm:$0xff] (!%p923_p11)  ;;  %v682_v47 = vadd.f32 (!%p923_p11), %v924_v19, %v659_v35  ;;  %v684_v52 = vadd.f32 (!%p923_p11), %v924_v19, %v661_v37 }
 0x133   : > { %636 = vst [vmem:[#allocation2 + $0x28] sm:$0xff] %v620_v15  ;;  %644 = vst [vmem:[#allocation2 + $0x68] sm:$0xff] %v628_v16  ;;  %v675_v21 = vadd.f32 (!%p923_p11), %v924_v19, %v652_v18  ;;  %v690_v31 = vmax.f32 (!%p923_p11), %v674_v20, 0.0  ;;  %v660_v36 = vld [vmem:[#allocation2 + $0x48] sm:$0xff] (!%p923_p11)  ;;  %v685_v57 = vadd.f32 (!%p923_p11), %v924_v19, %v662_v42 }
 0x134   : > { %v693_v39 = vmax.f32 %v677_v26, 0.0  ;;  %v683_v51 = vadd.f32 %v924_v19, %v660_v36  ;;  %v698_v56 = vmax.f32 %v682_v47, 0.0  ;;  %v700_v61 = vmax.f32 %v684_v52, 0.0 }
 0x135   : > { %v691_v32 = vmax.f32 %v675_v21, 0.0  ;;  %v701_v63 = vmax.f32 %v685_v57, 0.0 }
 0x136   : > { %v969_v49 = vpack.c.bf16 %v693_v39, %v692_v38  ;;  %v699_v60 = vmax.f32 %v683_v51, 0.0 }
 0x137   : > { %v657_v29 = vld [vmem:[#allocation2 + $0x30] sm:$0xff]  ;;  %v964_v44 = vpack.c.bf16 %v691_v32, %v690_v31  ;;  %v989_v5 = vpack.c.bf16 %v701_v63, %v700_v61 }
 0x138   : > { %v655_v24 = vld [vmem:[#allocation2 + $0x20] sm:$0xff]  ;;  %v680_v34 = vadd.f32 %v924_v19, %v657_v29  ;;  %v665_v53 = vld [vmem:[#allocation2 + $0x70] sm:$0xff]  ;;  %1001 = vst [vmem:[%s1325_s3 + $0x8] sm:$0xff] %v969_v49   ;;  %v984_v3 = vpack.c.bf16 %v699_v60, %v698_v56 }
 0x139   : > { %v678_v28 = vadd.f32 %v924_v19, %v655_v24  ;;  %v658_v30 = vld [vmem:[#allocation2 + $0x38] sm:$0xff]  ;;  %v663_v43 = vld [vmem:[#allocation2 + $0x60] sm:$0xff]  ;;  %965 = vst [vmem:[%s1325_s3] sm:$0xff] %v964_v44   ;;  %v688_v1 = vadd.f32 %v924_v19, %v665_v53  ;;  %1005 = vst [vmem:[%s1325_s3 + $0x28] sm:$0xff] %v989_v5  }
 0x13a   : > { %v656_v27 = vld [vmem:[#allocation2 + $0x28] sm:$0xff]  ;;  %v681_v41 = vadd.f32 %v924_v19, %v658_v30  ;;  %v696_v46 = vmax.f32 %v680_v34, 0.0  ;;  %v666_v54 = vld [vmem:[#allocation2 + $0x78] sm:$0xff]  ;;  %v686_v58 = vadd.f32 %v924_v19, %v663_v43  ;;  %1004 = vst [vmem:[%s1325_s3 + $0x20] sm:$0xff] %v984_v3  }
 0x13b   : > { %v679_v33 = vadd.f32 %v924_v19, %v656_v27  ;;  %v694_v40 = vmax.f32 %v678_v28, 0.0  ;;  %v664_v48 = vld [vmem:[#allocation2 + $0x68] sm:$0xff]  ;;  %v689_v2 = vadd.f32 %v924_v19, %v666_v54  ;;  %v704_v6 = vmax.f32 %v688_v1, 0.0 }
 0x13c   : > { %v697_v50 = vmax.f32 %v681_v41, 0.0  ;;  %v687_v62 = vadd.f32 %v924_v19, %v664_v48  ;;  %v702_v0 = vmax.f32 %v686_v58, 0.0 }
 0x13d   : > { %v695_v45 = vmax.f32 %v679_v33, 0.0  ;;  %v705_v7 = vmax.f32 %v689_v2, 0.0 }
 0x13e   : > { %v979_v59 = vpack.c.bf16 %v697_v50, %v696_v46  ;;  %v703_v4 = vmax.f32 %v687_v62, 0.0 }
 0x13f   : > { %v974_v55 = vpack.c.bf16 %v695_v45, %v694_v40  ;;  %v999_v9 = vpack.c.bf16 %v705_v7, %v704_v6 }
 0x140   : > { %1003 = vst [vmem:[%s1325_s3 + $0x18] sm:$0xff] %v979_v59   ;;  %v994_v8 = vpack.c.bf16 %v703_v4, %v702_v0 }
 0x141   : > { %1002 = vst [vmem:[%s1325_s3 + $0x10] sm:$0xff] %v974_v55   ;;  %1007 = vst [vmem:[%s1325_s3 + $0x38] sm:$0xff] %v999_v9  }
 0x142   : > { %1006 = vst [vmem:[%s1325_s3 + $0x30] sm:$0xff] %v994_v8  }
 0x143 PF: > { %s13_s16 = sadd.s32 1, %s1167_s16   ;;  %s1326_s12 = smov %s1155_s13 }
 0x144   : > { %p10_p12 = scmp.ge.s32.totalorder %s13_s16, 11   ;;  %s1327_s13 = smov %s1225_s20 }
 0x145   : > { %s1328_s14 = smov %s1163_s15  ;;  %s1329_s15 = smov %s1331_s17 }
 0x146   :  { %12 = sbr.rel (!%p10_p12) target bundleno = 3 (0x3), region = 122 }

// kernel: _lambda_.30
= control target key start
LH: loop header
LB: loop body
LE: loop exit
PB: predicated region body
PF: predicated region fallthrough
CT: control target
= control target key end

     0   :  { %s721_s1 = inlined_call_operand.vmem [shape: bf16[128,128], index: 1, kind: input, shape index: {}]   ;;  %s722_s0 = inlined_call_operand.vmem [shape: bf16[128,128], index: 0, kind: input, shape index: {}]   ;;  %s723_s2 = inlined_call_operand.vmem [shape: f32[1,128], index: 2, kind: input, shape index: {}]   ;;  %s724_s3 = inlined_call_operand.vmem [shape: bf16[128,128], index: 3, kind: output, shape index: {}]  }
   0x1   :  { %v610_v0 = vld [vmem:[%s721_s1] sm:$0xff]   ;;  %v611_v1 = vld [vmem:[%s721_s1 + $0x8] sm:$0xff]   ;;  %v612_v2 = vld [vmem:[%s721_s1 + $0x10] sm:$0xff]  }
   0x2   :  { %562 = vmatprep.subr.bf16.mxu0 %v610_v0  ;;  %594 = vmatprep.subr.bf16.mxu1 %v610_v0  ;;  %v613_v3 = vld [vmem:[%s721_s1 + $0x18] sm:$0xff]   ;;  %v618_v4 = vld [vmem:[%s722_s0] sm:$0xff]   ;;  %v615_v7 = vld [vmem:[%s721_s1 + $0x28] sm:$0xff]  }
   0x3   :  { %563 = vmatpush3.bf16.msra.mxu0 %v610_v0  ;;  %602 = vmatpush3.bf16.msra.mxu1 %v610_v0  ;;  %v619_v5 = vld [vmem:[%s722_s0 + $0x20] sm:$0xff]   ;;  %v616_v8 = vld [vmem:[%s721_s1 + $0x30] sm:$0xff]   ;;  %v617_v9 = vld [vmem:[%s721_s1 + $0x38] sm:$0xff]  }
   0x4   :  { %564 = vmatprep.subr.bf16.mxu0 %v611_v1  ;;  %595 = vmatprep.subr.bf16.mxu1 %v611_v1  ;;  %v614_v6 = vld [vmem:[%s721_s1 + $0x20] sm:$0xff]   ;;  %v620_v10 = vld [vmem:[%s722_s0 + $0x8] sm:$0xff]   ;;  %v622_v12 = vld [vmem:[%s722_s0 + $0x10] sm:$0xff]  }
   0x5   :  { %578 = vmatprep.mubr.bf16.mxu0 %v618_v4  ;;  %586 = vmatprep.mubr.bf16.mxu1 %v619_v5  ;;  %v621_v11 = vld [vmem:[%s722_s0 + $0x28] sm:$0xff]   ;;  %v623_v13 = vld [vmem:[%s722_s0 + $0x30] sm:$0xff]   ;;  %v624_v14 = vld [vmem:[%s722_s0 + $0x18] sm:$0xff]  }
   0x6   :  { %v625_v15 = vld [vmem:[%s722_s0 + $0x38] sm:$0xff]   ;;  %v466_v16 = vld [vmem:[%s723_s2] ss:$0 sm:$0xff] }
   0x7   :  { %565 = vmatpush3.bf16.msra.mxu0 %v611_v1  ;;  %603 = vmatpush3.bf16.msra.mxu1 %v611_v1 }
   0x8   :  { %566 = vmatprep.subr.bf16.mxu0 %v612_v2  ;;  %596 = vmatprep.subr.bf16.mxu1 %v612_v2 }
   0xb   :  { %567 = vmatpush3.bf16.msra.mxu0 %v612_v2  ;;  %604 = vmatpush3.bf16.msra.mxu1 %v612_v2 }
   0xc   :  { %568 = vmatprep.subr.bf16.mxu0 %v613_v3  ;;  %597 = vmatprep.subr.bf16.mxu1 %v613_v3 }
   0xf   :  { %569 = vmatpush3.bf16.msra.mxu0 %v613_v3  ;;  %605 = vmatpush3.bf16.msra.mxu1 %v613_v3 }
  0x10   :  { %570 = vmatprep.subr.bf16.mxu0 %v614_v6  ;;  %598 = vmatprep.subr.bf16.mxu1 %v614_v6 }
  0x13   :  { %571 = vmatpush3.bf16.msra.mxu0 %v614_v6  ;;  %606 = vmatpush3.bf16.msra.mxu1 %v614_v6 }
  0x14   :  { %572 = vmatprep.subr.bf16.mxu0 %v615_v7  ;;  %599 = vmatprep.subr.bf16.mxu1 %v615_v7 }
  0x17   :  { %573 = vmatpush3.bf16.msra.mxu0 %v615_v7  ;;  %607 = vmatpush3.bf16.msra.mxu1 %v615_v7 }
  0x18   :  { %574 = vmatprep.subr.bf16.mxu0 %v616_v8  ;;  %600 = vmatprep.subr.bf16.mxu1 %v616_v8 }
  0x1b   :  { %575 = vmatpush3.bf16.msra.mxu0 %v616_v8  ;;  %608 = vmatpush3.bf16.msra.mxu1 %v616_v8 }
  0x1c   :  { %576 = vmatprep.subr.bf16.mxu0 %v617_v9  ;;  %601 = vmatprep.subr.bf16.mxu1 %v617_v9 }
  0x1f   :  { %577 = vmatpush3.bf16.msra.mxu0 %v617_v9  ;;  %609 = vmatpush3.bf16.msra.mxu1 %v617_v9 }
  0x22   :  { %579 = vmatmul.mubr.bf16.vlgmr.msra.gmra.mrb[0].mxu0 %v620_v10  ;;  %587 = vmatmul.mubr.bf16.vlgmr.msra.gmra.mrb[0].mxu1 %v621_v11 }
  0x23   :  { %582 = vmatprep.mubr.bf16.mxu0 %v622_v12  ;;  %590 = vmatprep.mubr.bf16.mxu1 %v623_v13 }
  0x2a   :  { %583 = vmatmul.mubr.bf16.gmra.mrb[4].mxu0 %v624_v14  ;;  %591 = vmatmul.mubr.bf16.gmra.mrb[4].mxu1 %v625_v15 }
  0xf5   :  { %v580_v17 = vpop.f32.mrb[0].mxu0  ;;  %v588_v18 = vpop.f32.mrb[0].mxu1 }
  0xf6   :  { %v336_v19 = vadd.f32 %v580_v17, %v466_v16  ;;  %v344_v20 = vadd.f32 %v588_v18, %v466_v16  ;;  %v213_v21 = vpop.f32.mrb[1].mxu0  ;;  %v245_v22 = vpop.f32.mrb[1].mxu1 }
  0xf7   :  { %v334_v23 = vadd.f32 %v466_v16, %v213_v21  ;;  %v342_v24 = vadd.f32 %v466_v16, %v245_v22  ;;  %v581_v25 = vpop.f32.mrb[2].mxu0  ;;  %v589_v26 = vpop.f32.mrb[2].mxu1 }
  0xf8   :  { %v337_v27 = vadd.f32 %v581_v25, %v466_v16  ;;  %v345_v28 = vadd.f32 %v589_v26, %v466_v16  ;;  %v216_v29 = vpop.f32.mrb[3].mxu0  ;;  %v248_v30 = vpop.f32.mrb[3].mxu1  ;;  %v352_v33 = vmax.f32 %v336_v19, 0.0  ;;  %v360_v34 = vmax.f32 %v344_v20, 0.0 }
  0xf9   :  { %v335_v31 = vadd.f32 %v466_v16, %v216_v29  ;;  %v343_v32 = vadd.f32 %v466_v16, %v248_v30  ;;  %v350_v37 = vmax.f32 %v334_v23, 0.0  ;;  %v358_v38 = vmax.f32 %v342_v24, 0.0 }
  0xfa   :  { %v353_v35 = vmax.f32 %v337_v27, 0.0  ;;  %v361_v36 = vmax.f32 %v345_v28, 0.0 }
  0xfb   :  { %v351_v39 = vmax.f32 %v335_v31, 0.0  ;;  %v359_v40 = vmax.f32 %v343_v32, 0.0 }
  0xfc   :  { %v507_v41 = vpack.c.bf16 %v353_v35, %v352_v33  ;;  %v527_v42 = vpack.c.bf16 %v361_v36, %v360_v34 }
  0xfd   :  { %v502_v43 = vpack.c.bf16 %v351_v39, %v350_v37  ;;  %v522_v44 = vpack.c.bf16 %v359_v40, %v358_v38  ;;  %v584_v45 = vpop.f32.mrb[4].mxu0  ;;  %v592_v46 = vpop.f32.mrb[4].mxu1 }
  0xfe   :  { %539 = vst [vmem:[%s724_s3 + $0x8] sm:$0xff] %v507_v41   ;;  %543 = vst [vmem:[%s724_s3 + $0x28] sm:$0xff] %v527_v42   ;;  %v340_v47 = vadd.f32 %v584_v45, %v466_v16  ;;  %v348_v48 = vadd.f32 %v592_v46, %v466_v16  ;;  %v229_v49 = vpop.f32.mrb[5].mxu0  ;;  %v261_v50 = vpop.f32.mrb[5].mxu1 }
  0xff   :  { %503 = vst [vmem:[%s724_s3] sm:$0xff] %v502_v43   ;;  %542 = vst [vmem:[%s724_s3 + $0x20] sm:$0xff] %v522_v44   ;;  %v338_v51 = vadd.f32 %v466_v16, %v229_v49  ;;  %v346_v52 = vadd.f32 %v466_v16, %v261_v50  ;;  %v585_v53 = vpop.f32.mrb[6].mxu0  ;;  %v593_v54 = vpop.f32.mrb[6].mxu1 }
 0x100   :  { %v341_v55 = vadd.f32 %v585_v53, %v466_v16  ;;  %v349_v56 = vadd.f32 %v593_v54, %v466_v16  ;;  %v232_v57 = vpop.f32.mrb[7].mxu0  ;;  %v264_v58 = vpop.f32.mrb[7].mxu1  ;;  %v356_v61 = vmax.f32 %v340_v47, 0.0  ;;  %v364_v62 = vmax.f32 %v348_v48, 0.0 }
 0x101   :  { %v339_v59 = vadd.f32 %v466_v16, %v232_v57  ;;  %v347_v60 = vadd.f32 %v466_v16, %v264_v58  ;;  %v354_v1 = vmax.f32 %v338_v51, 0.0  ;;  %v362_v2 = vmax.f32 %v346_v52, 0.0 }
 0x102   :  { %v357_v63 = vmax.f32 %v341_v55, 0.0  ;;  %v365_v0 = vmax.f32 %v349_v56, 0.0 }
 0x103   :  { %v355_v3 = vmax.f32 %v339_v59, 0.0  ;;  %v363_v4 = vmax.f32 %v347_v60, 0.0 }
 0x104   :  { %v517_v5 = vpack.c.bf16 %v357_v63, %v356_v61  ;;  %v537_v6 = vpack.c.bf16 %v365_v0, %v364_v62 }
 0x105   :  { %v512_v7 = vpack.c.bf16 %v355_v3, %v354_v1  ;;  %v532_v8 = vpack.c.bf16 %v363_v4, %v362_v2 }
 0x106   :  { %541 = vst [vmem:[%s724_s3 + $0x18] sm:$0xff] %v517_v5   ;;  %545 = vst [vmem:[%s724_s3 + $0x38] sm:$0xff] %v537_v6  }
 0x107   :  { %540 = vst [vmem:[%s724_s3 + $0x10] sm:$0xff] %v512_v7   ;;  %544 = vst [vmem:[%s724_s3 + $0x30] sm:$0xff] %v532_v8  }

// kernel: _lambda_.31
= control target key start
LH: loop header
LB: loop body
LE: loop exit
PB: predicated region body
PF: predicated region fallthrough
CT: control target
= control target key end

     0   :  { %s939_s1 = inlined_call_operand.vmem [shape: bf16[256,128], index: 1, kind: input, shape index: {}]   ;;  %s940_s0 = inlined_call_operand.vmem [shape: bf16[128,256], index: 0, kind: input, shape index: {}]   ;;  %s941_s2 = inlined_call_operand.vmem [shape: f32[1,128], index: 2, kind: input, shape index: {}]   ;;  %s942_s3 = inlined_call_operand.vmem [shape: bf16[128,128], index: 3, kind: output, shape index: {}]  }
   0x1   :  { %v738_v0 = vld [vmem:[%s939_s1 + $0x40] sm:$0xff]   ;;  %v740_v2 = vld [vmem:[%s939_s1 + $0x48] sm:$0xff]   ;;  %v742_v4 = vld [vmem:[%s939_s1 + $0x50] sm:$0xff]  }
   0x2   :  { %v739_v1 = vld [vmem:[%s939_s1] sm:$0xff]   ;;  %658 = vmatprep.subr.bf16.mxu0 %v738_v0  ;;  %722 = vmatprep.subr.bf16.mxu1 %v738_v0  ;;  %v741_v3 = vld [vmem:[%s939_s1 + $0x8] sm:$0xff]   ;;  %v743_v5 = vld [vmem:[%s939_s1 + $0x10] sm:$0xff]  }
   0x3   :  { %659 = vmatpush3.bf16.msra.mxu0 %v739_v1  ;;  %730 = vmatpush3.bf16.msra.mxu1 %v739_v1  ;;  %v744_v6 = vld [vmem:[%s939_s1 + $0x58] sm:$0xff]   ;;  %v746_v8 = vld [vmem:[%s939_s1 + $0x60] sm:$0xff]   ;;  %v748_v10 = vld [vmem:[%s939_s1 + $0x68] sm:$0xff]  }
   0x4   :  { %660 = vmatprep.subr.bf16.mxu0 %v740_v2  ;;  %723 = vmatprep.subr.bf16.mxu1 %v740_v2  ;;  %v745_v7 = vld [vmem:[%s939_s1 + $0x18] sm:$0xff]   ;;  %v747_v9 = vld [vmem:[%s939_s1 + $0x20] sm:$0xff]   ;;  %v749_v13 = vld [vmem:[%s939_s1 + $0x28] sm:$0xff]  }
   0x5   :  { %v756_v11 = vld [vmem:[%s940_s0 + $0x4] ss:$8 sps:$4 sm:$0xff]   ;;  %v750_v14 = vld [vmem:[%s939_s1 + $0x70] sm:$0xff]   ;;  %v752_v16 = vld [vmem:[%s939_s1 + $0x78] sm:$0xff]  }
   0x6   :  { %v759_v12 = vld [vmem:[%s940_s0 + $0x44] ss:$8 sps:$4 sm:$0xff]   ;;  %307 = vmatprep.mubr.bf16.mxu0 %v756_v11  ;;  %v751_v15 = vld [vmem:[%s939_s1 + $0x30] sm:$0xff]   ;;  %v753_v17 = vld [vmem:[%s939_s1 + $0x38] sm:$0xff]  }
   0x7   :  { %661 = vmatpush3.bf16.msra.mxu0 %v741_v3  ;;  %731 = vmatpush3.bf16.msra.mxu1 %v741_v3  ;;  %v754_v18 = vld [vmem:[%s940_s0] ss:$8 sps:$4 sm:$0xff]   ;;  %v760_v20 = vld [vmem:[%s940_s0 + $0x14] ss:$8 sps:$4 sm:$0xff]   ;;  %v764_v22 = vld [vmem:[%s940_s0 + $0x10] ss:$8 sps:$4 sm:$0xff]  }
   0x8   :  { %662 = vmatprep.subr.bf16.mxu0 %v742_v4  ;;  %724 = vmatprep.subr.bf16.mxu1 %v742_v4  ;;  %v757_v19 = vld [vmem:[%s940_s0 + $0x40] ss:$8 sps:$4 sm:$0xff]   ;;  %v762_v21 = vld [vmem:[%s940_s0 + $0x54] ss:$8 sps:$4 sm:$0xff]   ;;  %v765_v23 = vld [vmem:[%s940_s0 + $0x50] ss:$8 sps:$4 sm:$0xff]  }
   0x9   :  { %339 = vmatprep.mubr.bf16.mxu1 %v759_v12  ;;  %v766_v24 = vld [vmem:[%s940_s0 + $0x24] ss:$8 sps:$4 sm:$0xff]   ;;  %v770_v26 = vld [vmem:[%s940_s0 + $0x20] ss:$8 sps:$4 sm:$0xff]   ;;  %v772_v28 = vld [vmem:[%s940_s0 + $0x34] ss:$8 sps:$4 sm:$0xff]  }
   0xa   :  { %v768_v25 = vld [vmem:[%s940_s0 + $0x64] ss:$8 sps:$4 sm:$0xff]   ;;  %v771_v27 = vld [vmem:[%s940_s0 + $0x60] ss:$8 sps:$4 sm:$0xff]   ;;  %v774_v29 = vld [vmem:[%s940_s0 + $0x74] ss:$8 sps:$4 sm:$0xff]  }
   0xb   :  { %663 = vmatpush3.bf16.msra.mxu0 %v743_v5  ;;  %732 = vmatpush3.bf16.msra.mxu1 %v743_v5  ;;  %v776_v30 = vld [vmem:[%s940_s0 + $0x30] ss:$8 sps:$4 sm:$0xff]   ;;  %v897_v35 = vld [vmem:[%s941_s2] ss:$0 sm:$0xff] }
   0xc   :  { %664 = vmatprep.subr.bf16.mxu0 %v744_v6  ;;  %725 = vmatprep.subr.bf16.mxu1 %v744_v6  ;;  %v777_v31 = vld [vmem:[%s940_s0 + $0x70] ss:$8 sps:$4 sm:$0xff]  }
   0xf   :  { %665 = vmatpush3.bf16.msra.mxu0 %v745_v7  ;;  %733 = vmatpush3.bf16.msra.mxu1 %v745_v7 }
  0x10   :  { %666 = vmatprep.subr.bf16.mxu0 %v746_v8  ;;  %726 = vmatprep.subr.bf16.mxu1 %v746_v8 }
  0x13   :  { %667 = vmatpush3.bf16.msra.mxu0 %v747_v9  ;;  %734 = vmatpush3.bf16.msra.mxu1 %v747_v9 }
  0x14   :  { %668 = vmatprep.subr.bf16.mxu0 %v748_v10  ;;  %727 = vmatprep.subr.bf16.mxu1 %v748_v10 }
  0x17   :  { %669 = vmatpush3.bf16.msra.mxu0 %v749_v13  ;;  %735 = vmatpush3.bf16.msra.mxu1 %v749_v13 }
  0x18   :  { %670 = vmatprep.subr.bf16.mxu0 %v750_v14  ;;  %728 = vmatprep.subr.bf16.mxu1 %v750_v14 }
  0x1b   :  { %671 = vmatpush3.bf16.msra.mxu0 %v751_v15  ;;  %736 = vmatpush3.bf16.msra.mxu1 %v751_v15 }
  0x1c   :  { %672 = vmatprep.subr.bf16.mxu0 %v752_v16  ;;  %729 = vmatprep.subr.bf16.mxu1 %v752_v16 }
  0x1f   :  { %673 = vmatpush3.bf16.msra.mxu0 %v753_v17  ;;  %737 = vmatpush3.bf16.msra.mxu1 %v753_v17 }
  0x22   :  { %308 = vmatmul.mubr.bf16.vlgmr.msra.gmra.mrb[0].mxu0 %v754_v18  ;;  %340 = vmatmul.mubr.bf16.vlgmr.msra.gmra.mrb[0].mxu1 %v757_v19 }
  0x23   :  { %315 = vmatprep.mubr.bf16.mxu0 %v760_v20  ;;  %347 = vmatprep.mubr.bf16.mxu1 %v762_v21 }
  0x2a   :  { %316 = vmatmul.mubr.bf16.gmra.mrb[4].mxu0 %v764_v22  ;;  %348 = vmatmul.mubr.bf16.gmra.mrb[4].mxu1 %v765_v23 }
  0x2b   :  { %323 = vmatprep.mubr.bf16.mxu0 %v766_v24  ;;  %355 = vmatprep.mubr.bf16.mxu1 %v768_v25 }
  0x32   :  { %324 = vmatmul.mubr.bf16.gmra.mrb[8].mxu0 %v770_v26  ;;  %356 = vmatmul.mubr.bf16.gmra.mrb[8].mxu1 %v771_v27 }
  0x33   :  { %331 = vmatprep.mubr.bf16.mxu0 %v772_v28  ;;  %363 = vmatprep.mubr.bf16.mxu1 %v774_v29 }
  0x3a   :  { %332 = vmatmul.mubr.bf16.gmra.mrb[12].mxu0 %v776_v30  ;;  %364 = vmatmul.mubr.bf16.gmra.mrb[12].mxu1 %v777_v31 }
  0xf5   :  { %v674_v32 = vpop.f32.mrb[0].mxu0  ;;  %v698_v33 = vpop.f32.mrb[0].mxu1 }
  0xf6   :  { %v675_v34 = vpop.f32.mrb[1].mxu0  ;;  %v699_v36 = vpop.f32.mrb[1].mxu1 }
  0xf7   :  { %v676_v37 = vadd.f32 %v675_v34, %v674_v32  ;;  %v700_v38 = vadd.f32 %v699_v36, %v698_v33  ;;  %v677_v39 = vpop.f32.mrb[2].mxu0  ;;  %v701_v40 = vpop.f32.mrb[2].mxu1 }
  0xf8   :  { %v678_v41 = vpop.f32.mrb[3].mxu0  ;;  %v702_v42 = vpop.f32.mrb[3].mxu1 }
  0xf9   :  { %v430_v43 = vadd.f32 %v676_v37, %v897_v35  ;;  %v438_v44 = vadd.f32 %v700_v38, %v897_v35  ;;  %v679_v45 = vadd.f32 %v678_v41, %v677_v39  ;;  %v703_v46 = vadd.f32 %v702_v42, %v701_v40 }
  0xfb   :  { %v431_v47 = vadd.f32 %v679_v45, %v897_v35  ;;  %v439_v48 = vadd.f32 %v703_v46, %v897_v35  ;;  %v446_v49 = vmax.f32 %v430_v43, 0.0  ;;  %v454_v50 = vmax.f32 %v438_v44, 0.0 }
  0xfd   :  { %v447_v51 = vmax.f32 %v431_v47, 0.0  ;;  %v455_v52 = vmax.f32 %v439_v48, 0.0  ;;  %v680_v53 = vpop.f32.mrb[4].mxu0  ;;  %v704_v54 = vpop.f32.mrb[4].mxu1 }
  0xfe   :  { %v681_v55 = vpop.f32.mrb[5].mxu0  ;;  %v705_v56 = vpop.f32.mrb[5].mxu1 }
  0xff   :  { %v614_v57 = vpack.c.bf16 %v447_v51, %v446_v49  ;;  %v634_v58 = vpack.c.bf16 %v455_v52, %v454_v50  ;;  %v682_v59 = vadd.f32 %v681_v55, %v680_v53  ;;  %v706_v60 = vadd.f32 %v705_v56, %v704_v54  ;;  %v683_v61 = vpop.f32.mrb[6].mxu0  ;;  %v707_v62 = vpop.f32.mrb[6].mxu1 }
 0x100   :  { %v684_v63 = vpop.f32.mrb[7].mxu0  ;;  %v708_v0 = vpop.f32.mrb[7].mxu1 }
 0x101   :  { %615 = vst [vmem:[%s942_s3] sm:$0xff] %v614_v57   ;;  %654 = vst [vmem:[%s942_s3 + $0x20] sm:$0xff] %v634_v58   ;;  %v432_v1 = vadd.f32 %v682_v59, %v897_v35  ;;  %v440_v2 = vadd.f32 %v706_v60, %v897_v35  ;;  %v685_v3 = vadd.f32 %v684_v63, %v683_v61 }
 0x102   :  { %v709_v4 = vadd.f32 %v708_v0, %v707_v62 }
 0x103   :  { %v433_v5 = vadd.f32 %v685_v3, %v897_v35  ;;  %v448_v7 = vmax.f32 %v432_v1, 0.0  ;;  %v456_v8 = vmax.f32 %v440_v2, 0.0 }
 0x104   :  { %v441_v6 = vadd.f32 %v709_v4, %v897_v35 }
 0x105   :  { %v449_v9 = vmax.f32 %v433_v5, 0.0  ;;  %v686_v11 = vpop.f32.mrb[8].mxu0  ;;  %v710_v12 = vpop.f32.mrb[8].mxu1 }
 0x106   :  { %v457_v10 = vmax.f32 %v441_v6, 0.0  ;;  %v687_v13 = vpop.f32.mrb[9].mxu0  ;;  %v711_v14 = vpop.f32.mrb[9].mxu1 }
 0x107   :  { %v619_v15 = vpack.c.bf16 %v449_v9, %v448_v7  ;;  %v688_v17 = vadd.f32 %v687_v13, %v686_v11  ;;  %v712_v18 = vadd.f32 %v711_v14, %v710_v12  ;;  %v689_v19 = vpop.f32.mrb[10].mxu0  ;;  %v713_v20 = vpop.f32.mrb[10].mxu1 }
 0x108   :  { %v639_v16 = vpack.c.bf16 %v457_v10, %v456_v8  ;;  %v690_v21 = vpop.f32.mrb[11].mxu0  ;;  %v714_v22 = vpop.f32.mrb[11].mxu1 }
 0x109   :  { %651 = vst [vmem:[%s942_s3 + $0x8] sm:$0xff] %v619_v15   ;;  %v434_v23 = vadd.f32 %v688_v17, %v897_v35  ;;  %v442_v24 = vadd.f32 %v712_v18, %v897_v35  ;;  %v691_v25 = vadd.f32 %v690_v21, %v689_v19  ;;  %v715_v26 = vadd.f32 %v714_v22, %v713_v20 }
 0x10a   :  { %655 = vst [vmem:[%s942_s3 + $0x28] sm:$0xff] %v639_v16  }
 0x10b   :  { %v435_v27 = vadd.f32 %v691_v25, %v897_v35  ;;  %v443_v28 = vadd.f32 %v715_v26, %v897_v35  ;;  %v450_v29 = vmax.f32 %v434_v23, 0.0  ;;  %v458_v30 = vmax.f32 %v442_v24, 0.0 }
 0x10d   :  { %v451_v31 = vmax.f32 %v435_v27, 0.0  ;;  %v459_v32 = vmax.f32 %v443_v28, 0.0  ;;  %v692_v33 = vpop.f32.mrb[12].mxu0  ;;  %v716_v34 = vpop.f32.mrb[12].mxu1 }
 0x10e   :  { %v693_v36 = vpop.f32.mrb[13].mxu0  ;;  %v717_v37 = vpop.f32.mrb[13].mxu1 }
 0x10f   :  { %v624_v38 = vpack.c.bf16 %v451_v31, %v450_v29  ;;  %v644_v39 = vpack.c.bf16 %v459_v32, %v458_v30  ;;  %v694_v40 = vadd.f32 %v693_v36, %v692_v33  ;;  %v718_v41 = vadd.f32 %v717_v37, %v716_v34  ;;  %v695_v42 = vpop.f32.mrb[14].mxu0  ;;  %v719_v43 = vpop.f32.mrb[14].mxu1 }
 0x110   :  { %v696_v44 = vpop.f32.mrb[15].mxu0  ;;  %v720_v45 = vpop.f32.mrb[15].mxu1 }
 0x111   :  { %652 = vst [vmem:[%s942_s3 + $0x10] sm:$0xff] %v624_v38   ;;  %656 = vst [vmem:[%s942_s3 + $0x30] sm:$0xff] %v644_v39   ;;  %v436_v46 = vadd.f32 %v694_v40, %v897_v35  ;;  %v444_v47 = vadd.f32 %v718_v41, %v897_v35  ;;  %v697_v48 = vadd.f32 %v696_v44, %v695_v42 }
 0x112   :  { %v721_v49 = vadd.f32 %v720_v45, %v719_v43 }
 0x113   :  { %v437_v50 = vadd.f32 %v697_v48, %v897_v35  ;;  %v452_v52 = vmax.f32 %v436_v46, 0.0  ;;  %v460_v53 = vmax.f32 %v444_v47, 0.0 }
 0x114   :  { %v445_v51 = vadd.f32 %v721_v49, %v897_v35 }
 0x115   :  { %v453_v54 = vmax.f32 %v437_v50, 0.0 }
 0x116   :  { %v461_v55 = vmax.f32 %v445_v51, 0.0 }
 0x117   :  { %v629_v56 = vpack.c.bf16 %v453_v54, %v452_v52 }
 0x118   :  { %v649_v57 = vpack.c.bf16 %v461_v55, %v460_v53 }
 0x119   :  { %653 = vst [vmem:[%s942_s3 + $0x18] sm:$0xff] %v629_v56  }
 0x11a   :  { %657 = vst [vmem:[%s942_s3 + $0x38] sm:$0xff] %v649_v57  }

// kernel: _lambda_.36
= control target key start
LH: loop header
LB: loop body
LE: loop exit
PB: predicated region body
PF: predicated region fallthrough
CT: control target
= control target key end

     0   :  { %s1212_s12 = smov 0   ;;  %s1214_s13 = smov 0   ;;  %s1346_s0 = inlined_call_operand.vmem [shape: bf16[512,128], index: 0, kind: input, shape index: {}]   ;;  %s1347_s1 = inlined_call_operand.vmem [shape: bf16[128,128], index: 1, kind: input, shape index: {}]   ;;  %s1348_s2 = inlined_call_operand.vmem [shape: f32[1,128], index: 2, kind: input, shape index: {}]   ;;  %s1349_s3 = inlined_call_operand.vmem [shape: bf16[512,128], index: 3, kind: output, shape index: {}]  }
   0x1   :  { %s1216_s14 = smov 0  }
   0x2 LB: > { %s32_s15 = sadd.s32 1, %s1186_s13  ;;  %p1000_p0 = scmp.ge.s32.totalorder %s1190_s14, 1  ;;  %s1190_s14 = sphi %s1216_s14, %s13_s14   ;;  %s1186_s13 = sphi %s1214_s13, %s1351_s13   ;;  %s1182_s12 = sphi %s1212_s12, %s1350_s12  }
   0x3   : > { %p34_p1 = scmp.ge.s32.totalorder %s32_s15, 2  ;;  %p188_p2 = scmp.lt.s32.totalorder %s1190_s14, 3 }
   0x5   : > { %s1353_s15 = smov (%p34_p1, %s32_s15), 0  ;;  %p189_p3 = pnand %p1000_p0, %p188_p2 }
   0x6   : > { %v1144_v0 = vld [vmem:[%s1347_s1] sm:$0xff] (!%p189_p3)   ;;  %s1001_s18 = sshll.u32 (!%p189_p3), %s1182_s12, 5  ;;  %v1145_v1 = vld [vmem:[%s1347_s1 + $0x8] sm:$0xff] (!%p189_p3)   ;;  %v1146_v2 = vld [vmem:[%s1347_s1 + $0x10] sm:$0xff] (!%p189_p3)   ;;  %s1003_s10 = sshll.u32 (!%p189_p3), %s1182_s12, 4 }
   0x7   : > { %192 = sbr.rel (%p189_p3) target bundleno = 285 (0x11d), region = 32  ;;  %p230_p4 = scmp.lt.s32.totalorder (!%p189_p3), %s1001_s18, 63  ;;  %1056 = vmatprep.subr.bf16.mxu0 (!%p189_p3), %v1144_v0  ;;  %1104 = vmatprep.subr.bf16.mxu1 (!%p189_p3), %v1144_v0  ;;  %v1147_v3 = vld [vmem:[%s1347_s1 + $0x18] sm:$0xff] (!%p189_p3)   ;;  %v1148_v6 = vld [vmem:[%s1347_s1 + $0x20] sm:$0xff] (!%p189_p3)   ;;  %v1149_v7 = vld [vmem:[%s1347_s1 + $0x28] sm:$0xff] (!%p189_p3)  }
   0x8   : > { %1057 = vmatpush3.bf16.msra.mxu0 (!%p189_p3), %v1144_v0  ;;  %1112 = vmatpush3.bf16.msra.mxu1 (!%p189_p3), %v1144_v0  ;;  %v1150_v8 = vld [vmem:[%s1347_s1 + $0x30] sm:$0xff] (!%p189_p3)   ;;  %v1151_v9 = vld [vmem:[%s1347_s1 + $0x38] sm:$0xff] (!%p189_p3)   ;;  %p251_p5 = scmp.lt.s32.totalorder (!%p189_p3), %s1003_s10, 31  ;;  %v1282_v24 = vld [vmem:[%s1348_s2] ss:$0 sm:$0xff] (!%p189_p3) }
   0x9   : > { %1058 = vmatprep.subr.bf16.mxu0 (!%p189_p3), %v1145_v1  ;;  %1105 = vmatprep.subr.bf16.mxu1 (!%p189_p3), %v1145_v1 }
   0xc   : > { %1059 = vmatpush3.bf16.msra.mxu0 (!%p189_p3), %v1145_v1  ;;  %1113 = vmatpush3.bf16.msra.mxu1 (!%p189_p3), %v1145_v1 }
   0xd   : > { %1060 = vmatprep.subr.bf16.mxu0 (!%p189_p3), %v1146_v2  ;;  %1106 = vmatprep.subr.bf16.mxu1 (!%p189_p3), %v1146_v2 }
   0xe   : > { %s1355_s18 = smov (!%p230_p4, %s1001_s18), 63  ;;  %s1357_s10 = smov (!%p251_p5, %s1003_s10), 31 }
   0xf   : > { %s1002_s23 = sshll.u32 %s1355_s18, 2  ;;  %s1004_s12 = sshll.u32 %s1357_s10, 3 }
  0x10   : > { %s1245_s26 = scalar_lea.vmem %s1346_s0, %s1002_s23  ;;  %1061 = vmatpush3.bf16.msra.mxu0 %v1146_v2  ;;  %1114 = vmatpush3.bf16.msra.mxu1 %v1146_v2  ;;  %s1295_s19 = scalar_lea.vmem %s1349_s3, %s1004_s12 }
  0x11   : > { %v1152_v4 = vld [vmem:[%s1245_s26] sm:$0xff]   ;;  %1062 = vmatprep.subr.bf16.mxu0 %v1147_v3  ;;  %1107 = vmatprep.subr.bf16.mxu1 %v1147_v3  ;;  %v1154_v10 = vld [vmem:[%s1245_s26 + $0x8] sm:$0xff]   ;;  %v1156_v12 = vld [vmem:[%s1245_s26 + $0x10] sm:$0xff]  }
  0x12   : > { %v1153_v5 = vld [vmem:[%s1245_s26 + $0x40] sm:$0xff]   ;;  %1072 = vmatprep.mubr.bf16.mxu0 %v1152_v4  ;;  %v1155_v11 = vld [vmem:[%s1245_s26 + $0x48] sm:$0xff]   ;;  %v1157_v13 = vld [vmem:[%s1245_s26 + $0x50] sm:$0xff]  }
  0x13   : > { %1088 = vmatprep.mubr.bf16.mxu1 %v1153_v5  ;;  %v1158_v14 = vld [vmem:[%s1245_s26 + $0x18] sm:$0xff]   ;;  %v1160_v16 = vld [vmem:[%s1245_s26 + $0x20] sm:$0xff]   ;;  %v1162_v18 = vld [vmem:[%s1245_s26 + $0x28] sm:$0xff]  }
  0x14   : > { %1063 = vmatpush3.bf16.msra.mxu0 %v1147_v3  ;;  %1115 = vmatpush3.bf16.msra.mxu1 %v1147_v3  ;;  %v1159_v15 = vld [vmem:[%s1245_s26 + $0x58] sm:$0xff]   ;;  %v1161_v17 = vld [vmem:[%s1245_s26 + $0x60] sm:$0xff]   ;;  %v1163_v19 = vld [vmem:[%s1245_s26 + $0x68] sm:$0xff]  }
  0x15   : > { %1064 = vmatprep.subr.bf16.mxu0 %v1148_v6  ;;  %1108 = vmatprep.subr.bf16.mxu1 %v1148_v6  ;;  %v1164_v20 = vld [vmem:[%s1245_s26 + $0x30] sm:$0xff]   ;;  %v1166_v22 = vld [vmem:[%s1245_s26 + $0x38] sm:$0xff]  }
  0x16   : > { %v1165_v21 = vld [vmem:[%s1245_s26 + $0x70] sm:$0xff]   ;;  %v1167_v23 = vld [vmem:[%s1245_s26 + $0x78] sm:$0xff]  }
  0x18   : > { %1065 = vmatpush3.bf16.msra.mxu0 %v1148_v6  ;;  %1116 = vmatpush3.bf16.msra.mxu1 %v1148_v6 }
  0x19   : > { %1066 = vmatprep.subr.bf16.mxu0 %v1149_v7  ;;  %1109 = vmatprep.subr.bf16.mxu1 %v1149_v7 }
  0x1c   : > { %1067 = vmatpush3.bf16.msra.mxu0 %v1149_v7  ;;  %1117 = vmatpush3.bf16.msra.mxu1 %v1149_v7 }
  0x1d   : > { %1068 = vmatprep.subr.bf16.mxu0 %v1150_v8  ;;  %1110 = vmatprep.subr.bf16.mxu1 %v1150_v8 }
  0x20   : > { %1069 = vmatpush3.bf16.msra.mxu0 %v1150_v8  ;;  %1118 = vmatpush3.bf16.msra.mxu1 %v1150_v8 }
  0x21   : > { %1070 = vmatprep.subr.bf16.mxu0 %v1151_v9  ;;  %1111 = vmatprep.subr.bf16.mxu1 %v1151_v9 }
  0x24   : > { %1071 = vmatpush3.bf16.msra.mxu0 %v1151_v9  ;;  %1119 = vmatpush3.bf16.msra.mxu1 %v1151_v9 }
  0x27   : > { %1073 = vmatmul.mubr.bf16.vlgmr.msra.gmra.mrb[0].mxu0 %v1154_v10  ;;  %1089 = vmatmul.mubr.bf16.vlgmr.msra.gmra.mrb[0].mxu1 %v1155_v11 }
  0x28   : > { %1076 = vmatprep.mubr.bf16.mxu0 %v1156_v12  ;;  %1092 = vmatprep.mubr.bf16.mxu1 %v1157_v13 }
  0x2f   : > { %1077 = vmatmul.mubr.bf16.gmra.mrb[4].mxu0 %v1158_v14  ;;  %1093 = vmatmul.mubr.bf16.gmra.mrb[4].mxu1 %v1159_v15 }
  0x30   : > { %1080 = vmatprep.mubr.bf16.mxu0 %v1160_v16  ;;  %1096 = vmatprep.mubr.bf16.mxu1 %v1161_v17 }
  0x37   : > { %1081 = vmatmul.mubr.bf16.gmra.mrb[8].mxu0 %v1162_v18  ;;  %1097 = vmatmul.mubr.bf16.gmra.mrb[8].mxu1 %v1163_v19 }
  0x38   : > { %1084 = vmatprep.mubr.bf16.mxu0 %v1164_v20  ;;  %1100 = vmatprep.mubr.bf16.mxu1 %v1165_v21 }
  0x3f   : > { %1085 = vmatmul.mubr.bf16.gmra.mrb[12].mxu0 %v1166_v22  ;;  %1101 = vmatmul.mubr.bf16.gmra.mrb[12].mxu1 %v1167_v23 }
  0xfa   : > { %v1074_v25 = vpop.f32.mrb[0].mxu0  ;;  %v1090_v26 = vpop.f32.mrb[0].mxu1 }
  0xfb   : > { %v789_v27 = vadd.f32 %v1074_v25, %v1282_v24  ;;  %v805_v28 = vadd.f32 %v1090_v26, %v1282_v24  ;;  %v554_v29 = vpop.f32.mrb[1].mxu0  ;;  %v618_v30 = vpop.f32.mrb[1].mxu1 }
  0xfc   : > { %v787_v31 = vadd.f32 %v1282_v24, %v554_v29  ;;  %v803_v32 = vadd.f32 %v1282_v24, %v618_v30  ;;  %v1075_v33 = vpop.f32.mrb[2].mxu0  ;;  %v1091_v34 = vpop.f32.mrb[2].mxu1 }
  0xfd   : > { %v790_v35 = vadd.f32 %v1075_v33, %v1282_v24  ;;  %v806_v36 = vadd.f32 %v1091_v34, %v1282_v24  ;;  %v557_v37 = vpop.f32.mrb[3].mxu0  ;;  %v621_v38 = vpop.f32.mrb[3].mxu1  ;;  %v821_v41 = vmax.f32 %v789_v27, 0.0  ;;  %v837_v42 = vmax.f32 %v805_v28, 0.0 }
  0xfe   : > { %v788_v39 = vadd.f32 %v1282_v24, %v557_v37  ;;  %v804_v40 = vadd.f32 %v1282_v24, %v621_v38  ;;  %v819_v45 = vmax.f32 %v787_v31, 0.0  ;;  %v835_v46 = vmax.f32 %v803_v32, 0.0 }
  0xff   : > { %v822_v43 = vmax.f32 %v790_v35, 0.0  ;;  %v838_v44 = vmax.f32 %v806_v36, 0.0 }
 0x100   : > { %v820_v47 = vmax.f32 %v788_v39, 0.0  ;;  %v836_v48 = vmax.f32 %v804_v40, 0.0 }
 0x101   : > { %v852_v49 = vpack.c.bf16 %v822_v43, %v821_v41  ;;  %v860_v50 = vpack.c.bf16 %v838_v44, %v837_v42 }
 0x102   : > { %v851_v51 = vpack.c.bf16 %v820_v47, %v819_v45  ;;  %v859_v52 = vpack.c.bf16 %v836_v48, %v835_v46  ;;  %v1078_v53 = vpop.f32.mrb[4].mxu0  ;;  %v1094_v54 = vpop.f32.mrb[4].mxu1 }
 0x103   : > { %868 = vst [vmem:[%s1295_s19 + $0x8] sm:$0xff] %v852_v49  ;;  %876 = vst [vmem:[%s1295_s19 + $0x48] sm:$0xff] %v860_v50  ;;  %v793_v55 = vadd.f32 %v1078_v53, %v1282_v24  ;;  %v809_v56 = vadd.f32 %v1094_v54, %v1282_v24  ;;  %v570_v57 = vpop.f32.mrb[5].mxu0  ;;  %v634_v58 = vpop.f32.mrb[5].mxu1 }
 0x104   : > { %867 = vst [vmem:[%s1295_s19] sm:$0xff] %v851_v51  ;;  %875 = vst [vmem:[%s1295_s19 + $0x40] sm:$0xff] %v859_v52  ;;  %v791_v59 = vadd.f32 %v1282_v24, %v570_v57  ;;  %v807_v60 = vadd.f32 %v1282_v24, %v634_v58  ;;  %v1079_v61 = vpop.f32.mrb[6].mxu0  ;;  %v1095_v62 = vpop.f32.mrb[6].mxu1 }
 0x105   : > { %v794_v63 = vadd.f32 %v1079_v61, %v1282_v24  ;;  %v810_v0 = vadd.f32 %v1095_v62, %v1282_v24  ;;  %v573_v1 = vpop.f32.mrb[7].mxu0  ;;  %v637_v2 = vpop.f32.mrb[7].mxu1  ;;  %v825_v5 = vmax.f32 %v793_v55, 0.0  ;;  %v841_v6 = vmax.f32 %v809_v56, 0.0 }
 0x106   : > { %v792_v3 = vadd.f32 %v1282_v24, %v573_v1  ;;  %v808_v4 = vadd.f32 %v1282_v24, %v637_v2  ;;  %v823_v9 = vmax.f32 %v791_v59, 0.0  ;;  %v839_v10 = vmax.f32 %v807_v60, 0.0 }
 0x107   : > { %v826_v7 = vmax.f32 %v794_v63, 0.0  ;;  %v842_v8 = vmax.f32 %v810_v0, 0.0 }
 0x108   : > { %v824_v11 = vmax.f32 %v792_v3, 0.0  ;;  %v840_v12 = vmax.f32 %v808_v4, 0.0 }
 0x109   : > { %v854_v13 = vpack.c.bf16 %v826_v7, %v825_v5  ;;  %v862_v14 = vpack.c.bf16 %v842_v8, %v841_v6 }
 0x10a   : > { %v853_v15 = vpack.c.bf16 %v824_v11, %v823_v9  ;;  %v861_v16 = vpack.c.bf16 %v840_v12, %v839_v10  ;;  %v1082_v17 = vpop.f32.mrb[8].mxu0  ;;  %v1098_v18 = vpop.f32.mrb[8].mxu1 }
 0x10b   : > { %870 = vst [vmem:[%s1295_s19 + $0x18] sm:$0xff] %v854_v13  ;;  %878 = vst [vmem:[%s1295_s19 + $0x58] sm:$0xff] %v862_v14  ;;  %v797_v19 = vadd.f32 %v1082_v17, %v1282_v24  ;;  %v813_v20 = vadd.f32 %v1098_v18, %v1282_v24  ;;  %v586_v21 = vpop.f32.mrb[9].mxu0  ;;  %v650_v22 = vpop.f32.mrb[9].mxu1 }
 0x10c   : > { %869 = vst [vmem:[%s1295_s19 + $0x10] sm:$0xff] %v853_v15  ;;  %877 = vst [vmem:[%s1295_s19 + $0x50] sm:$0xff] %v861_v16  ;;  %v795_v23 = vadd.f32 %v1282_v24, %v586_v21  ;;  %v811_v25 = vadd.f32 %v1282_v24, %v650_v22  ;;  %v1083_v26 = vpop.f32.mrb[10].mxu0  ;;  %v1099_v27 = vpop.f32.mrb[10].mxu1 }
 0x10d   : > { %v798_v28 = vadd.f32 %v1083_v26, %v1282_v24  ;;  %v814_v29 = vadd.f32 %v1099_v27, %v1282_v24  ;;  %v589_v30 = vpop.f32.mrb[11].mxu0  ;;  %v653_v31 = vpop.f32.mrb[11].mxu1  ;;  %v829_v34 = vmax.f32 %v797_v19, 0.0  ;;  %v845_v35 = vmax.f32 %v813_v20, 0.0 }
 0x10e   : > { %v796_v32 = vadd.f32 %v1282_v24, %v589_v30  ;;  %v812_v33 = vadd.f32 %v1282_v24, %v653_v31  ;;  %v827_v38 = vmax.f32 %v795_v23, 0.0  ;;  %v843_v39 = vmax.f32 %v811_v25, 0.0 }
 0x10f   : > { %v830_v36 = vmax.f32 %v798_v28, 0.0  ;;  %v846_v37 = vmax.f32 %v814_v29, 0.0 }
 0x110   : > { %v828_v40 = vmax.f32 %v796_v32, 0.0  ;;  %v844_v41 = vmax.f32 %v812_v33, 0.0 }
 0x111   : > { %v856_v42 = vpack.c.bf16 %v830_v36, %v829_v34  ;;  %v864_v43 = vpack.c.bf16 %v846_v37, %v845_v35 }
 0x112   : > { %v855_v44 = vpack.c.bf16 %v828_v40, %v827_v38  ;;  %v863_v45 = vpack.c.bf16 %v844_v41, %v843_v39  ;;  %v1086_v46 = vpop.f32.mrb[12].mxu0  ;;  %v1102_v47 = vpop.f32.mrb[12].mxu1 }
 0x113   : > { %872 = vst [vmem:[%s1295_s19 + $0x28] sm:$0xff] %v856_v42  ;;  %880 = vst [vmem:[%s1295_s19 + $0x68] sm:$0xff] %v864_v43  ;;  %v801_v48 = vadd.f32 %v1086_v46, %v1282_v24  ;;  %v817_v49 = vadd.f32 %v1102_v47, %v1282_v24  ;;  %v602_v50 = vpop.f32.mrb[13].mxu0  ;;  %v666_v51 = vpop.f32.mrb[13].mxu1 }
 0x114   : > { %871 = vst [vmem:[%s1295_s19 + $0x20] sm:$0xff] %v855_v44  ;;  %879 = vst [vmem:[%s1295_s19 + $0x60] sm:$0xff] %v863_v45  ;;  %v799_v52 = vadd.f32 %v1282_v24, %v602_v50  ;;  %v815_v53 = vadd.f32 %v1282_v24, %v666_v51  ;;  %v1087_v54 = vpop.f32.mrb[14].mxu0  ;;  %v1103_v55 = vpop.f32.mrb[14].mxu1 }
 0x115   : > { %v802_v56 = vadd.f32 %v1087_v54, %v1282_v24  ;;  %v818_v57 = vadd.f32 %v1103_v55, %v1282_v24  ;;  %v605_v58 = vpop.f32.mrb[15].mxu0  ;;  %v669_v59 = vpop.f32.mrb[15].mxu1  ;;  %v833_v62 = vmax.f32 %v801_v48, 0.0  ;;  %v849_v63 = vmax.f32 %v817_v49, 0.0 }
 0x116   : > { %v800_v60 = vadd.f32 %v1282_v24, %v605_v58  ;;  %v816_v61 = vadd.f32 %v1282_v24, %v669_v59  ;;  %v831_v2 = vmax.f32 %v799_v52, 0.0  ;;  %v847_v3 = vmax.f32 %v815_v53, 0.0 }
 0x117   : > { %v834_v0 = vmax.f32 %v802_v56, 0.0  ;;  %v850_v1 = vmax.f32 %v818_v57, 0.0 }
 0x118   : > { %v832_v4 = vmax.f32 %v800_v60, 0.0  ;;  %v848_v5 = vmax.f32 %v816_v61, 0.0 }
 0x119   : > { %v858_v6 = vpack.c.bf16 %v834_v0, %v833_v62  ;;  %v866_v7 = vpack.c.bf16 %v850_v1, %v849_v63 }
 0x11a   : > { %v857_v8 = vpack.c.bf16 %v832_v4, %v831_v2  ;;  %v865_v9 = vpack.c.bf16 %v848_v5, %v847_v3 }
 0x11b   : > { %874 = vst [vmem:[%s1295_s19 + $0x38] sm:$0xff] %v858_v6  ;;  %882 = vst [vmem:[%s1295_s19 + $0x78] sm:$0xff] %v866_v7 }
 0x11c   : > { %873 = vst [vmem:[%s1295_s19 + $0x30] sm:$0xff] %v857_v8  ;;  %881 = vst [vmem:[%s1295_s19 + $0x70] sm:$0xff] %v865_v9 }
 0x11d PF: > { %s13_s14 = sadd.s32 1, %s1190_s14   ;;  %s1350_s12 = smov %s1186_s13 }
 0x11e   : > { %p10_p6 = scmp.ge.s32.totalorder %s13_s14, 4   ;;  %s1351_s13 = smov %s1353_s15 }
 0x120   :  { %12 = sbr.rel (!%p10_p6) target bundleno = 2 (0x2), region = 76 }

</bundles_post_ra>
